<compile_context>
chip_gen: v5e
topology: v5e:2x2
jax: 0.10.0
libtpu: 0.0.40
codegen_flags: <defaults>
</compile_context>

<pallas_src>
import functools

import numpy as np
import jax
import jax.numpy as jnp
from jax.experimental import pallas as pl
from jax.experimental.pallas import tpu as pltpu


# ---------------------------------------------------------------------------
# Pallas kernels
# ---------------------------------------------------------------------------
def _matmul_kernel(x_ref, w_ref, o_ref, *, relu):
    acc = jnp.dot(x_ref[...], w_ref[...], preferred_element_type=jnp.float32)
    if relu:
        acc = jnp.maximum(acc, 0.0)
    o_ref[...] = acc.astype(o_ref.dtype)


def pallas_matmul(x, w, *, relu, out_dtype=jnp.bfloat16):
    """Grid-less single-block matmul: x (M,K) @ w (K,N) -> (M,N).
    bf16 operands on the MXU, f32 accumulation, fused ReLU.  Blocks are the full
    arrays, so no K/M padding or post-slice passes are needed around the call."""
    m, k = x.shape
    k2, n = w.shape
    assert k == k2, (x.shape, w.shape)
    x = x.astype(jnp.bfloat16)
    out_bytes = jnp.dtype(out_dtype).itemsize
    return pl.pallas_call(
        functools.partial(_matmul_kernel, relu=relu),
        out_shape=jax.ShapeDtypeStruct((m, n), out_dtype),
        cost_estimate=pl.CostEstimate(
            flops=2 * m * k * n,
            transcendentals=0,
            bytes_accessed=(m * k + k * n) * 2 + m * n * out_bytes),
    )(x, w)


def _gap_fc_kernel(x_ref, w_ref, b_ref, o_ref, *, inv):
    # Global average pool over (H, W) fused with the final Linear layer.
    feat = jnp.sum(x_ref[...].astype(jnp.float32), axis=(1, 2)) * inv      # (N, C)
    acc = jnp.dot(feat.astype(jnp.bfloat16), w_ref[...],
                  preferred_element_type=jnp.float32)
    o_ref[...] = acc + b_ref[...]


def gap_fc(x, fc_w, fc_b):
    """AdaptiveAvgPool2d((1,1)) + flatten(1) + Linear, in one pallas_call."""
    n, h, w, c = x.shape
    ncls = fc_w.shape[1]
    return pl.pallas_call(
        functools.partial(_gap_fc_kernel, inv=1.0 / float(h * w)),
        out_shape=jax.ShapeDtypeStruct((n, ncls), jnp.float32),
        cost_estimate=pl.CostEstimate(
            flops=2 * n * c * ncls + n * h * w * c,
            transcendentals=0,
            bytes_accessed=n * h * w * c * 2 + c * ncls * 2 + n * ncls * 4),
    )(x, fc_w, fc_b)


def _pool_kernel(x_ref, o_ref, *, k, ho, wo, mode, inv):
    # x_ref: (1, Hp, Wp, C) NHWC tile; stride-1 window reduce inside the kernel.
    if mode == "max":
        x = x_ref[...]                       # bf16 reduce (native VALU on v6e/v7x)
        acc = x[:, 0:ho, 0:wo, :]
        for i in range(k):
            for j in range(k):
                if i == 0 and j == 0:
                    continue
                acc = jnp.maximum(acc, x[:, i:i + ho, j:j + wo, :])
        o_ref[...] = acc.astype(o_ref.dtype)
    else:  # avg, count_include_pad=True semantics (always divide by k*k)
        x = x_ref[...].astype(jnp.float32)
        acc = jnp.zeros((1, ho, wo, x.shape[-1]), jnp.float32)
        for i in range(k):
            for j in range(k):
                acc = acc + x[:, i:i + ho, j:j + wo, :]
        o_ref[...] = (acc * inv).astype(o_ref.dtype)


def pool2d(x, ksize, stride, padding, mode):
    """NHWC pooling.  Stride-1 window reduce in Pallas; stride-2 subsample outside
    (identical to floor-mode pooling since the stride-1 grid is a superset)."""
    n, h, w, c = x.shape
    if mode == "max":
        assert padding == 0, "max pools in Inception-v3 use padding=0"
    if padding:
        x = jnp.pad(x, ((0, 0), (padding, padding), (padding, padding), (0, 0)))
    hp, wp = h + 2 * padding, w + 2 * padding
    ho1, wo1 = hp - ksize + 1, wp - ksize + 1          # stride-1 output size
    out = pl.pallas_call(
        functools.partial(_pool_kernel, k=ksize, ho=ho1, wo=wo1, mode=mode,
                          inv=1.0 / float(ksize * ksize)),
        grid=(n,),
        in_specs=[pl.BlockSpec((1, hp, wp, c), lambda b: (b, 0, 0, 0))],
        out_specs=pl.BlockSpec((1, ho1, wo1, c), lambda b: (b, 0, 0, 0)),
        out_shape=jax.ShapeDtypeStruct((n, ho1, wo1, c), x.dtype),
        compiler_params=pltpu.CompilerParams(dimension_semantics=("parallel",)),
    )(x)
    if stride > 1:
        out = out[:, ::stride, ::stride, :]
    return out


# ---------------------------------------------------------------------------
# im2col (NHWC) in plain JAX; 1x1 convs are a pure reshape (no materialization)
# ---------------------------------------------------------------------------
def _im2col_nhwc(x, kh, kw, stride, ph, pw):
    n, h, w, c = x.shape
    if ph or pw:
        x = jnp.pad(x, ((0, 0), (ph, ph), (pw, pw), (0, 0)))
    hp, wp = h + 2 * ph, w + 2 * pw
    ho = (hp - kh) // stride + 1
    wo = (wp - kw) // stride + 1
    if kh == 1 and kw == 1 and stride == 1:
        return x.reshape(n * ho * wo, c), ho, wo
    taps = []
    for i in range(kh):
        for j in range(kw):
            taps.append(x[:, i:i + stride * ho:stride, j:j + stride * wo:stride, :])
    p = jnp.concatenate(taps, axis=-1)                 # (N, Ho, Wo, kh*kw*C)
    return p.reshape(n * ho * wo, kh * kw * c), ho, wo


def apply_basic_conv(x, p):
    n = x.shape[0]
    patches, ho, wo = _im2col_nhwc(x, p["kh"], p["kw"], p["stride"], p["ph"], p["pw"])
    out = pallas_matmul(patches, p["w"], relu=True, out_dtype=jnp.bfloat16)
    return out.reshape(n, ho, wo, p["w"].shape[1])


# ---------------------------------------------------------------------------
# Deterministic parameter construction (synthetic, NOT a checkpoint load)
# ---------------------------------------------------------------------------
class _KeyGen:
    def __init__(self, key):
        self._key = key
        self._n = 0

    def __call__(self):
        self._n += 1
        return jax.random.fold_in(self._key, self._n)


def make_basic_conv(kg, cin, cout, kernel_size, stride=1, padding=0):
    kh, kw = (kernel_size, kernel_size) if isinstance(kernel_size, int) else kernel_size
    ph, pw = (padding, padding) if isinstance(padding, int) else padding
    fan_in = cin * kh * kw
    w = jax.random.normal(kg(), (cout, cin, kh, kw), jnp.float32) * np.sqrt(2.0 / fan_in)
    # weight layout: w2d[(i*kw + j)*cin + c_in, c_out], matching the im2col tap order.
    # BatchNorm2d(eps=1e-3) eval mode, default stats (gamma=1, beta=0, mean=0, var=1)
    # folds to a pure scale 1/sqrt(1+eps); shift is zero -> folded into the weight.
    w2d = w.transpose(2, 3, 1, 0).reshape(kh * kw * cin, cout) * (1.0 / np.sqrt(1.0 + 1e-3))
    return dict(w=w2d.astype(jnp.bfloat16), kh=kh, kw=kw, stride=stride, ph=ph, pw=pw)


def make_inception_a(kg, cin, pool_features):
    return dict(
        # fused sibling 1x1 convs: branch1x1(64) | branch5x5_1(48) | branch3x3dbl_1(64)
        f1x1=make_basic_conv(kg, cin, 64 + 48 + 64, 1),
        splits=(64, 48, 64),
        b5_2=make_basic_conv(kg, 48, 64, 5, padding=2),
        b3d_2=make_basic_conv(kg, 64, 96, 3, padding=1),
        b3d_3=make_basic_conv(kg, 96, 96, 3, padding=1),
        bp=make_basic_conv(kg, cin, pool_features, 1),
    )


def make_inception_b(kg, cin):
    return dict(
        b3=make_basic_conv(kg, cin, 384, 3, stride=2),
        b3d_1=make_basic_conv(kg, cin, 64, 1),
        b3d_2=make_basic_conv(kg, 64, 96, 3, padding=1),
        b3d_3=make_basic_conv(kg, 96, 96, 3, stride=2),
    )


def make_inception_c(kg, cin, c7):
    return dict(
        # fused 1x1: branch1x1(192) | branch7x7_1(c7) | branch7x7dbl_1(c7)
        f1x1=make_basic_conv(kg, cin, 192 + c7 + c7, 1),
        splits=(192, c7, c7),
        b7_2=make_basic_conv(kg, c7, c7, (1, 7), padding=(0, 3)),
        b7_3=make_basic_conv(kg, c7, 192, (7, 1), padding=(3, 0)),
        b7d_2=make_basic_conv(kg, c7, c7, (7, 1), padding=(3, 0)),
        b7d_3=make_basic_conv(kg, c7, c7, (1, 7), padding=(0, 3)),
        b7d_4=make_basic_conv(kg, c7, c7, (7, 1), padding=(3, 0)),
        b7d_5=make_basic_conv(kg, c7, 192, (1, 7), padding=(0, 3)),
        bp=make_basic_conv(kg, cin, 192, 1),
    )


def make_inception_d(kg, cin):
    return dict(
        # fused 1x1: branch3x3_1(192) | branch7x7x3_1(192)
        f1x1=make_basic_conv(kg, cin, 192 + 192, 1),
        splits=(192, 192),
        b3_2=make_basic_conv(kg, 192, 320, 3, stride=2),
        b7x3_2=make_basic_conv(kg, 192, 192, (1, 7), padding=(0, 3)),
        b7x3_3=make_basic_conv(kg, 192, 192, (7, 1), padding=(3, 0)),
        b7x3_4=make_basic_conv(kg, 192, 192, 3, stride=2),
    )


def make_inception_e(kg, cin):
    return dict(
        # fused 1x1: branch1x1(320) | branch3x3_1(384) | branch3x3dbl_1(448)
        f1x1=make_basic_conv(kg, cin, 320 + 384 + 448, 1),
        splits=(320, 384, 448),
        b3_2a=make_basic_conv(kg, 384, 384, (1, 3), padding=(0, 1)),
        b3_2b=make_basic_conv(kg, 384, 384, (3, 1), padding=(1, 0)),
        b3d_2=make_basic_conv(kg, 448, 384, 3, padding=1),
        b3d_3a=make_basic_conv(kg, 384, 384, (1, 3), padding=(0, 1)),
        b3d_3b=make_basic_conv(kg, 384, 384, (3, 1), padding=(1, 0)),
        bp=make_basic_conv(kg, cin, 192, 1),
    )


def make_inception_v3(key, num_classes=1000):
    kg = _KeyGen(key)
    P = {}
    P["Conv2d_1a_3x3"] = make_basic_conv(kg, 3, 32, 3, stride=2)
    P["Conv2d_2a_3x3"] = make_basic_conv(kg, 32, 32, 3)
    P["Conv2d_2b_3x3"] = make_basic_conv(kg, 32, 64, 3, padding=1)
    P["Conv2d_3b_1x1"] = make_basic_conv(kg, 64, 80, 1)
    P["Conv2d_4a_3x3"] = make_basic_conv(kg, 80, 192, 3)
    P["Mixed_5b"] = make_inception_a(kg, 192, 32)
    P["Mixed_5c"] = make_inception_a(kg, 256, 64)
    P["Mixed_5d"] = make_inception_a(kg, 288, 64)
    P["Mixed_6a"] = make_inception_b(kg, 288)
    P["Mixed_6b"] = make_inception_c(kg, 768, 128)
    P["Mixed_6c"] = make_inception_c(kg, 768, 160)
    P["Mixed_6d"] = make_inception_c(kg, 768, 160)
    P["Mixed_6e"] = make_inception_c(kg, 768, 192)
    P["Mixed_7a"] = make_inception_d(kg, 768)
    P["Mixed_7b"] = make_inception_e(kg, 1280)
    P["Mixed_7c"] = make_inception_e(kg, 2048)
    kw_, kb_ = jax.random.split(kg())
    bound = 1.0 / np.sqrt(2048.0)               # nn.Linear default init bounds
    fc_w = jax.random.uniform(kw_, (2048, num_classes), jnp.float32, -bound, bound)
    fc_b = jax.random.uniform(kb_, (1, num_classes), jnp.float32, -bound, bound)
    P["fc_w"] = fc_w.astype(jnp.bfloat16)       # unpadded (K, num_classes)
    P["fc_b"] = fc_b                            # unpadded (1, num_classes) f32
    P["num_classes"] = num_classes
    return P


# ---------------------------------------------------------------------------
# Forward pass (mirrors TraceInceptionV3.forward), activations NHWC / bf16
# ---------------------------------------------------------------------------
def apply_inception_a(x, p):
    f = apply_basic_conv(x, p["f1x1"])
    c1, c2, _ = p["splits"]
    b1 = f[..., :c1]
    b5 = apply_basic_conv(f[..., c1:c1 + c2], p["b5_2"])
    b3 = apply_basic_conv(apply_basic_conv(f[..., c1 + c2:], p["b3d_2"]), p["b3d_3"])
    bp = apply_basic_conv(pool2d(x, 3, 1, 1, "avg"), p["bp"])
    return jnp.concatenate([b1, b5, b3, bp], axis=-1)


def apply_inception_b(x, p):
    b3 = apply_basic_conv(x, p["b3"])
    b3d = x
    for k in ("b3d_1", "b3d_2", "b3d_3"):
        b3d = apply_basic_conv(b3d, p[k])
    bp = pool2d(x, 3, 2, 0, "max")
    return jnp.concatenate([b3, b3d, bp], axis=-1)


def apply_inception_c(x, p):
    f = apply_basic_conv(x, p["f1x1"])
    c1, c2, _ = p["splits"]
    b1 = f[..., :c1]
    b7 = f[..., c1:c1 + c2]
    for k in ("b7_2", "b7_3"):
        b7 = apply_basic_conv(b7, p[k])
    b7d = f[..., c1 + c2:]
    for k in ("b7d_2", "b7d_3", "b7d_4", "b7d_5"):
        b7d = apply_basic_conv(b7d, p[k])
    bp = apply_basic_conv(pool2d(x, 3, 1, 1, "avg"), p["bp"])
    return jnp.concatenate([b1, b7, b7d, bp], axis=-1)


def apply_inception_d(x, p):
    f = apply_basic_conv(x, p["f1x1"])
    c1, _ = p["splits"]
    b3 = apply_basic_conv(f[..., :c1], p["b3_2"])
    b7 = f[..., c1:]
    for k in ("b7x3_2", "b7x3_3", "b7x3_4"):
        b7 = apply_basic_conv(b7, p[k])
    bp = pool2d(x, 3, 2, 0, "max")
    return jnp.concatenate([b3, b7, bp], axis=-1)


def apply_inception_e(x, p):
    f = apply_basic_conv(x, p["f1x1"])
    c1, c2, _ = p["splits"]
    b1 = f[..., :c1]
    b3 = f[..., c1:c1 + c2]
    b3 = jnp.concatenate([apply_basic_conv(b3, p["b3_2a"]),
                          apply_basic_conv(b3, p["b3_2b"])], axis=-1)
    b3d = apply_basic_conv(f[..., c1 + c2:], p["b3d_2"])
    b3d = jnp.concatenate([apply_basic_conv(b3d, p["b3d_3a"]),
                           apply_basic_conv(b3d, p["b3d_3b"])], axis=-1)
    bp = apply_basic_conv(pool2d(x, 3, 1, 1, "avg"), p["bp"])
    return jnp.concatenate([b1, b3, b3d, bp], axis=-1)


def inception_v3_forward(x_nchw, P):
    # NCHW -> NHWC once at the boundary, bf16 activations thereafter.
    x = jnp.transpose(x_nchw, (0, 2, 3, 1)).astype(jnp.bfloat16)
    # features()
    x = apply_basic_conv(x, P["Conv2d_1a_3x3"])
    x = apply_basic_conv(x, P["Conv2d_2a_3x3"])
    x = apply_basic_conv(x, P["Conv2d_2b_3x3"])
    x = pool2d(x, 3, 2, 0, "max")                  # maxpool1
    x = apply_basic_conv(x, P["Conv2d_3b_1x1"])
    x = apply_basic_conv(x, P["Conv2d_4a_3x3"])
    x = pool2d(x, 3, 2, 0, "max")                  # maxpool2
    x = apply_inception_a(x, P["Mixed_5b"])
    x = apply_inception_a(x, P["Mixed_5c"])
    x = apply_inception_a(x, P["Mixed_5d"])
    x = apply_inception_b(x, P["Mixed_6a"])
    x = apply_inception_c(x, P["Mixed_6b"])
    x = apply_inception_c(x, P["Mixed_6c"])
    x = apply_inception_c(x, P["Mixed_6d"])
    x = apply_inception_c(x, P["Mixed_6e"])
    x = apply_inception_d(x, P["Mixed_7a"])
    x = apply_inception_e(x, P["Mixed_7b"])
    x = apply_inception_e(x, P["Mixed_7c"])
    # avgpool + dropout(eval: identity) + flatten(1) + fc, fused in one kernel.
    return gap_fc(x, P["fc_w"], P["fc_b"])


if __name__ == "__main__":
    key = jax.random.PRNGKey(0)
    pkey, xkey = jax.random.split(key)
    params = make_inception_v3(pkey, num_classes=1000)
    # 75x75 is the minimum spatial size the Inception-v3 downsampling chain admits.
    x = jax.random.normal(xkey, (2, 3, 75, 75), jnp.float32)
    logits = inception_v3_forward(x, params)
    logits = jax.block_until_ready(logits)
    assert logits.shape == (2, 1000)
    assert bool(jnp.all(jnp.isfinite(logits)))
    print("KERNEL_OK")
</pallas_src>

<mosaic_0001>
module attributes {stable_mosaic.version = 11 : i64} {
  func.func @_matmul_kernel(%arg0: memref<2738x27xbf16, #tpu.memory_space<vmem>>, %arg1: memref<27x32xbf16, #tpu.memory_space<vmem>>, %arg2: memref<2738x32xbf16, #tpu.memory_space<vmem>>) attributes {dimension_semantics = [], scalar_prefetch = 0 : i64, scratch_operands = 0 : i64, tpu.core_type = #tpu.core_type<tc>} {
    %c0 = arith.constant 0 : index
    %c0_0 = arith.constant 0 : index
    %0 = vector.load %arg0[%c0, %c0_0] : memref<2738x27xbf16, #tpu.memory_space<vmem>>, vector<2738x27xbf16>
    %c0_1 = arith.constant 0 : index
    %c0_2 = arith.constant 0 : index
    %1 = vector.load %arg1[%c0_1, %c0_2] : memref<27x32xbf16, #tpu.memory_space<vmem>>, vector<27x32xbf16>
    %cst = arith.constant dense<0.000000e+00> : vector<2738x32xf32>
    %2 = tpu.matmul %0, %1, %cst {dimension_numbers = #tpu.dot_dimension_numbers<[1], [0], [0], [1], [0, 0, 1, 1], [], []>} : vector<2738x27xbf16>, vector<27x32xbf16>, vector<2738x32xf32> -> vector<2738x32xf32>
    %cst_3 = arith.constant 0.000000e+00 : f32
    %3 = vector.broadcast %cst_3 : f32 to vector<2738x32xf32>
    %4 = arith.maximumf %2, %3 : vector<2738x32xf32>
    %5 = arith.truncf %4 : vector<2738x32xf32> to vector<2738x32xbf16>
    %c0_4 = arith.constant 0 : index
    %c0_5 = arith.constant 0 : index
    %6 = vector.load %arg2[%c0_4, %c0_5] : memref<2738x32xbf16, #tpu.memory_space<vmem>>, vector<2738x32xbf16>
    tpu.vector_store %arg2[%c0_4, %c0_5], %5 {strides = array<i32>} : memref<2738x32xbf16, #tpu.memory_space<vmem>>, vector<2738x32xbf16>,
    return
  }
}

</mosaic_0001>

<bundles_post_ra>
// kernel: tpu_custom_call.1
= control target key start
LH: loop header
LB: loop body
LE: loop exit
PB: predicated region body
PF: predicated region fallthrough
CT: control target
= control target key end

     0   :  { %vm1745_vm0 = vcmask 1044480   ;;  %vm1746_vm1 = vcmask 1045504   ;;  %v4699_v2 = vmov 65535   ;;  %vm1228_vm2 = vcmask 220160   ;;  %s6783_s1 = inlined_call_operand.vmem [shape: bf16[27,32], index: 1, kind: input, shape index: {}]   ;;  %s6784_s0 = inlined_call_operand.vmem [shape: bf16[2738,27], index: 0, kind: input, shape index: {}]   ;;  %s6785_s2 = inlined_call_operand.vmem [shape: bf16[2738,32], index: 2, kind: output, shape index: {}]  }
   0x1   :  { %v4345_v0 = vld [vmem:[%s6783_s1 + $0x8] sm:$0xf]  ;;  %v4691_v1 = vld [vmem:[%s6783_s1 + $0x8] sm:$0x30]  ;;  %v1747_v3 = vsel %vm1745_vm0, 4294967295, %v4699_v2  ;;  %v4690_v7 = vld [vmem:[%s6783_s1] sm:$0xff] }
   0x2   :  { %v4346_v4 = vor.u32 %v4691_v1, %v4345_v0  ;;  %v1748_v5 = vsel %vm1746_vm1, %v1747_v3, 0  ;;  %v4519_v8 = vld [vmem:[%s6784_s0] sm:$0xff]  ;;  %v4562_v9 = vld [vmem:[%s6784_s0 + $0x158] sm:$0xff]  ;;  %v4605_v10 = vld [vmem:[%s6784_s0 + $0x2b0] sm:$0xff]  ;;  %vm3306_vm3 = vcmask 257024   ;;  %vm3649_vm4 = vcmask 253952  }
   0x3   :  { %v4648_v11 = vld [vmem:[%s6784_s0 + $0x408] sm:$0xff]  ;;  %v4563_v13 = vld [vmem:[%s6784_s0 + $0x160] sm:$0xff]  ;;  %v4606_v14 = vld [vmem:[%s6784_s0 + $0x2b8] sm:$0xff] }
   0x4   :  { %v1750_v6 = vand.u32 %v4346_v4, %v1748_v5  ;;  %v4520_v12 = vld [vmem:[%s6784_s0 + $0x8] sm:$0xff]  ;;  %v4649_v15 = vld [vmem:[%s6784_s0 + $0x410] sm:$0xff]  ;;  %v4607_v18 = vld [vmem:[%s6784_s0 + $0x2c0] sm:$0xff] }
   0x5   :  { %v4521_v16 = vld [vmem:[%s6784_s0 + $0x10] sm:$0xff]  ;;  %v4564_v17 = vld [vmem:[%s6784_s0 + $0x168] sm:$0xff]  ;;  %v4650_v19 = vld [vmem:[%s6784_s0 + $0x418] sm:$0xff] }
   0x6   :  { %1758 = vmatpush.bf16.msra.mxu0 %v1750_v6  ;;  %4692 = vmatpush.bf16.msra.mxu1 %v1750_v6  ;;  %v4522_v20 = vld [vmem:[%s6784_s0 + $0x18] sm:$0xff]  ;;  %v4565_v21 = vld [vmem:[%s6784_s0 + $0x170] sm:$0xff]  ;;  %v4608_v22 = vld [vmem:[%s6784_s0 + $0x2c8] sm:$0xff] }
   0x7   :  { %4693 = vmatpush.bf16.msra.mxu2 %v1750_v6  ;;  %4694 = vmatpush.bf16.msra.mxu3 %v1750_v6  ;;  %v4651_v23 = vld [vmem:[%s6784_s0 + $0x420] sm:$0xff]  ;;  %v4566_v25 = vld [vmem:[%s6784_s0 + $0x178] sm:$0xff]  ;;  %v4609_v26 = vld [vmem:[%s6784_s0 + $0x2d0] sm:$0xff] }
   0x8   :  { %v4523_v24 = vld [vmem:[%s6784_s0 + $0x20] sm:$0xff]  ;;  %v4652_v27 = vld [vmem:[%s6784_s0 + $0x428] sm:$0xff]  ;;  %v4610_v30 = vld [vmem:[%s6784_s0 + $0x2d8] sm:$0xff] }
   0x9   :  { %v4524_v28 = vld [vmem:[%s6784_s0 + $0x28] sm:$0xff]  ;;  %v4567_v29 = vld [vmem:[%s6784_s0 + $0x180] sm:$0xff]  ;;  %v4653_v31 = vld [vmem:[%s6784_s0 + $0x430] sm:$0xff] }
   0xa   :  { %1759 = vmatpush.bf16.msra.mxu0 %v4690_v7  ;;  %4695 = vmatpush.bf16.msra.mxu1 %v4690_v7  ;;  %v4525_v32 = vld [vmem:[%s6784_s0 + $0x30] sm:$0xff]  ;;  %v4568_v33 = vld [vmem:[%s6784_s0 + $0x188] sm:$0xff]  ;;  %v4611_v34 = vld [vmem:[%s6784_s0 + $0x2e0] sm:$0xff] }
   0xb   :  { %4696 = vmatpush.bf16.msra.mxu2 %v4690_v7  ;;  %4697 = vmatpush.bf16.msra.mxu3 %v4690_v7  ;;  %v4654_v35 = vld [vmem:[%s6784_s0 + $0x438] sm:$0xff]  ;;  %v4569_v37 = vld [vmem:[%s6784_s0 + $0x190] sm:$0xff]  ;;  %v4612_v38 = vld [vmem:[%s6784_s0 + $0x2e8] sm:$0xff] }
   0xc   :  { %v4526_v36 = vld [vmem:[%s6784_s0 + $0x38] sm:$0xff]  ;;  %v4655_v39 = vld [vmem:[%s6784_s0 + $0x440] sm:$0xff]  ;;  %v4613_v44 = vld [vmem:[%s6784_s0 + $0x2f0] sm:$0xff] }
   0xd   :  { %4347 = vmatmul.msk.bf16.vlgmr.msra.gmra.mxu0 %vm1228_vm2, %v4519_v8  ;;  %4390 = vmatmul.msk.bf16.vlgmr.msra.gmra.mxu1 %vm1228_vm2, %v4562_v9  ;;  %v4527_v40 = vld [vmem:[%s6784_s0 + $0x40] sm:$0xff]  ;;  %v4570_v41 = vld [vmem:[%s6784_s0 + $0x198] sm:$0xff]  ;;  %v4656_v45 = vld [vmem:[%s6784_s0 + $0x448] sm:$0xff] }
   0xe   :  { %4433 = vmatmul.msk.bf16.vlgmr.msra.gmra.mxu2 %vm1228_vm2, %v4605_v10  ;;  %4476 = vmatmul.msk.bf16.vlgmr.msra.gmra.mxu3 %vm1228_vm2, %v4648_v11  ;;  %v4528_v0 = vld [vmem:[%s6784_s0 + $0x48] sm:$0xff]  ;;  %v4571_v1 = vld [vmem:[%s6784_s0 + $0x1a0] sm:$0xff]  ;;  %v4614_v6 = vld [vmem:[%s6784_s0 + $0x2f8] sm:$0xff] }
   0xf   :  { %v4657_v7 = vld [vmem:[%s6784_s0 + $0x450] sm:$0xff] }
  0x1d   :  { %4348 = vmatmul.msk.bf16.gmra.mxu0 %vm1228_vm2, %v4520_v12  ;;  %4391 = vmatmul.msk.bf16.gmra.mxu1 %vm1228_vm2, %v4563_v13 }
  0x1e   :  { %4434 = vmatmul.msk.bf16.gmra.mxu2 %vm1228_vm2, %v4606_v14  ;;  %4477 = vmatmul.msk.bf16.gmra.mxu3 %vm1228_vm2, %v4649_v15 }
  0x2d   :  { %4349 = vmatmul.msk.bf16.gmra.mxu0 %vm1228_vm2, %v4521_v16  ;;  %4392 = vmatmul.msk.bf16.gmra.mxu1 %vm1228_vm2, %v4564_v17 }
  0x2e   :  { %4435 = vmatmul.msk.bf16.gmra.mxu2 %vm1228_vm2, %v4607_v18  ;;  %4478 = vmatmul.msk.bf16.gmra.mxu3 %vm1228_vm2, %v4650_v19 }
  0x3d   :  { %4350 = vmatmul.msk.bf16.gmra.mxu0 %vm1228_vm2, %v4522_v20  ;;  %4393 = vmatmul.msk.bf16.gmra.mxu1 %vm1228_vm2, %v4565_v21 }
  0x3e   :  { %4436 = vmatmul.msk.bf16.gmra.mxu2 %vm1228_vm2, %v4608_v22  ;;  %4479 = vmatmul.msk.bf16.gmra.mxu3 %vm1228_vm2, %v4651_v23 }
  0x4d   :  { %4351 = vmatmul.msk.bf16.gmra.mxu0 %vm1228_vm2, %v4523_v24  ;;  %4394 = vmatmul.msk.bf16.gmra.mxu1 %vm1228_vm2, %v4566_v25 }
  0x4e   :  { %4437 = vmatmul.msk.bf16.gmra.mxu2 %vm1228_vm2, %v4609_v26  ;;  %4480 = vmatmul.msk.bf16.gmra.mxu3 %vm1228_vm2, %v4652_v27 }
  0x5d   :  { %4352 = vmatmul.msk.bf16.gmra.mxu0 %vm1228_vm2, %v4524_v28  ;;  %4395 = vmatmul.msk.bf16.gmra.mxu1 %vm1228_vm2, %v4567_v29  ;;  %v4529_v28 = vld [vmem:[%s6784_s0 + $0x50] sm:$0xff]  ;;  %v4572_v29 = vld [vmem:[%s6784_s0 + $0x1a8] sm:$0xff] }
  0x5e   :  { %4438 = vmatmul.msk.bf16.gmra.mxu2 %vm1228_vm2, %v4610_v30  ;;  %4481 = vmatmul.msk.bf16.gmra.mxu3 %vm1228_vm2, %v4653_v31 }
  0x6d   :  { %4353 = vmatmul.msk.bf16.gmra.mxu0 %vm1228_vm2, %v4525_v32  ;;  %4396 = vmatmul.msk.bf16.gmra.mxu1 %vm1228_vm2, %v4568_v33 }
  0x6e   :  { %4439 = vmatmul.msk.bf16.gmra.mxu2 %vm1228_vm2, %v4611_v34  ;;  %4482 = vmatmul.msk.bf16.gmra.mxu3 %vm1228_vm2, %v4654_v35  ;;  %v4615_v34 = vld [vmem:[%s6784_s0 + $0x300] sm:$0xff]  ;;  %v4658_v35 = vld [vmem:[%s6784_s0 + $0x458] sm:$0xff] }
  0x7d   :  { %4354 = vmatmul.msk.bf16.gmra.mxu0 %vm1228_vm2, %v4526_v36  ;;  %4397 = vmatmul.msk.bf16.gmra.mxu1 %vm1228_vm2, %v4569_v37 }
  0x7e   :  { %4440 = vmatmul.msk.bf16.gmra.mxu2 %vm1228_vm2, %v4612_v38  ;;  %4483 = vmatmul.msk.bf16.gmra.mxu3 %vm1228_vm2, %v4655_v39 }
  0x8a   :  { %v1761_v42 = vpop.f32.mrf.mxu0  ;;  %v1976_v43 = vpop.f32.mrf.mxu1 }
  0x8b   :  { %v2620_v46 = vmax.f32 %v1761_v42, 0.0  ;;  %v2706_v47 = vmax.f32 %v1976_v43, 0.0 }
  0x8d   :  { %v2963_v48 = vpack.c.bf16 %v2620_v46, %v2620_v46  ;;  %v3049_v49 = vpack.c.bf16 %v2706_v47, %v2706_v47  ;;  %4355 = vmatmul.msk.bf16.gmra.mxu0 %vm1228_vm2, %v4527_v40  ;;  %4398 = vmatmul.msk.bf16.gmra.mxu1 %vm1228_vm2, %v4570_v41 }
  0x8e   :  { %4441 = vmatmul.msk.bf16.gmra.mxu2 %vm1228_vm2, %v4613_v44  ;;  %4484 = vmatmul.msk.bf16.gmra.mxu3 %vm1228_vm2, %v4656_v45 }
  0x8f   :  { %3307 = vst.msk [vmem:[%s6785_s2] sm:$0xf] %vm3306_vm3, %v2963_v48 }
  0x90   :  { %3393 = vst.msk [vmem:[%s6785_s2 + $0x158] sm:$0xf] %vm3306_vm3, %v3049_v49 }
  0x91   :  { %v2191_v50 = vpop.f32.mrf.mxu2  ;;  %v2406_v51 = vpop.f32.mrf.mxu3 }
  0x92   :  { %v2792_v52 = vmax.f32 %v2191_v50, 0.0  ;;  %v2878_v53 = vmax.f32 %v2406_v51, 0.0  ;;  %v1763_v54 = vpop.f32.mrf.mxu0  ;;  %v1978_v55 = vpop.f32.mrf.mxu1 }
  0x93   :  { %v2621_v56 = vmax.f32 %v1763_v54, 0.0  ;;  %v2707_v57 = vmax.f32 %v1978_v55, 0.0 }
  0x94   :  { %v3135_v58 = vpack.c.bf16 %v2792_v52, %v2792_v52  ;;  %v3221_v59 = vpack.c.bf16 %v2878_v53, %v2878_v53 }
  0x95   :  { %v2964_v60 = vpack.c.bf16 %v2621_v56, %v2621_v56  ;;  %v3050_v61 = vpack.c.bf16 %v2707_v57, %v2707_v57  ;;  %v4530_v56 = vld [vmem:[%s6784_s0 + $0x58] sm:$0xff]  ;;  %v4573_v57 = vld [vmem:[%s6784_s0 + $0x1b0] sm:$0xff] }
  0x96   :  { %3479 = vst.msk [vmem:[%s6785_s2 + $0x2b0] sm:$0xf] %vm3306_vm3, %v3135_v58 }
  0x97   :  { %3565 = vst.msk [vmem:[%s6785_s2 + $0x408] sm:$0xf] %vm3306_vm3, %v3221_v59 }
  0x98   :  { %3308 = vst.msk [vmem:[%s6785_s2 + $0x4] sm:$0xf] %vm3306_vm3, %v2964_v60 }
  0x99   :  { %3394 = vst.msk [vmem:[%s6785_s2 + $0x15c] sm:$0xf] %vm3306_vm3, %v3050_v61  ;;  %v2193_v62 = vpop.f32.mrf.mxu2  ;;  %v2408_v63 = vpop.f32.mrf.mxu3 }
  0x9a   :  { %v2793_v2 = vmax.f32 %v2193_v62, 0.0  ;;  %v2879_v3 = vmax.f32 %v2408_v63, 0.0  ;;  %v1766_v4 = vpop.f32.mrf.mxu0  ;;  %v1981_v5 = vpop.f32.mrf.mxu1  ;;  %v4616_v62 = vld [vmem:[%s6784_s0 + $0x308] sm:$0xff]  ;;  %v4659_v63 = vld [vmem:[%s6784_s0 + $0x460] sm:$0xff] }
  0x9b   :  { %v2622_v8 = vmax.f32 %v1766_v4, 0.0  ;;  %v2708_v9 = vmax.f32 %v1981_v5, 0.0 }
  0x9c   :  { %v3136_v10 = vpack.c.bf16 %v2793_v2, %v2793_v2  ;;  %v3222_v11 = vpack.c.bf16 %v2879_v3, %v2879_v3 }
  0x9d   :  { %v2965_v12 = vpack.c.bf16 %v2622_v8, %v2622_v8  ;;  %v3051_v13 = vpack.c.bf16 %v2708_v9, %v2708_v9  ;;  %4356 = vmatmul.msk.bf16.gmra.mxu0 %vm1228_vm2, %v4528_v0  ;;  %4399 = vmatmul.msk.bf16.gmra.mxu1 %vm1228_vm2, %v4571_v1 }
  0x9e   :  { %3480 = vst.msk [vmem:[%s6785_s2 + $0x2b4] sm:$0xf] %vm3306_vm3, %v3136_v10  ;;  %4442 = vmatmul.msk.bf16.gmra.mxu2 %vm1228_vm2, %v4614_v6  ;;  %4485 = vmatmul.msk.bf16.gmra.mxu3 %vm1228_vm2, %v4657_v7 }
  0x9f   :  { %3566 = vst.msk [vmem:[%s6785_s2 + $0x40c] sm:$0xf] %vm3306_vm3, %v3222_v11 }
  0xa0   :  { %3309 = vst.msk [vmem:[%s6785_s2 + $0x8] sm:$0xf] %vm3306_vm3, %v2965_v12 }
  0xa1   :  { %3395 = vst.msk [vmem:[%s6785_s2 + $0x160] sm:$0xf] %vm3306_vm3, %v3051_v13  ;;  %v2196_v14 = vpop.f32.mrf.mxu2  ;;  %v2411_v15 = vpop.f32.mrf.mxu3 }
  0xa2   :  { %v2794_v16 = vmax.f32 %v2196_v14, 0.0  ;;  %v2880_v17 = vmax.f32 %v2411_v15, 0.0  ;;  %v1768_v18 = vpop.f32.mrf.mxu0  ;;  %v1983_v19 = vpop.f32.mrf.mxu1 }
  0xa3   :  { %v2623_v20 = vmax.f32 %v1768_v18, 0.0  ;;  %v2709_v21 = vmax.f32 %v1983_v19, 0.0 }
  0xa4   :  { %v3137_v22 = vpack.c.bf16 %v2794_v16, %v2794_v16  ;;  %v3223_v23 = vpack.c.bf16 %v2880_v17, %v2880_v17 }
  0xa5   :  { %v2966_v24 = vpack.c.bf16 %v2623_v20, %v2623_v20  ;;  %v3052_v25 = vpack.c.bf16 %v2709_v21, %v2709_v21  ;;  %v4531_v20 = vld [vmem:[%s6784_s0 + $0x60] sm:$0xff]  ;;  %v4574_v21 = vld [vmem:[%s6784_s0 + $0x1b8] sm:$0xff] }
  0xa6   :  { %3481 = vst.msk [vmem:[%s6785_s2 + $0x2b8] sm:$0xf] %vm3306_vm3, %v3137_v22 }
  0xa7   :  { %3567 = vst.msk [vmem:[%s6785_s2 + $0x410] sm:$0xf] %vm3306_vm3, %v3223_v23 }
  0xa8   :  { %3310 = vst.msk [vmem:[%s6785_s2 + $0xc] sm:$0xf] %vm3306_vm3, %v2966_v24 }
  0xa9   :  { %3396 = vst.msk [vmem:[%s6785_s2 + $0x164] sm:$0xf] %vm3306_vm3, %v3052_v25  ;;  %v2198_v26 = vpop.f32.mrf.mxu2  ;;  %v2413_v27 = vpop.f32.mrf.mxu3 }
  0xaa   :  { %v2795_v30 = vmax.f32 %v2198_v26, 0.0  ;;  %v2881_v31 = vmax.f32 %v2413_v27, 0.0  ;;  %v1771_v32 = vpop.f32.mrf.mxu0  ;;  %v1986_v33 = vpop.f32.mrf.mxu1  ;;  %v4617_v26 = vld [vmem:[%s6784_s0 + $0x310] sm:$0xff]  ;;  %v4660_v27 = vld [vmem:[%s6784_s0 + $0x468] sm:$0xff] }
  0xab   :  { %v2624_v36 = vmax.f32 %v1771_v32, 0.0  ;;  %v2710_v37 = vmax.f32 %v1986_v33, 0.0 }
  0xac   :  { %v3138_v38 = vpack.c.bf16 %v2795_v30, %v2795_v30  ;;  %v3224_v39 = vpack.c.bf16 %v2881_v31, %v2881_v31 }
  0xad   :  { %v2967_v40 = vpack.c.bf16 %v2624_v36, %v2624_v36  ;;  %v3053_v41 = vpack.c.bf16 %v2710_v37, %v2710_v37  ;;  %4357 = vmatmul.msk.bf16.gmra.mxu0 %vm1228_vm2, %v4529_v28  ;;  %4400 = vmatmul.msk.bf16.gmra.mxu1 %vm1228_vm2, %v4572_v29 }
  0xae   :  { %3482 = vst.msk [vmem:[%s6785_s2 + $0x2bc] sm:$0xf] %vm3306_vm3, %v3138_v38  ;;  %4443 = vmatmul.msk.bf16.gmra.mxu2 %vm1228_vm2, %v4615_v34  ;;  %4486 = vmatmul.msk.bf16.gmra.mxu3 %vm1228_vm2, %v4658_v35 }
  0xaf   :  { %3568 = vst.msk [vmem:[%s6785_s2 + $0x414] sm:$0xf] %vm3306_vm3, %v3224_v39 }
  0xb0   :  { %3311 = vst.msk [vmem:[%s6785_s2 + $0x10] sm:$0xf] %vm3306_vm3, %v2967_v40 }
  0xb1   :  { %3397 = vst.msk [vmem:[%s6785_s2 + $0x168] sm:$0xf] %vm3306_vm3, %v3053_v41  ;;  %v2201_v42 = vpop.f32.mrf.mxu2  ;;  %v2416_v43 = vpop.f32.mrf.mxu3 }
  0xb2   :  { %v2796_v44 = vmax.f32 %v2201_v42, 0.0  ;;  %v2882_v45 = vmax.f32 %v2416_v43, 0.0  ;;  %v1773_v46 = vpop.f32.mrf.mxu0  ;;  %v1988_v47 = vpop.f32.mrf.mxu1 }
  0xb3   :  { %v2625_v48 = vmax.f32 %v1773_v46, 0.0  ;;  %v2711_v49 = vmax.f32 %v1988_v47, 0.0 }
  0xb4   :  { %v3139_v50 = vpack.c.bf16 %v2796_v44, %v2796_v44  ;;  %v3225_v51 = vpack.c.bf16 %v2882_v45, %v2882_v45 }
  0xb5   :  { %v2968_v52 = vpack.c.bf16 %v2625_v48, %v2625_v48  ;;  %v3054_v53 = vpack.c.bf16 %v2711_v49, %v2711_v49  ;;  %v4532_v48 = vld [vmem:[%s6784_s0 + $0x68] sm:$0xff]  ;;  %v4575_v49 = vld [vmem:[%s6784_s0 + $0x1c0] sm:$0xff] }
  0xb6   :  { %3483 = vst.msk [vmem:[%s6785_s2 + $0x2c0] sm:$0xf] %vm3306_vm3, %v3139_v50 }
  0xb7   :  { %3569 = vst.msk [vmem:[%s6785_s2 + $0x418] sm:$0xf] %vm3306_vm3, %v3225_v51 }
  0xb8   :  { %3312 = vst.msk [vmem:[%s6785_s2 + $0x14] sm:$0xf] %vm3306_vm3, %v2968_v52 }
  0xb9   :  { %3398 = vst.msk [vmem:[%s6785_s2 + $0x16c] sm:$0xf] %vm3306_vm3, %v3054_v53  ;;  %v2203_v54 = vpop.f32.mrf.mxu2  ;;  %v2418_v55 = vpop.f32.mrf.mxu3 }
  0xba   :  { %v2797_v58 = vmax.f32 %v2203_v54, 0.0  ;;  %v2883_v59 = vmax.f32 %v2418_v55, 0.0  ;;  %v1776_v60 = vpop.f32.mrf.mxu0  ;;  %v1991_v61 = vpop.f32.mrf.mxu1  ;;  %v4618_v54 = vld [vmem:[%s6784_s0 + $0x318] sm:$0xff]  ;;  %v4661_v55 = vld [vmem:[%s6784_s0 + $0x470] sm:$0xff] }
  0xbb   :  { %v2626_v0 = vmax.f32 %v1776_v60, 0.0  ;;  %v2712_v1 = vmax.f32 %v1991_v61, 0.0 }
  0xbc   :  { %v3140_v2 = vpack.c.bf16 %v2797_v58, %v2797_v58  ;;  %v3226_v3 = vpack.c.bf16 %v2883_v59, %v2883_v59 }
  0xbd   :  { %v2969_v4 = vpack.c.bf16 %v2626_v0, %v2626_v0  ;;  %v3055_v5 = vpack.c.bf16 %v2712_v1, %v2712_v1  ;;  %4358 = vmatmul.msk.bf16.gmra.mxu0 %vm1228_vm2, %v4530_v56  ;;  %4401 = vmatmul.msk.bf16.gmra.mxu1 %vm1228_vm2, %v4573_v57 }
  0xbe   :  { %3484 = vst.msk [vmem:[%s6785_s2 + $0x2c4] sm:$0xf] %vm3306_vm3, %v3140_v2  ;;  %4444 = vmatmul.msk.bf16.gmra.mxu2 %vm1228_vm2, %v4616_v62  ;;  %4487 = vmatmul.msk.bf16.gmra.mxu3 %vm1228_vm2, %v4659_v63 }
  0xbf   :  { %3570 = vst.msk [vmem:[%s6785_s2 + $0x41c] sm:$0xf] %vm3306_vm3, %v3226_v3 }
  0xc0   :  { %3313 = vst.msk [vmem:[%s6785_s2 + $0x18] sm:$0xf] %vm3306_vm3, %v2969_v4 }
  0xc1   :  { %3399 = vst.msk [vmem:[%s6785_s2 + $0x170] sm:$0xf] %vm3306_vm3, %v3055_v5  ;;  %v2206_v6 = vpop.f32.mrf.mxu2  ;;  %v2421_v7 = vpop.f32.mrf.mxu3 }
  0xc2   :  { %v2798_v8 = vmax.f32 %v2206_v6, 0.0  ;;  %v2884_v9 = vmax.f32 %v2421_v7, 0.0  ;;  %v1778_v10 = vpop.f32.mrf.mxu0  ;;  %v1993_v11 = vpop.f32.mrf.mxu1 }
  0xc3   :  { %v2627_v12 = vmax.f32 %v1778_v10, 0.0  ;;  %v2713_v13 = vmax.f32 %v1993_v11, 0.0 }
  0xc4   :  { %v3141_v14 = vpack.c.bf16 %v2798_v8, %v2798_v8  ;;  %v3227_v15 = vpack.c.bf16 %v2884_v9, %v2884_v9 }
  0xc5   :  { %v2970_v16 = vpack.c.bf16 %v2627_v12, %v2627_v12  ;;  %v3056_v17 = vpack.c.bf16 %v2713_v13, %v2713_v13  ;;  %v4533_v12 = vld [vmem:[%s6784_s0 + $0x70] sm:$0xff]  ;;  %v4576_v13 = vld [vmem:[%s6784_s0 + $0x1c8] sm:$0xff] }
  0xc6   :  { %3485 = vst.msk [vmem:[%s6785_s2 + $0x2c8] sm:$0xf] %vm3306_vm3, %v3141_v14 }
  0xc7   :  { %3571 = vst.msk [vmem:[%s6785_s2 + $0x420] sm:$0xf] %vm3306_vm3, %v3227_v15 }
  0xc8   :  { %3314 = vst.msk [vmem:[%s6785_s2 + $0x1c] sm:$0xf] %vm3306_vm3, %v2970_v16 }
  0xc9   :  { %3400 = vst.msk [vmem:[%s6785_s2 + $0x174] sm:$0xf] %vm3306_vm3, %v3056_v17  ;;  %v2208_v18 = vpop.f32.mrf.mxu2  ;;  %v2423_v19 = vpop.f32.mrf.mxu3 }
  0xca   :  { %v2799_v22 = vmax.f32 %v2208_v18, 0.0  ;;  %v2885_v23 = vmax.f32 %v2423_v19, 0.0  ;;  %v1781_v24 = vpop.f32.mrf.mxu0  ;;  %v1996_v25 = vpop.f32.mrf.mxu1  ;;  %v4619_v18 = vld [vmem:[%s6784_s0 + $0x320] sm:$0xff]  ;;  %v4662_v19 = vld [vmem:[%s6784_s0 + $0x478] sm:$0xff] }
  0xcb   :  { %v2628_v28 = vmax.f32 %v1781_v24, 0.0  ;;  %v2714_v29 = vmax.f32 %v1996_v25, 0.0 }
  0xcc   :  { %v3142_v30 = vpack.c.bf16 %v2799_v22, %v2799_v22  ;;  %v3228_v31 = vpack.c.bf16 %v2885_v23, %v2885_v23 }
  0xcd   :  { %v2971_v32 = vpack.c.bf16 %v2628_v28, %v2628_v28  ;;  %v3057_v33 = vpack.c.bf16 %v2714_v29, %v2714_v29  ;;  %4359 = vmatmul.msk.bf16.gmra.mxu0 %vm1228_vm2, %v4531_v20  ;;  %4402 = vmatmul.msk.bf16.gmra.mxu1 %vm1228_vm2, %v4574_v21 }
  0xce   :  { %3486 = vst.msk [vmem:[%s6785_s2 + $0x2cc] sm:$0xf] %vm3306_vm3, %v3142_v30  ;;  %4445 = vmatmul.msk.bf16.gmra.mxu2 %vm1228_vm2, %v4617_v26  ;;  %4488 = vmatmul.msk.bf16.gmra.mxu3 %vm1228_vm2, %v4660_v27 }
  0xcf   :  { %3572 = vst.msk [vmem:[%s6785_s2 + $0x424] sm:$0xf] %vm3306_vm3, %v3228_v31 }
  0xd0   :  { %3315 = vst.msk [vmem:[%s6785_s2 + $0x20] sm:$0xf] %vm3306_vm3, %v2971_v32 }
  0xd1   :  { %3401 = vst.msk [vmem:[%s6785_s2 + $0x178] sm:$0xf] %vm3306_vm3, %v3057_v33  ;;  %v2211_v34 = vpop.f32.mrf.mxu2  ;;  %v2426_v35 = vpop.f32.mrf.mxu3 }
  0xd2   :  { %v2800_v36 = vmax.f32 %v2211_v34, 0.0  ;;  %v2886_v37 = vmax.f32 %v2426_v35, 0.0  ;;  %v1783_v38 = vpop.f32.mrf.mxu0  ;;  %v1998_v39 = vpop.f32.mrf.mxu1 }
  0xd3   :  { %v2629_v40 = vmax.f32 %v1783_v38, 0.0  ;;  %v2715_v41 = vmax.f32 %v1998_v39, 0.0 }
  0xd4   :  { %v3143_v42 = vpack.c.bf16 %v2800_v36, %v2800_v36  ;;  %v3229_v43 = vpack.c.bf16 %v2886_v37, %v2886_v37 }
  0xd5   :  { %v2972_v44 = vpack.c.bf16 %v2629_v40, %v2629_v40  ;;  %v3058_v45 = vpack.c.bf16 %v2715_v41, %v2715_v41  ;;  %v4534_v40 = vld [vmem:[%s6784_s0 + $0x78] sm:$0xff]  ;;  %v4577_v41 = vld [vmem:[%s6784_s0 + $0x1d0] sm:$0xff] }
  0xd6   :  { %3487 = vst.msk [vmem:[%s6785_s2 + $0x2d0] sm:$0xf] %vm3306_vm3, %v3143_v42 }
  0xd7   :  { %3573 = vst.msk [vmem:[%s6785_s2 + $0x428] sm:$0xf] %vm3306_vm3, %v3229_v43 }
  0xd8   :  { %3316 = vst.msk [vmem:[%s6785_s2 + $0x24] sm:$0xf] %vm3306_vm3, %v2972_v44 }
  0xd9   :  { %3402 = vst.msk [vmem:[%s6785_s2 + $0x17c] sm:$0xf] %vm3306_vm3, %v3058_v45  ;;  %v2213_v46 = vpop.f32.mrf.mxu2  ;;  %v2428_v47 = vpop.f32.mrf.mxu3 }
  0xda   :  { %v2801_v50 = vmax.f32 %v2213_v46, 0.0  ;;  %v2887_v51 = vmax.f32 %v2428_v47, 0.0  ;;  %v1786_v52 = vpop.f32.mrf.mxu0  ;;  %v2001_v53 = vpop.f32.mrf.mxu1  ;;  %v4620_v46 = vld [vmem:[%s6784_s0 + $0x328] sm:$0xff]  ;;  %v4663_v47 = vld [vmem:[%s6784_s0 + $0x480] sm:$0xff] }
  0xdb   :  { %v2630_v56 = vmax.f32 %v1786_v52, 0.0  ;;  %v2716_v57 = vmax.f32 %v2001_v53, 0.0 }
  0xdc   :  { %v3144_v58 = vpack.c.bf16 %v2801_v50, %v2801_v50  ;;  %v3230_v59 = vpack.c.bf16 %v2887_v51, %v2887_v51 }
  0xdd   :  { %v2973_v60 = vpack.c.bf16 %v2630_v56, %v2630_v56  ;;  %v3059_v61 = vpack.c.bf16 %v2716_v57, %v2716_v57  ;;  %4360 = vmatmul.msk.bf16.gmra.mxu0 %vm1228_vm2, %v4532_v48  ;;  %4403 = vmatmul.msk.bf16.gmra.mxu1 %vm1228_vm2, %v4575_v49 }
  0xde   :  { %3488 = vst.msk [vmem:[%s6785_s2 + $0x2d4] sm:$0xf] %vm3306_vm3, %v3144_v58  ;;  %4446 = vmatmul.msk.bf16.gmra.mxu2 %vm1228_vm2, %v4618_v54  ;;  %4489 = vmatmul.msk.bf16.gmra.mxu3 %vm1228_vm2, %v4661_v55 }
  0xdf   :  { %3574 = vst.msk [vmem:[%s6785_s2 + $0x42c] sm:$0xf] %vm3306_vm3, %v3230_v59 }
  0xe0   :  { %3317 = vst.msk [vmem:[%s6785_s2 + $0x28] sm:$0xf] %vm3306_vm3, %v2973_v60 }
  0xe1   :  { %3403 = vst.msk [vmem:[%s6785_s2 + $0x180] sm:$0xf] %vm3306_vm3, %v3059_v61  ;;  %v2216_v62 = vpop.f32.mrf.mxu2  ;;  %v2431_v63 = vpop.f32.mrf.mxu3 }
  0xe2   :  { %v2802_v0 = vmax.f32 %v2216_v62, 0.0  ;;  %v2888_v1 = vmax.f32 %v2431_v63, 0.0  ;;  %v1788_v2 = vpop.f32.mrf.mxu0  ;;  %v2003_v3 = vpop.f32.mrf.mxu1 }
  0xe3   :  { %v2631_v4 = vmax.f32 %v1788_v2, 0.0  ;;  %v2717_v5 = vmax.f32 %v2003_v3, 0.0 }
  0xe4   :  { %v3145_v6 = vpack.c.bf16 %v2802_v0, %v2802_v0  ;;  %v3231_v7 = vpack.c.bf16 %v2888_v1, %v2888_v1 }
  0xe5   :  { %v2974_v8 = vpack.c.bf16 %v2631_v4, %v2631_v4  ;;  %v3060_v9 = vpack.c.bf16 %v2717_v5, %v2717_v5  ;;  %v4535_v4 = vld [vmem:[%s6784_s0 + $0x80] sm:$0xff]  ;;  %v4578_v5 = vld [vmem:[%s6784_s0 + $0x1d8] sm:$0xff] }
  0xe6   :  { %3489 = vst.msk [vmem:[%s6785_s2 + $0x2d8] sm:$0xf] %vm3306_vm3, %v3145_v6 }
  0xe7   :  { %3575 = vst.msk [vmem:[%s6785_s2 + $0x430] sm:$0xf] %vm3306_vm3, %v3231_v7 }
  0xe8   :  { %3318 = vst.msk [vmem:[%s6785_s2 + $0x2c] sm:$0xf] %vm3306_vm3, %v2974_v8 }
  0xe9   :  { %3404 = vst.msk [vmem:[%s6785_s2 + $0x184] sm:$0xf] %vm3306_vm3, %v3060_v9  ;;  %v2218_v10 = vpop.f32.mrf.mxu2  ;;  %v2433_v11 = vpop.f32.mrf.mxu3 }
  0xea   :  { %v2803_v14 = vmax.f32 %v2218_v10, 0.0  ;;  %v2889_v15 = vmax.f32 %v2433_v11, 0.0  ;;  %v1791_v16 = vpop.f32.mrf.mxu0  ;;  %v2006_v17 = vpop.f32.mrf.mxu1  ;;  %v4621_v10 = vld [vmem:[%s6784_s0 + $0x330] sm:$0xff]  ;;  %v4664_v11 = vld [vmem:[%s6784_s0 + $0x488] sm:$0xff] }
  0xeb   :  { %v2632_v20 = vmax.f32 %v1791_v16, 0.0  ;;  %v2718_v21 = vmax.f32 %v2006_v17, 0.0 }
  0xec   :  { %v3146_v22 = vpack.c.bf16 %v2803_v14, %v2803_v14  ;;  %v3232_v23 = vpack.c.bf16 %v2889_v15, %v2889_v15 }
  0xed   :  { %v2975_v24 = vpack.c.bf16 %v2632_v20, %v2632_v20  ;;  %v3061_v25 = vpack.c.bf16 %v2718_v21, %v2718_v21  ;;  %4361 = vmatmul.msk.bf16.gmra.mxu0 %vm1228_vm2, %v4533_v12  ;;  %4404 = vmatmul.msk.bf16.gmra.mxu1 %vm1228_vm2, %v4576_v13 }
  0xee   :  { %3490 = vst.msk [vmem:[%s6785_s2 + $0x2dc] sm:$0xf] %vm3306_vm3, %v3146_v22  ;;  %4447 = vmatmul.msk.bf16.gmra.mxu2 %vm1228_vm2, %v4619_v18  ;;  %4490 = vmatmul.msk.bf16.gmra.mxu3 %vm1228_vm2, %v4662_v19 }
  0xef   :  { %3576 = vst.msk [vmem:[%s6785_s2 + $0x434] sm:$0xf] %vm3306_vm3, %v3232_v23 }
  0xf0   :  { %3319 = vst.msk [vmem:[%s6785_s2 + $0x30] sm:$0xf] %vm3306_vm3, %v2975_v24 }
  0xf1   :  { %3405 = vst.msk [vmem:[%s6785_s2 + $0x188] sm:$0xf] %vm3306_vm3, %v3061_v25  ;;  %v2221_v26 = vpop.f32.mrf.mxu2  ;;  %v2436_v27 = vpop.f32.mrf.mxu3 }
  0xf2   :  { %v2804_v28 = vmax.f32 %v2221_v26, 0.0  ;;  %v2890_v29 = vmax.f32 %v2436_v27, 0.0  ;;  %v1793_v30 = vpop.f32.mrf.mxu0  ;;  %v2008_v31 = vpop.f32.mrf.mxu1 }
  0xf3   :  { %v2633_v32 = vmax.f32 %v1793_v30, 0.0  ;;  %v2719_v33 = vmax.f32 %v2008_v31, 0.0 }
  0xf4   :  { %v3147_v34 = vpack.c.bf16 %v2804_v28, %v2804_v28  ;;  %v3233_v35 = vpack.c.bf16 %v2890_v29, %v2890_v29 }
  0xf5   :  { %v2976_v36 = vpack.c.bf16 %v2633_v32, %v2633_v32  ;;  %v3062_v37 = vpack.c.bf16 %v2719_v33, %v2719_v33  ;;  %v4536_v32 = vld [vmem:[%s6784_s0 + $0x88] sm:$0xff]  ;;  %v4579_v33 = vld [vmem:[%s6784_s0 + $0x1e0] sm:$0xff] }
  0xf6   :  { %3491 = vst.msk [vmem:[%s6785_s2 + $0x2e0] sm:$0xf] %vm3306_vm3, %v3147_v34 }
  0xf7   :  { %3577 = vst.msk [vmem:[%s6785_s2 + $0x438] sm:$0xf] %vm3306_vm3, %v3233_v35 }
  0xf8   :  { %3320 = vst.msk [vmem:[%s6785_s2 + $0x34] sm:$0xf] %vm3306_vm3, %v2976_v36 }
  0xf9   :  { %3406 = vst.msk [vmem:[%s6785_s2 + $0x18c] sm:$0xf] %vm3306_vm3, %v3062_v37  ;;  %v2223_v38 = vpop.f32.mrf.mxu2  ;;  %v2438_v39 = vpop.f32.mrf.mxu3 }
  0xfa   :  { %v2805_v42 = vmax.f32 %v2223_v38, 0.0  ;;  %v2891_v43 = vmax.f32 %v2438_v39, 0.0  ;;  %v1796_v44 = vpop.f32.mrf.mxu0  ;;  %v2011_v45 = vpop.f32.mrf.mxu1  ;;  %v4622_v38 = vld [vmem:[%s6784_s0 + $0x338] sm:$0xff]  ;;  %v4665_v39 = vld [vmem:[%s6784_s0 + $0x490] sm:$0xff] }
  0xfb   :  { %v2634_v48 = vmax.f32 %v1796_v44, 0.0  ;;  %v2720_v49 = vmax.f32 %v2011_v45, 0.0 }
  0xfc   :  { %v3148_v50 = vpack.c.bf16 %v2805_v42, %v2805_v42  ;;  %v3234_v51 = vpack.c.bf16 %v2891_v43, %v2891_v43 }
  0xfd   :  { %v2977_v52 = vpack.c.bf16 %v2634_v48, %v2634_v48  ;;  %v3063_v53 = vpack.c.bf16 %v2720_v49, %v2720_v49  ;;  %4362 = vmatmul.msk.bf16.gmra.mxu0 %vm1228_vm2, %v4534_v40  ;;  %4405 = vmatmul.msk.bf16.gmra.mxu1 %vm1228_vm2, %v4577_v41 }
  0xfe   :  { %3492 = vst.msk [vmem:[%s6785_s2 + $0x2e4] sm:$0xf] %vm3306_vm3, %v3148_v50  ;;  %4448 = vmatmul.msk.bf16.gmra.mxu2 %vm1228_vm2, %v4620_v46  ;;  %4491 = vmatmul.msk.bf16.gmra.mxu3 %vm1228_vm2, %v4663_v47 }
  0xff   :  { %3578 = vst.msk [vmem:[%s6785_s2 + $0x43c] sm:$0xf] %vm3306_vm3, %v3234_v51 }
 0x100   :  { %3321 = vst.msk [vmem:[%s6785_s2 + $0x38] sm:$0xf] %vm3306_vm3, %v2977_v52 }
 0x101   :  { %3407 = vst.msk [vmem:[%s6785_s2 + $0x190] sm:$0xf] %vm3306_vm3, %v3063_v53  ;;  %v2226_v54 = vpop.f32.mrf.mxu2  ;;  %v2441_v55 = vpop.f32.mrf.mxu3 }
 0x102   :  { %v2806_v56 = vmax.f32 %v2226_v54, 0.0  ;;  %v2892_v57 = vmax.f32 %v2441_v55, 0.0  ;;  %v1798_v58 = vpop.f32.mrf.mxu0  ;;  %v2013_v59 = vpop.f32.mrf.mxu1 }
 0x103   :  { %v2635_v60 = vmax.f32 %v1798_v58, 0.0  ;;  %v2721_v61 = vmax.f32 %v2013_v59, 0.0 }
 0x104   :  { %v3149_v62 = vpack.c.bf16 %v2806_v56, %v2806_v56  ;;  %v3235_v63 = vpack.c.bf16 %v2892_v57, %v2892_v57 }
 0x105   :  { %v2978_v0 = vpack.c.bf16 %v2635_v60, %v2635_v60  ;;  %v3064_v1 = vpack.c.bf16 %v2721_v61, %v2721_v61  ;;  %v4537_v60 = vld [vmem:[%s6784_s0 + $0x90] sm:$0xff]  ;;  %v4580_v61 = vld [vmem:[%s6784_s0 + $0x1e8] sm:$0xff] }
 0x106   :  { %3493 = vst.msk [vmem:[%s6785_s2 + $0x2e8] sm:$0xf] %vm3306_vm3, %v3149_v62 }
 0x107   :  { %3579 = vst.msk [vmem:[%s6785_s2 + $0x440] sm:$0xf] %vm3306_vm3, %v3235_v63 }
 0x108   :  { %3322 = vst.msk [vmem:[%s6785_s2 + $0x3c] sm:$0xf] %vm3306_vm3, %v2978_v0 }
 0x109   :  { %3408 = vst.msk [vmem:[%s6785_s2 + $0x194] sm:$0xf] %vm3306_vm3, %v3064_v1  ;;  %v2228_v2 = vpop.f32.mrf.mxu2  ;;  %v2443_v3 = vpop.f32.mrf.mxu3 }
 0x10a   :  { %v2807_v6 = vmax.f32 %v2228_v2, 0.0  ;;  %v2893_v7 = vmax.f32 %v2443_v3, 0.0  ;;  %v1801_v8 = vpop.f32.mrf.mxu0  ;;  %v2016_v9 = vpop.f32.mrf.mxu1  ;;  %v4623_v2 = vld [vmem:[%s6784_s0 + $0x340] sm:$0xff]  ;;  %v4666_v3 = vld [vmem:[%s6784_s0 + $0x498] sm:$0xff] }
 0x10b   :  { %v2636_v12 = vmax.f32 %v1801_v8, 0.0  ;;  %v2722_v13 = vmax.f32 %v2016_v9, 0.0 }
 0x10c   :  { %v3150_v14 = vpack.c.bf16 %v2807_v6, %v2807_v6  ;;  %v3236_v15 = vpack.c.bf16 %v2893_v7, %v2893_v7 }
 0x10d   :  { %v2979_v16 = vpack.c.bf16 %v2636_v12, %v2636_v12  ;;  %v3065_v17 = vpack.c.bf16 %v2722_v13, %v2722_v13  ;;  %4363 = vmatmul.msk.bf16.gmra.mxu0 %vm1228_vm2, %v4535_v4  ;;  %4406 = vmatmul.msk.bf16.gmra.mxu1 %vm1228_vm2, %v4578_v5 }
 0x10e   :  { %3494 = vst.msk [vmem:[%s6785_s2 + $0x2ec] sm:$0xf] %vm3306_vm3, %v3150_v14  ;;  %4449 = vmatmul.msk.bf16.gmra.mxu2 %vm1228_vm2, %v4621_v10  ;;  %4492 = vmatmul.msk.bf16.gmra.mxu3 %vm1228_vm2, %v4664_v11 }
 0x10f   :  { %3580 = vst.msk [vmem:[%s6785_s2 + $0x444] sm:$0xf] %vm3306_vm3, %v3236_v15 }
 0x110   :  { %3323 = vst.msk [vmem:[%s6785_s2 + $0x40] sm:$0xf] %vm3306_vm3, %v2979_v16 }
 0x111   :  { %3409 = vst.msk [vmem:[%s6785_s2 + $0x198] sm:$0xf] %vm3306_vm3, %v3065_v17  ;;  %v2231_v18 = vpop.f32.mrf.mxu2  ;;  %v2446_v19 = vpop.f32.mrf.mxu3 }
 0x112   :  { %v2808_v20 = vmax.f32 %v2231_v18, 0.0  ;;  %v2894_v21 = vmax.f32 %v2446_v19, 0.0  ;;  %v1803_v22 = vpop.f32.mrf.mxu0  ;;  %v2018_v23 = vpop.f32.mrf.mxu1 }
 0x113   :  { %v2637_v24 = vmax.f32 %v1803_v22, 0.0  ;;  %v2723_v25 = vmax.f32 %v2018_v23, 0.0 }
 0x114   :  { %v3151_v26 = vpack.c.bf16 %v2808_v20, %v2808_v20  ;;  %v3237_v27 = vpack.c.bf16 %v2894_v21, %v2894_v21 }
 0x115   :  { %v2980_v28 = vpack.c.bf16 %v2637_v24, %v2637_v24  ;;  %v3066_v29 = vpack.c.bf16 %v2723_v25, %v2723_v25  ;;  %v4538_v24 = vld [vmem:[%s6784_s0 + $0x98] sm:$0xff]  ;;  %v4581_v25 = vld [vmem:[%s6784_s0 + $0x1f0] sm:$0xff] }
 0x116   :  { %3495 = vst.msk [vmem:[%s6785_s2 + $0x2f0] sm:$0xf] %vm3306_vm3, %v3151_v26 }
 0x117   :  { %3581 = vst.msk [vmem:[%s6785_s2 + $0x448] sm:$0xf] %vm3306_vm3, %v3237_v27 }
 0x118   :  { %3324 = vst.msk [vmem:[%s6785_s2 + $0x44] sm:$0xf] %vm3306_vm3, %v2980_v28 }
 0x119   :  { %3410 = vst.msk [vmem:[%s6785_s2 + $0x19c] sm:$0xf] %vm3306_vm3, %v3066_v29  ;;  %v2233_v30 = vpop.f32.mrf.mxu2  ;;  %v2448_v31 = vpop.f32.mrf.mxu3 }
 0x11a   :  { %v2809_v34 = vmax.f32 %v2233_v30, 0.0  ;;  %v2895_v35 = vmax.f32 %v2448_v31, 0.0  ;;  %v1806_v36 = vpop.f32.mrf.mxu0  ;;  %v2021_v37 = vpop.f32.mrf.mxu1  ;;  %v4624_v30 = vld [vmem:[%s6784_s0 + $0x348] sm:$0xff]  ;;  %v4667_v31 = vld [vmem:[%s6784_s0 + $0x4a0] sm:$0xff] }
 0x11b   :  { %v2638_v40 = vmax.f32 %v1806_v36, 0.0  ;;  %v2724_v41 = vmax.f32 %v2021_v37, 0.0 }
 0x11c   :  { %v3152_v42 = vpack.c.bf16 %v2809_v34, %v2809_v34  ;;  %v3238_v43 = vpack.c.bf16 %v2895_v35, %v2895_v35 }
 0x11d   :  { %v2981_v44 = vpack.c.bf16 %v2638_v40, %v2638_v40  ;;  %v3067_v45 = vpack.c.bf16 %v2724_v41, %v2724_v41  ;;  %4364 = vmatmul.msk.bf16.gmra.mxu0 %vm1228_vm2, %v4536_v32  ;;  %4407 = vmatmul.msk.bf16.gmra.mxu1 %vm1228_vm2, %v4579_v33 }
 0x11e   :  { %3496 = vst.msk [vmem:[%s6785_s2 + $0x2f4] sm:$0xf] %vm3306_vm3, %v3152_v42  ;;  %4450 = vmatmul.msk.bf16.gmra.mxu2 %vm1228_vm2, %v4622_v38  ;;  %4493 = vmatmul.msk.bf16.gmra.mxu3 %vm1228_vm2, %v4665_v39 }
 0x11f   :  { %3582 = vst.msk [vmem:[%s6785_s2 + $0x44c] sm:$0xf] %vm3306_vm3, %v3238_v43 }
 0x120   :  { %3325 = vst.msk [vmem:[%s6785_s2 + $0x48] sm:$0xf] %vm3306_vm3, %v2981_v44 }
 0x121   :  { %3411 = vst.msk [vmem:[%s6785_s2 + $0x1a0] sm:$0xf] %vm3306_vm3, %v3067_v45  ;;  %v2236_v46 = vpop.f32.mrf.mxu2  ;;  %v2451_v47 = vpop.f32.mrf.mxu3 }
 0x122   :  { %v2810_v48 = vmax.f32 %v2236_v46, 0.0  ;;  %v2896_v49 = vmax.f32 %v2451_v47, 0.0  ;;  %v1808_v50 = vpop.f32.mrf.mxu0  ;;  %v2023_v51 = vpop.f32.mrf.mxu1 }
 0x123   :  { %v2639_v52 = vmax.f32 %v1808_v50, 0.0  ;;  %v2725_v53 = vmax.f32 %v2023_v51, 0.0 }
 0x124   :  { %v3153_v54 = vpack.c.bf16 %v2810_v48, %v2810_v48  ;;  %v3239_v55 = vpack.c.bf16 %v2896_v49, %v2896_v49 }
 0x125   :  { %v2982_v56 = vpack.c.bf16 %v2639_v52, %v2639_v52  ;;  %v3068_v57 = vpack.c.bf16 %v2725_v53, %v2725_v53  ;;  %v4539_v52 = vld [vmem:[%s6784_s0 + $0xa0] sm:$0xff]  ;;  %v4582_v53 = vld [vmem:[%s6784_s0 + $0x1f8] sm:$0xff] }
 0x126   :  { %3497 = vst.msk [vmem:[%s6785_s2 + $0x2f8] sm:$0xf] %vm3306_vm3, %v3153_v54 }
 0x127   :  { %3583 = vst.msk [vmem:[%s6785_s2 + $0x450] sm:$0xf] %vm3306_vm3, %v3239_v55 }
 0x128   :  { %3326 = vst.msk [vmem:[%s6785_s2 + $0x4c] sm:$0xf] %vm3306_vm3, %v2982_v56 }
 0x129   :  { %3412 = vst.msk [vmem:[%s6785_s2 + $0x1a4] sm:$0xf] %vm3306_vm3, %v3068_v57  ;;  %v2238_v58 = vpop.f32.mrf.mxu2  ;;  %v2453_v59 = vpop.f32.mrf.mxu3 }
 0x12a   :  { %v2811_v62 = vmax.f32 %v2238_v58, 0.0  ;;  %v2897_v63 = vmax.f32 %v2453_v59, 0.0  ;;  %v1811_v0 = vpop.f32.mrf.mxu0  ;;  %v2026_v1 = vpop.f32.mrf.mxu1  ;;  %v4625_v58 = vld [vmem:[%s6784_s0 + $0x350] sm:$0xff]  ;;  %v4668_v59 = vld [vmem:[%s6784_s0 + $0x4a8] sm:$0xff] }
 0x12b   :  { %v2640_v4 = vmax.f32 %v1811_v0, 0.0  ;;  %v2726_v5 = vmax.f32 %v2026_v1, 0.0 }
 0x12c   :  { %v3154_v6 = vpack.c.bf16 %v2811_v62, %v2811_v62  ;;  %v3240_v7 = vpack.c.bf16 %v2897_v63, %v2897_v63 }
 0x12d   :  { %v2983_v8 = vpack.c.bf16 %v2640_v4, %v2640_v4  ;;  %v3069_v9 = vpack.c.bf16 %v2726_v5, %v2726_v5  ;;  %4365 = vmatmul.msk.bf16.gmra.mxu0 %vm1228_vm2, %v4537_v60  ;;  %4408 = vmatmul.msk.bf16.gmra.mxu1 %vm1228_vm2, %v4580_v61 }
 0x12e   :  { %3498 = vst.msk [vmem:[%s6785_s2 + $0x2fc] sm:$0xf] %vm3306_vm3, %v3154_v6  ;;  %4451 = vmatmul.msk.bf16.gmra.mxu2 %vm1228_vm2, %v4623_v2  ;;  %4494 = vmatmul.msk.bf16.gmra.mxu3 %vm1228_vm2, %v4666_v3 }
 0x12f   :  { %3584 = vst.msk [vmem:[%s6785_s2 + $0x454] sm:$0xf] %vm3306_vm3, %v3240_v7 }
 0x130   :  { %3327 = vst.msk [vmem:[%s6785_s2 + $0x50] sm:$0xf] %vm3306_vm3, %v2983_v8 }
 0x131   :  { %3413 = vst.msk [vmem:[%s6785_s2 + $0x1a8] sm:$0xf] %vm3306_vm3, %v3069_v9  ;;  %v2241_v10 = vpop.f32.mrf.mxu2  ;;  %v2456_v11 = vpop.f32.mrf.mxu3 }
 0x132   :  { %v2812_v12 = vmax.f32 %v2241_v10, 0.0  ;;  %v2898_v13 = vmax.f32 %v2456_v11, 0.0  ;;  %v1813_v14 = vpop.f32.mrf.mxu0  ;;  %v2028_v15 = vpop.f32.mrf.mxu1 }
 0x133   :  { %v2641_v16 = vmax.f32 %v1813_v14, 0.0  ;;  %v2727_v17 = vmax.f32 %v2028_v15, 0.0 }
 0x134   :  { %v3155_v18 = vpack.c.bf16 %v2812_v12, %v2812_v12  ;;  %v3241_v19 = vpack.c.bf16 %v2898_v13, %v2898_v13 }
 0x135   :  { %v2984_v20 = vpack.c.bf16 %v2641_v16, %v2641_v16  ;;  %v3070_v21 = vpack.c.bf16 %v2727_v17, %v2727_v17  ;;  %v4540_v16 = vld [vmem:[%s6784_s0 + $0xa8] sm:$0xff]  ;;  %v4583_v17 = vld [vmem:[%s6784_s0 + $0x200] sm:$0xff] }
 0x136   :  { %3499 = vst.msk [vmem:[%s6785_s2 + $0x300] sm:$0xf] %vm3306_vm3, %v3155_v18 }
 0x137   :  { %3585 = vst.msk [vmem:[%s6785_s2 + $0x458] sm:$0xf] %vm3306_vm3, %v3241_v19 }
 0x138   :  { %3328 = vst.msk [vmem:[%s6785_s2 + $0x54] sm:$0xf] %vm3306_vm3, %v2984_v20 }
 0x139   :  { %3414 = vst.msk [vmem:[%s6785_s2 + $0x1ac] sm:$0xf] %vm3306_vm3, %v3070_v21  ;;  %v2243_v22 = vpop.f32.mrf.mxu2  ;;  %v2458_v23 = vpop.f32.mrf.mxu3 }
 0x13a   :  { %v2813_v26 = vmax.f32 %v2243_v22, 0.0  ;;  %v2899_v27 = vmax.f32 %v2458_v23, 0.0  ;;  %v1816_v28 = vpop.f32.mrf.mxu0  ;;  %v2031_v29 = vpop.f32.mrf.mxu1  ;;  %v4626_v22 = vld [vmem:[%s6784_s0 + $0x358] sm:$0xff]  ;;  %v4669_v23 = vld [vmem:[%s6784_s0 + $0x4b0] sm:$0xff] }
 0x13b   :  { %v2642_v32 = vmax.f32 %v1816_v28, 0.0  ;;  %v2728_v33 = vmax.f32 %v2031_v29, 0.0 }
 0x13c   :  { %v3156_v34 = vpack.c.bf16 %v2813_v26, %v2813_v26  ;;  %v3242_v35 = vpack.c.bf16 %v2899_v27, %v2899_v27 }
 0x13d   :  { %v2985_v36 = vpack.c.bf16 %v2642_v32, %v2642_v32  ;;  %v3071_v37 = vpack.c.bf16 %v2728_v33, %v2728_v33  ;;  %4366 = vmatmul.msk.bf16.gmra.mxu0 %vm1228_vm2, %v4538_v24  ;;  %4409 = vmatmul.msk.bf16.gmra.mxu1 %vm1228_vm2, %v4581_v25 }
 0x13e   :  { %3500 = vst.msk [vmem:[%s6785_s2 + $0x304] sm:$0xf] %vm3306_vm3, %v3156_v34  ;;  %4452 = vmatmul.msk.bf16.gmra.mxu2 %vm1228_vm2, %v4624_v30  ;;  %4495 = vmatmul.msk.bf16.gmra.mxu3 %vm1228_vm2, %v4667_v31 }
 0x13f   :  { %3586 = vst.msk [vmem:[%s6785_s2 + $0x45c] sm:$0xf] %vm3306_vm3, %v3242_v35 }
 0x140   :  { %3329 = vst.msk [vmem:[%s6785_s2 + $0x58] sm:$0xf] %vm3306_vm3, %v2985_v36 }
 0x141   :  { %3415 = vst.msk [vmem:[%s6785_s2 + $0x1b0] sm:$0xf] %vm3306_vm3, %v3071_v37  ;;  %v2246_v38 = vpop.f32.mrf.mxu2  ;;  %v2461_v39 = vpop.f32.mrf.mxu3 }
 0x142   :  { %v2814_v40 = vmax.f32 %v2246_v38, 0.0  ;;  %v2900_v41 = vmax.f32 %v2461_v39, 0.0  ;;  %v1818_v42 = vpop.f32.mrf.mxu0  ;;  %v2033_v43 = vpop.f32.mrf.mxu1 }
 0x143   :  { %v2643_v44 = vmax.f32 %v1818_v42, 0.0  ;;  %v2729_v45 = vmax.f32 %v2033_v43, 0.0 }
 0x144   :  { %v3157_v46 = vpack.c.bf16 %v2814_v40, %v2814_v40  ;;  %v3243_v47 = vpack.c.bf16 %v2900_v41, %v2900_v41 }
 0x145   :  { %v2986_v48 = vpack.c.bf16 %v2643_v44, %v2643_v44  ;;  %v3072_v49 = vpack.c.bf16 %v2729_v45, %v2729_v45  ;;  %v4541_v44 = vld [vmem:[%s6784_s0 + $0xb0] sm:$0xff]  ;;  %v4584_v45 = vld [vmem:[%s6784_s0 + $0x208] sm:$0xff] }
 0x146   :  { %3501 = vst.msk [vmem:[%s6785_s2 + $0x308] sm:$0xf] %vm3306_vm3, %v3157_v46 }
 0x147   :  { %3587 = vst.msk [vmem:[%s6785_s2 + $0x460] sm:$0xf] %vm3306_vm3, %v3243_v47 }
 0x148   :  { %3330 = vst.msk [vmem:[%s6785_s2 + $0x5c] sm:$0xf] %vm3306_vm3, %v2986_v48 }
 0x149   :  { %3416 = vst.msk [vmem:[%s6785_s2 + $0x1b4] sm:$0xf] %vm3306_vm3, %v3072_v49  ;;  %v2248_v50 = vpop.f32.mrf.mxu2  ;;  %v2463_v51 = vpop.f32.mrf.mxu3 }
 0x14a   :  { %v2815_v54 = vmax.f32 %v2248_v50, 0.0  ;;  %v2901_v55 = vmax.f32 %v2463_v51, 0.0  ;;  %v1821_v56 = vpop.f32.mrf.mxu0  ;;  %v2036_v57 = vpop.f32.mrf.mxu1  ;;  %v4627_v50 = vld [vmem:[%s6784_s0 + $0x360] sm:$0xff]  ;;  %v4670_v51 = vld [vmem:[%s6784_s0 + $0x4b8] sm:$0xff] }
 0x14b   :  { %v2644_v60 = vmax.f32 %v1821_v56, 0.0  ;;  %v2730_v61 = vmax.f32 %v2036_v57, 0.0 }
 0x14c   :  { %v3158_v62 = vpack.c.bf16 %v2815_v54, %v2815_v54  ;;  %v3244_v63 = vpack.c.bf16 %v2901_v55, %v2901_v55 }
 0x14d   :  { %v2987_v0 = vpack.c.bf16 %v2644_v60, %v2644_v60  ;;  %v3073_v1 = vpack.c.bf16 %v2730_v61, %v2730_v61  ;;  %4367 = vmatmul.msk.bf16.gmra.mxu0 %vm1228_vm2, %v4539_v52  ;;  %4410 = vmatmul.msk.bf16.gmra.mxu1 %vm1228_vm2, %v4582_v53 }
 0x14e   :  { %3502 = vst.msk [vmem:[%s6785_s2 + $0x30c] sm:$0xf] %vm3306_vm3, %v3158_v62  ;;  %4453 = vmatmul.msk.bf16.gmra.mxu2 %vm1228_vm2, %v4625_v58  ;;  %4496 = vmatmul.msk.bf16.gmra.mxu3 %vm1228_vm2, %v4668_v59 }
 0x14f   :  { %3588 = vst.msk [vmem:[%s6785_s2 + $0x464] sm:$0xf] %vm3306_vm3, %v3244_v63 }
 0x150   :  { %3331 = vst.msk [vmem:[%s6785_s2 + $0x60] sm:$0xf] %vm3306_vm3, %v2987_v0 }
 0x151   :  { %3417 = vst.msk [vmem:[%s6785_s2 + $0x1b8] sm:$0xf] %vm3306_vm3, %v3073_v1  ;;  %v2251_v2 = vpop.f32.mrf.mxu2  ;;  %v2466_v3 = vpop.f32.mrf.mxu3 }
 0x152   :  { %v2816_v4 = vmax.f32 %v2251_v2, 0.0  ;;  %v2902_v5 = vmax.f32 %v2466_v3, 0.0  ;;  %v1823_v6 = vpop.f32.mrf.mxu0  ;;  %v2038_v7 = vpop.f32.mrf.mxu1 }
 0x153   :  { %v2645_v8 = vmax.f32 %v1823_v6, 0.0  ;;  %v2731_v9 = vmax.f32 %v2038_v7, 0.0 }
 0x154   :  { %v3159_v10 = vpack.c.bf16 %v2816_v4, %v2816_v4  ;;  %v3245_v11 = vpack.c.bf16 %v2902_v5, %v2902_v5 }
 0x155   :  { %v2988_v12 = vpack.c.bf16 %v2645_v8, %v2645_v8  ;;  %v3074_v13 = vpack.c.bf16 %v2731_v9, %v2731_v9  ;;  %v4542_v8 = vld [vmem:[%s6784_s0 + $0xb8] sm:$0xff]  ;;  %v4585_v9 = vld [vmem:[%s6784_s0 + $0x210] sm:$0xff] }
 0x156   :  { %3503 = vst.msk [vmem:[%s6785_s2 + $0x310] sm:$0xf] %vm3306_vm3, %v3159_v10 }
 0x157   :  { %3589 = vst.msk [vmem:[%s6785_s2 + $0x468] sm:$0xf] %vm3306_vm3, %v3245_v11 }
 0x158   :  { %3332 = vst.msk [vmem:[%s6785_s2 + $0x64] sm:$0xf] %vm3306_vm3, %v2988_v12 }
 0x159   :  { %3418 = vst.msk [vmem:[%s6785_s2 + $0x1bc] sm:$0xf] %vm3306_vm3, %v3074_v13  ;;  %v2253_v14 = vpop.f32.mrf.mxu2  ;;  %v2468_v15 = vpop.f32.mrf.mxu3 }
 0x15a   :  { %v2817_v18 = vmax.f32 %v2253_v14, 0.0  ;;  %v2903_v19 = vmax.f32 %v2468_v15, 0.0  ;;  %v1826_v20 = vpop.f32.mrf.mxu0  ;;  %v2041_v21 = vpop.f32.mrf.mxu1  ;;  %v4628_v14 = vld [vmem:[%s6784_s0 + $0x368] sm:$0xff]  ;;  %v4671_v15 = vld [vmem:[%s6784_s0 + $0x4c0] sm:$0xff] }
 0x15b   :  { %v2646_v24 = vmax.f32 %v1826_v20, 0.0  ;;  %v2732_v25 = vmax.f32 %v2041_v21, 0.0 }
 0x15c   :  { %v3160_v26 = vpack.c.bf16 %v2817_v18, %v2817_v18  ;;  %v3246_v27 = vpack.c.bf16 %v2903_v19, %v2903_v19 }
 0x15d   :  { %v2989_v28 = vpack.c.bf16 %v2646_v24, %v2646_v24  ;;  %v3075_v29 = vpack.c.bf16 %v2732_v25, %v2732_v25  ;;  %4368 = vmatmul.msk.bf16.gmra.mxu0 %vm1228_vm2, %v4540_v16  ;;  %4411 = vmatmul.msk.bf16.gmra.mxu1 %vm1228_vm2, %v4583_v17 }
 0x15e   :  { %3504 = vst.msk [vmem:[%s6785_s2 + $0x314] sm:$0xf] %vm3306_vm3, %v3160_v26  ;;  %4454 = vmatmul.msk.bf16.gmra.mxu2 %vm1228_vm2, %v4626_v22  ;;  %4497 = vmatmul.msk.bf16.gmra.mxu3 %vm1228_vm2, %v4669_v23 }
 0x15f   :  { %3590 = vst.msk [vmem:[%s6785_s2 + $0x46c] sm:$0xf] %vm3306_vm3, %v3246_v27 }
 0x160   :  { %3333 = vst.msk [vmem:[%s6785_s2 + $0x68] sm:$0xf] %vm3306_vm3, %v2989_v28 }
 0x161   :  { %3419 = vst.msk [vmem:[%s6785_s2 + $0x1c0] sm:$0xf] %vm3306_vm3, %v3075_v29  ;;  %v2256_v30 = vpop.f32.mrf.mxu2  ;;  %v2471_v31 = vpop.f32.mrf.mxu3 }
 0x162   :  { %v2818_v32 = vmax.f32 %v2256_v30, 0.0  ;;  %v2904_v33 = vmax.f32 %v2471_v31, 0.0  ;;  %v1828_v34 = vpop.f32.mrf.mxu0  ;;  %v2043_v35 = vpop.f32.mrf.mxu1 }
 0x163   :  { %v2647_v36 = vmax.f32 %v1828_v34, 0.0  ;;  %v2733_v37 = vmax.f32 %v2043_v35, 0.0 }
 0x164   :  { %v3161_v38 = vpack.c.bf16 %v2818_v32, %v2818_v32  ;;  %v3247_v39 = vpack.c.bf16 %v2904_v33, %v2904_v33 }
 0x165   :  { %v2990_v40 = vpack.c.bf16 %v2647_v36, %v2647_v36  ;;  %v3076_v41 = vpack.c.bf16 %v2733_v37, %v2733_v37  ;;  %v4543_v36 = vld [vmem:[%s6784_s0 + $0xc0] sm:$0xff]  ;;  %v4586_v37 = vld [vmem:[%s6784_s0 + $0x218] sm:$0xff] }
 0x166   :  { %3505 = vst.msk [vmem:[%s6785_s2 + $0x318] sm:$0xf] %vm3306_vm3, %v3161_v38 }
 0x167   :  { %3591 = vst.msk [vmem:[%s6785_s2 + $0x470] sm:$0xf] %vm3306_vm3, %v3247_v39 }
 0x168   :  { %3334 = vst.msk [vmem:[%s6785_s2 + $0x6c] sm:$0xf] %vm3306_vm3, %v2990_v40 }
 0x169   :  { %3420 = vst.msk [vmem:[%s6785_s2 + $0x1c4] sm:$0xf] %vm3306_vm3, %v3076_v41  ;;  %v2258_v42 = vpop.f32.mrf.mxu2  ;;  %v2473_v43 = vpop.f32.mrf.mxu3 }
 0x16a   :  { %v2819_v46 = vmax.f32 %v2258_v42, 0.0  ;;  %v2905_v47 = vmax.f32 %v2473_v43, 0.0  ;;  %v1831_v48 = vpop.f32.mrf.mxu0  ;;  %v2046_v49 = vpop.f32.mrf.mxu1  ;;  %v4629_v42 = vld [vmem:[%s6784_s0 + $0x370] sm:$0xff]  ;;  %v4672_v43 = vld [vmem:[%s6784_s0 + $0x4c8] sm:$0xff] }
 0x16b   :  { %v2648_v52 = vmax.f32 %v1831_v48, 0.0  ;;  %v2734_v53 = vmax.f32 %v2046_v49, 0.0 }
 0x16c   :  { %v3162_v54 = vpack.c.bf16 %v2819_v46, %v2819_v46  ;;  %v3248_v55 = vpack.c.bf16 %v2905_v47, %v2905_v47 }
 0x16d   :  { %v2991_v56 = vpack.c.bf16 %v2648_v52, %v2648_v52  ;;  %v3077_v57 = vpack.c.bf16 %v2734_v53, %v2734_v53  ;;  %4369 = vmatmul.msk.bf16.gmra.mxu0 %vm1228_vm2, %v4541_v44  ;;  %4412 = vmatmul.msk.bf16.gmra.mxu1 %vm1228_vm2, %v4584_v45 }
 0x16e   :  { %3506 = vst.msk [vmem:[%s6785_s2 + $0x31c] sm:$0xf] %vm3306_vm3, %v3162_v54  ;;  %4455 = vmatmul.msk.bf16.gmra.mxu2 %vm1228_vm2, %v4627_v50  ;;  %4498 = vmatmul.msk.bf16.gmra.mxu3 %vm1228_vm2, %v4670_v51 }
 0x16f   :  { %3592 = vst.msk [vmem:[%s6785_s2 + $0x474] sm:$0xf] %vm3306_vm3, %v3248_v55 }
 0x170   :  { %3335 = vst.msk [vmem:[%s6785_s2 + $0x70] sm:$0xf] %vm3306_vm3, %v2991_v56 }
 0x171   :  { %3421 = vst.msk [vmem:[%s6785_s2 + $0x1c8] sm:$0xf] %vm3306_vm3, %v3077_v57  ;;  %v2261_v58 = vpop.f32.mrf.mxu2  ;;  %v2476_v59 = vpop.f32.mrf.mxu3 }
 0x172   :  { %v2820_v60 = vmax.f32 %v2261_v58, 0.0  ;;  %v2906_v61 = vmax.f32 %v2476_v59, 0.0  ;;  %v1833_v62 = vpop.f32.mrf.mxu0  ;;  %v2048_v63 = vpop.f32.mrf.mxu1 }
 0x173   :  { %v2649_v0 = vmax.f32 %v1833_v62, 0.0  ;;  %v2735_v1 = vmax.f32 %v2048_v63, 0.0 }
 0x174   :  { %v3163_v2 = vpack.c.bf16 %v2820_v60, %v2820_v60  ;;  %v3249_v3 = vpack.c.bf16 %v2906_v61, %v2906_v61 }
 0x175   :  { %v2992_v4 = vpack.c.bf16 %v2649_v0, %v2649_v0  ;;  %v3078_v5 = vpack.c.bf16 %v2735_v1, %v2735_v1  ;;  %v4544_v0 = vld [vmem:[%s6784_s0 + $0xc8] sm:$0xff]  ;;  %v4587_v1 = vld [vmem:[%s6784_s0 + $0x220] sm:$0xff] }
 0x176   :  { %3507 = vst.msk [vmem:[%s6785_s2 + $0x320] sm:$0xf] %vm3306_vm3, %v3163_v2 }
 0x177   :  { %3593 = vst.msk [vmem:[%s6785_s2 + $0x478] sm:$0xf] %vm3306_vm3, %v3249_v3 }
 0x178   :  { %3336 = vst.msk [vmem:[%s6785_s2 + $0x74] sm:$0xf] %vm3306_vm3, %v2992_v4 }
 0x179   :  { %3422 = vst.msk [vmem:[%s6785_s2 + $0x1cc] sm:$0xf] %vm3306_vm3, %v3078_v5  ;;  %v2263_v6 = vpop.f32.mrf.mxu2  ;;  %v2478_v7 = vpop.f32.mrf.mxu3 }
 0x17a   :  { %v2821_v10 = vmax.f32 %v2263_v6, 0.0  ;;  %v2907_v11 = vmax.f32 %v2478_v7, 0.0  ;;  %v1836_v12 = vpop.f32.mrf.mxu0  ;;  %v2051_v13 = vpop.f32.mrf.mxu1  ;;  %v4630_v6 = vld [vmem:[%s6784_s0 + $0x378] sm:$0xff]  ;;  %v4673_v7 = vld [vmem:[%s6784_s0 + $0x4d0] sm:$0xff] }
 0x17b   :  { %v2650_v16 = vmax.f32 %v1836_v12, 0.0  ;;  %v2736_v17 = vmax.f32 %v2051_v13, 0.0 }
 0x17c   :  { %v3164_v18 = vpack.c.bf16 %v2821_v10, %v2821_v10  ;;  %v3250_v19 = vpack.c.bf16 %v2907_v11, %v2907_v11 }
 0x17d   :  { %v2993_v20 = vpack.c.bf16 %v2650_v16, %v2650_v16  ;;  %v3079_v21 = vpack.c.bf16 %v2736_v17, %v2736_v17  ;;  %4370 = vmatmul.msk.bf16.gmra.mxu0 %vm1228_vm2, %v4542_v8  ;;  %4413 = vmatmul.msk.bf16.gmra.mxu1 %vm1228_vm2, %v4585_v9 }
 0x17e   :  { %3508 = vst.msk [vmem:[%s6785_s2 + $0x324] sm:$0xf] %vm3306_vm3, %v3164_v18  ;;  %4456 = vmatmul.msk.bf16.gmra.mxu2 %vm1228_vm2, %v4628_v14  ;;  %4499 = vmatmul.msk.bf16.gmra.mxu3 %vm1228_vm2, %v4671_v15 }
 0x17f   :  { %3594 = vst.msk [vmem:[%s6785_s2 + $0x47c] sm:$0xf] %vm3306_vm3, %v3250_v19 }
 0x180   :  { %3337 = vst.msk [vmem:[%s6785_s2 + $0x78] sm:$0xf] %vm3306_vm3, %v2993_v20 }
 0x181   :  { %3423 = vst.msk [vmem:[%s6785_s2 + $0x1d0] sm:$0xf] %vm3306_vm3, %v3079_v21  ;;  %v2266_v22 = vpop.f32.mrf.mxu2  ;;  %v2481_v23 = vpop.f32.mrf.mxu3 }
 0x182   :  { %v2822_v24 = vmax.f32 %v2266_v22, 0.0  ;;  %v2908_v25 = vmax.f32 %v2481_v23, 0.0  ;;  %v1838_v26 = vpop.f32.mrf.mxu0  ;;  %v2053_v27 = vpop.f32.mrf.mxu1 }
 0x183   :  { %v2651_v28 = vmax.f32 %v1838_v26, 0.0  ;;  %v2737_v29 = vmax.f32 %v2053_v27, 0.0 }
 0x184   :  { %v3165_v30 = vpack.c.bf16 %v2822_v24, %v2822_v24  ;;  %v3251_v31 = vpack.c.bf16 %v2908_v25, %v2908_v25 }
 0x185   :  { %v2994_v32 = vpack.c.bf16 %v2651_v28, %v2651_v28  ;;  %v3080_v33 = vpack.c.bf16 %v2737_v29, %v2737_v29  ;;  %v4545_v28 = vld [vmem:[%s6784_s0 + $0xd0] sm:$0xff]  ;;  %v4588_v29 = vld [vmem:[%s6784_s0 + $0x228] sm:$0xff] }
 0x186   :  { %3509 = vst.msk [vmem:[%s6785_s2 + $0x328] sm:$0xf] %vm3306_vm3, %v3165_v30 }
 0x187   :  { %3595 = vst.msk [vmem:[%s6785_s2 + $0x480] sm:$0xf] %vm3306_vm3, %v3251_v31 }
 0x188   :  { %3338 = vst.msk [vmem:[%s6785_s2 + $0x7c] sm:$0xf] %vm3306_vm3, %v2994_v32 }
 0x189   :  { %3424 = vst.msk [vmem:[%s6785_s2 + $0x1d4] sm:$0xf] %vm3306_vm3, %v3080_v33  ;;  %v2268_v34 = vpop.f32.mrf.mxu2  ;;  %v2483_v35 = vpop.f32.mrf.mxu3 }
 0x18a   :  { %v2823_v38 = vmax.f32 %v2268_v34, 0.0  ;;  %v2909_v39 = vmax.f32 %v2483_v35, 0.0  ;;  %v1841_v40 = vpop.f32.mrf.mxu0  ;;  %v2056_v41 = vpop.f32.mrf.mxu1  ;;  %v4631_v34 = vld [vmem:[%s6784_s0 + $0x380] sm:$0xff]  ;;  %v4674_v35 = vld [vmem:[%s6784_s0 + $0x4d8] sm:$0xff] }
 0x18b   :  { %v2652_v44 = vmax.f32 %v1841_v40, 0.0  ;;  %v2738_v45 = vmax.f32 %v2056_v41, 0.0 }
 0x18c   :  { %v3166_v46 = vpack.c.bf16 %v2823_v38, %v2823_v38  ;;  %v3252_v47 = vpack.c.bf16 %v2909_v39, %v2909_v39 }
 0x18d   :  { %v2995_v48 = vpack.c.bf16 %v2652_v44, %v2652_v44  ;;  %v3081_v49 = vpack.c.bf16 %v2738_v45, %v2738_v45  ;;  %4371 = vmatmul.msk.bf16.gmra.mxu0 %vm1228_vm2, %v4543_v36  ;;  %4414 = vmatmul.msk.bf16.gmra.mxu1 %vm1228_vm2, %v4586_v37 }
 0x18e   :  { %3510 = vst.msk [vmem:[%s6785_s2 + $0x32c] sm:$0xf] %vm3306_vm3, %v3166_v46  ;;  %4457 = vmatmul.msk.bf16.gmra.mxu2 %vm1228_vm2, %v4629_v42  ;;  %4500 = vmatmul.msk.bf16.gmra.mxu3 %vm1228_vm2, %v4672_v43 }
 0x18f   :  { %3596 = vst.msk [vmem:[%s6785_s2 + $0x484] sm:$0xf] %vm3306_vm3, %v3252_v47 }
 0x190   :  { %3339 = vst.msk [vmem:[%s6785_s2 + $0x80] sm:$0xf] %vm3306_vm3, %v2995_v48 }
 0x191   :  { %3425 = vst.msk [vmem:[%s6785_s2 + $0x1d8] sm:$0xf] %vm3306_vm3, %v3081_v49  ;;  %v2271_v50 = vpop.f32.mrf.mxu2  ;;  %v2486_v51 = vpop.f32.mrf.mxu3 }
 0x192   :  { %v2824_v52 = vmax.f32 %v2271_v50, 0.0  ;;  %v2910_v53 = vmax.f32 %v2486_v51, 0.0  ;;  %v1843_v54 = vpop.f32.mrf.mxu0  ;;  %v2058_v55 = vpop.f32.mrf.mxu1 }
 0x193   :  { %v2653_v56 = vmax.f32 %v1843_v54, 0.0  ;;  %v2739_v57 = vmax.f32 %v2058_v55, 0.0 }
 0x194   :  { %v3167_v58 = vpack.c.bf16 %v2824_v52, %v2824_v52  ;;  %v3253_v59 = vpack.c.bf16 %v2910_v53, %v2910_v53 }
 0x195   :  { %v2996_v60 = vpack.c.bf16 %v2653_v56, %v2653_v56  ;;  %v3082_v61 = vpack.c.bf16 %v2739_v57, %v2739_v57  ;;  %v4546_v56 = vld [vmem:[%s6784_s0 + $0xd8] sm:$0xff]  ;;  %v4589_v57 = vld [vmem:[%s6784_s0 + $0x230] sm:$0xff] }
 0x196   :  { %3511 = vst.msk [vmem:[%s6785_s2 + $0x330] sm:$0xf] %vm3306_vm3, %v3167_v58 }
 0x197   :  { %3597 = vst.msk [vmem:[%s6785_s2 + $0x488] sm:$0xf] %vm3306_vm3, %v3253_v59 }
 0x198   :  { %3340 = vst.msk [vmem:[%s6785_s2 + $0x84] sm:$0xf] %vm3306_vm3, %v2996_v60 }
 0x199   :  { %3426 = vst.msk [vmem:[%s6785_s2 + $0x1dc] sm:$0xf] %vm3306_vm3, %v3082_v61  ;;  %v2273_v62 = vpop.f32.mrf.mxu2  ;;  %v2488_v63 = vpop.f32.mrf.mxu3 }
 0x19a   :  { %v2825_v2 = vmax.f32 %v2273_v62, 0.0  ;;  %v2911_v3 = vmax.f32 %v2488_v63, 0.0  ;;  %v1846_v4 = vpop.f32.mrf.mxu0  ;;  %v2061_v5 = vpop.f32.mrf.mxu1  ;;  %v4632_v62 = vld [vmem:[%s6784_s0 + $0x388] sm:$0xff]  ;;  %v4675_v63 = vld [vmem:[%s6784_s0 + $0x4e0] sm:$0xff] }
 0x19b   :  { %v2654_v8 = vmax.f32 %v1846_v4, 0.0  ;;  %v2740_v9 = vmax.f32 %v2061_v5, 0.0 }
 0x19c   :  { %v3168_v10 = vpack.c.bf16 %v2825_v2, %v2825_v2  ;;  %v3254_v11 = vpack.c.bf16 %v2911_v3, %v2911_v3 }
 0x19d   :  { %v2997_v12 = vpack.c.bf16 %v2654_v8, %v2654_v8  ;;  %v3083_v13 = vpack.c.bf16 %v2740_v9, %v2740_v9  ;;  %4372 = vmatmul.msk.bf16.gmra.mxu0 %vm1228_vm2, %v4544_v0  ;;  %4415 = vmatmul.msk.bf16.gmra.mxu1 %vm1228_vm2, %v4587_v1 }
 0x19e   :  { %3512 = vst.msk [vmem:[%s6785_s2 + $0x334] sm:$0xf] %vm3306_vm3, %v3168_v10  ;;  %4458 = vmatmul.msk.bf16.gmra.mxu2 %vm1228_vm2, %v4630_v6  ;;  %4501 = vmatmul.msk.bf16.gmra.mxu3 %vm1228_vm2, %v4673_v7 }
 0x19f   :  { %3598 = vst.msk [vmem:[%s6785_s2 + $0x48c] sm:$0xf] %vm3306_vm3, %v3254_v11 }
 0x1a0   :  { %3341 = vst.msk [vmem:[%s6785_s2 + $0x88] sm:$0xf] %vm3306_vm3, %v2997_v12 }
 0x1a1   :  { %3427 = vst.msk [vmem:[%s6785_s2 + $0x1e0] sm:$0xf] %vm3306_vm3, %v3083_v13  ;;  %v2276_v14 = vpop.f32.mrf.mxu2  ;;  %v2491_v15 = vpop.f32.mrf.mxu3 }
 0x1a2   :  { %v2826_v16 = vmax.f32 %v2276_v14, 0.0  ;;  %v2912_v17 = vmax.f32 %v2491_v15, 0.0  ;;  %v1848_v18 = vpop.f32.mrf.mxu0  ;;  %v2063_v19 = vpop.f32.mrf.mxu1 }
 0x1a3   :  { %v2655_v20 = vmax.f32 %v1848_v18, 0.0  ;;  %v2741_v21 = vmax.f32 %v2063_v19, 0.0 }
 0x1a4   :  { %v3169_v22 = vpack.c.bf16 %v2826_v16, %v2826_v16  ;;  %v3255_v23 = vpack.c.bf16 %v2912_v17, %v2912_v17 }
 0x1a5   :  { %v2998_v24 = vpack.c.bf16 %v2655_v20, %v2655_v20  ;;  %v3084_v25 = vpack.c.bf16 %v2741_v21, %v2741_v21  ;;  %v4547_v20 = vld [vmem:[%s6784_s0 + $0xe0] sm:$0xff]  ;;  %v4590_v21 = vld [vmem:[%s6784_s0 + $0x238] sm:$0xff] }
 0x1a6   :  { %3513 = vst.msk [vmem:[%s6785_s2 + $0x338] sm:$0xf] %vm3306_vm3, %v3169_v22 }
 0x1a7   :  { %3599 = vst.msk [vmem:[%s6785_s2 + $0x490] sm:$0xf] %vm3306_vm3, %v3255_v23 }
 0x1a8   :  { %3342 = vst.msk [vmem:[%s6785_s2 + $0x8c] sm:$0xf] %vm3306_vm3, %v2998_v24 }
 0x1a9   :  { %3428 = vst.msk [vmem:[%s6785_s2 + $0x1e4] sm:$0xf] %vm3306_vm3, %v3084_v25  ;;  %v2278_v26 = vpop.f32.mrf.mxu2  ;;  %v2493_v27 = vpop.f32.mrf.mxu3 }
 0x1aa   :  { %v2827_v30 = vmax.f32 %v2278_v26, 0.0  ;;  %v2913_v31 = vmax.f32 %v2493_v27, 0.0  ;;  %v1851_v32 = vpop.f32.mrf.mxu0  ;;  %v2066_v33 = vpop.f32.mrf.mxu1  ;;  %v4633_v26 = vld [vmem:[%s6784_s0 + $0x390] sm:$0xff]  ;;  %v4676_v27 = vld [vmem:[%s6784_s0 + $0x4e8] sm:$0xff] }
 0x1ab   :  { %v2656_v36 = vmax.f32 %v1851_v32, 0.0  ;;  %v2742_v37 = vmax.f32 %v2066_v33, 0.0 }
 0x1ac   :  { %v3170_v38 = vpack.c.bf16 %v2827_v30, %v2827_v30  ;;  %v3256_v39 = vpack.c.bf16 %v2913_v31, %v2913_v31 }
 0x1ad   :  { %v2999_v40 = vpack.c.bf16 %v2656_v36, %v2656_v36  ;;  %v3085_v41 = vpack.c.bf16 %v2742_v37, %v2742_v37  ;;  %4373 = vmatmul.msk.bf16.gmra.mxu0 %vm1228_vm2, %v4545_v28  ;;  %4416 = vmatmul.msk.bf16.gmra.mxu1 %vm1228_vm2, %v4588_v29 }
 0x1ae   :  { %3514 = vst.msk [vmem:[%s6785_s2 + $0x33c] sm:$0xf] %vm3306_vm3, %v3170_v38  ;;  %4459 = vmatmul.msk.bf16.gmra.mxu2 %vm1228_vm2, %v4631_v34  ;;  %4502 = vmatmul.msk.bf16.gmra.mxu3 %vm1228_vm2, %v4674_v35 }
 0x1af   :  { %3600 = vst.msk [vmem:[%s6785_s2 + $0x494] sm:$0xf] %vm3306_vm3, %v3256_v39 }
 0x1b0   :  { %3343 = vst.msk [vmem:[%s6785_s2 + $0x90] sm:$0xf] %vm3306_vm3, %v2999_v40 }
 0x1b1   :  { %3429 = vst.msk [vmem:[%s6785_s2 + $0x1e8] sm:$0xf] %vm3306_vm3, %v3085_v41  ;;  %v2281_v42 = vpop.f32.mrf.mxu2  ;;  %v2496_v43 = vpop.f32.mrf.mxu3 }
 0x1b2   :  { %v2828_v44 = vmax.f32 %v2281_v42, 0.0  ;;  %v2914_v45 = vmax.f32 %v2496_v43, 0.0  ;;  %v1853_v46 = vpop.f32.mrf.mxu0  ;;  %v2068_v47 = vpop.f32.mrf.mxu1 }
 0x1b3   :  { %v2657_v48 = vmax.f32 %v1853_v46, 0.0  ;;  %v2743_v49 = vmax.f32 %v2068_v47, 0.0 }
 0x1b4   :  { %v3171_v50 = vpack.c.bf16 %v2828_v44, %v2828_v44  ;;  %v3257_v51 = vpack.c.bf16 %v2914_v45, %v2914_v45 }
 0x1b5   :  { %v3000_v52 = vpack.c.bf16 %v2657_v48, %v2657_v48  ;;  %v3086_v53 = vpack.c.bf16 %v2743_v49, %v2743_v49  ;;  %v4548_v48 = vld [vmem:[%s6784_s0 + $0xe8] sm:$0xff]  ;;  %v4591_v49 = vld [vmem:[%s6784_s0 + $0x240] sm:$0xff] }
 0x1b6   :  { %3515 = vst.msk [vmem:[%s6785_s2 + $0x340] sm:$0xf] %vm3306_vm3, %v3171_v50 }
 0x1b7   :  { %3601 = vst.msk [vmem:[%s6785_s2 + $0x498] sm:$0xf] %vm3306_vm3, %v3257_v51 }
 0x1b8   :  { %3344 = vst.msk [vmem:[%s6785_s2 + $0x94] sm:$0xf] %vm3306_vm3, %v3000_v52 }
 0x1b9   :  { %3430 = vst.msk [vmem:[%s6785_s2 + $0x1ec] sm:$0xf] %vm3306_vm3, %v3086_v53  ;;  %v2283_v54 = vpop.f32.mrf.mxu2  ;;  %v2498_v55 = vpop.f32.mrf.mxu3 }
 0x1ba   :  { %v2829_v58 = vmax.f32 %v2283_v54, 0.0  ;;  %v2915_v59 = vmax.f32 %v2498_v55, 0.0  ;;  %v1856_v60 = vpop.f32.mrf.mxu0  ;;  %v2071_v61 = vpop.f32.mrf.mxu1  ;;  %v4634_v54 = vld [vmem:[%s6784_s0 + $0x398] sm:$0xff]  ;;  %v4677_v55 = vld [vmem:[%s6784_s0 + $0x4f0] sm:$0xff] }
 0x1bb   :  { %v2658_v0 = vmax.f32 %v1856_v60, 0.0  ;;  %v2744_v1 = vmax.f32 %v2071_v61, 0.0 }
 0x1bc   :  { %v3172_v2 = vpack.c.bf16 %v2829_v58, %v2829_v58  ;;  %v3258_v3 = vpack.c.bf16 %v2915_v59, %v2915_v59 }
 0x1bd   :  { %v3001_v4 = vpack.c.bf16 %v2658_v0, %v2658_v0  ;;  %v3087_v5 = vpack.c.bf16 %v2744_v1, %v2744_v1  ;;  %4374 = vmatmul.msk.bf16.gmra.mxu0 %vm1228_vm2, %v4546_v56  ;;  %4417 = vmatmul.msk.bf16.gmra.mxu1 %vm1228_vm2, %v4589_v57 }
 0x1be   :  { %3516 = vst.msk [vmem:[%s6785_s2 + $0x344] sm:$0xf] %vm3306_vm3, %v3172_v2  ;;  %4460 = vmatmul.msk.bf16.gmra.mxu2 %vm1228_vm2, %v4632_v62  ;;  %4503 = vmatmul.msk.bf16.gmra.mxu3 %vm1228_vm2, %v4675_v63 }
 0x1bf   :  { %3602 = vst.msk [vmem:[%s6785_s2 + $0x49c] sm:$0xf] %vm3306_vm3, %v3258_v3 }
 0x1c0   :  { %3345 = vst.msk [vmem:[%s6785_s2 + $0x98] sm:$0xf] %vm3306_vm3, %v3001_v4 }
 0x1c1   :  { %3431 = vst.msk [vmem:[%s6785_s2 + $0x1f0] sm:$0xf] %vm3306_vm3, %v3087_v5  ;;  %v2286_v6 = vpop.f32.mrf.mxu2  ;;  %v2501_v7 = vpop.f32.mrf.mxu3 }
 0x1c2   :  { %v2830_v8 = vmax.f32 %v2286_v6, 0.0  ;;  %v2916_v9 = vmax.f32 %v2501_v7, 0.0  ;;  %v1858_v10 = vpop.f32.mrf.mxu0  ;;  %v2073_v11 = vpop.f32.mrf.mxu1 }
 0x1c3   :  { %v2659_v12 = vmax.f32 %v1858_v10, 0.0  ;;  %v2745_v13 = vmax.f32 %v2073_v11, 0.0 }
 0x1c4   :  { %v3173_v14 = vpack.c.bf16 %v2830_v8, %v2830_v8  ;;  %v3259_v15 = vpack.c.bf16 %v2916_v9, %v2916_v9 }
 0x1c5   :  { %v3002_v16 = vpack.c.bf16 %v2659_v12, %v2659_v12  ;;  %v3088_v17 = vpack.c.bf16 %v2745_v13, %v2745_v13  ;;  %v4549_v12 = vld [vmem:[%s6784_s0 + $0xf0] sm:$0xff]  ;;  %v4592_v13 = vld [vmem:[%s6784_s0 + $0x248] sm:$0xff] }
 0x1c6   :  { %3517 = vst.msk [vmem:[%s6785_s2 + $0x348] sm:$0xf] %vm3306_vm3, %v3173_v14 }
 0x1c7   :  { %3603 = vst.msk [vmem:[%s6785_s2 + $0x4a0] sm:$0xf] %vm3306_vm3, %v3259_v15 }
 0x1c8   :  { %3346 = vst.msk [vmem:[%s6785_s2 + $0x9c] sm:$0xf] %vm3306_vm3, %v3002_v16 }
 0x1c9   :  { %3432 = vst.msk [vmem:[%s6785_s2 + $0x1f4] sm:$0xf] %vm3306_vm3, %v3088_v17  ;;  %v2288_v18 = vpop.f32.mrf.mxu2  ;;  %v2503_v19 = vpop.f32.mrf.mxu3 }
 0x1ca   :  { %v2831_v22 = vmax.f32 %v2288_v18, 0.0  ;;  %v2917_v23 = vmax.f32 %v2503_v19, 0.0  ;;  %v1861_v24 = vpop.f32.mrf.mxu0  ;;  %v2076_v25 = vpop.f32.mrf.mxu1  ;;  %v4635_v18 = vld [vmem:[%s6784_s0 + $0x3a0] sm:$0xff]  ;;  %v4678_v19 = vld [vmem:[%s6784_s0 + $0x4f8] sm:$0xff] }
 0x1cb   :  { %v2660_v28 = vmax.f32 %v1861_v24, 0.0  ;;  %v2746_v29 = vmax.f32 %v2076_v25, 0.0 }
 0x1cc   :  { %v3174_v30 = vpack.c.bf16 %v2831_v22, %v2831_v22  ;;  %v3260_v31 = vpack.c.bf16 %v2917_v23, %v2917_v23 }
 0x1cd   :  { %v3003_v32 = vpack.c.bf16 %v2660_v28, %v2660_v28  ;;  %v3089_v33 = vpack.c.bf16 %v2746_v29, %v2746_v29  ;;  %4375 = vmatmul.msk.bf16.gmra.mxu0 %vm1228_vm2, %v4547_v20  ;;  %4418 = vmatmul.msk.bf16.gmra.mxu1 %vm1228_vm2, %v4590_v21 }
 0x1ce   :  { %3518 = vst.msk [vmem:[%s6785_s2 + $0x34c] sm:$0xf] %vm3306_vm3, %v3174_v30  ;;  %4461 = vmatmul.msk.bf16.gmra.mxu2 %vm1228_vm2, %v4633_v26  ;;  %4504 = vmatmul.msk.bf16.gmra.mxu3 %vm1228_vm2, %v4676_v27 }
 0x1cf   :  { %3604 = vst.msk [vmem:[%s6785_s2 + $0x4a4] sm:$0xf] %vm3306_vm3, %v3260_v31 }
 0x1d0   :  { %3347 = vst.msk [vmem:[%s6785_s2 + $0xa0] sm:$0xf] %vm3306_vm3, %v3003_v32 }
 0x1d1   :  { %3433 = vst.msk [vmem:[%s6785_s2 + $0x1f8] sm:$0xf] %vm3306_vm3, %v3089_v33  ;;  %v2291_v34 = vpop.f32.mrf.mxu2  ;;  %v2506_v35 = vpop.f32.mrf.mxu3 }
 0x1d2   :  { %v2832_v36 = vmax.f32 %v2291_v34, 0.0  ;;  %v2918_v37 = vmax.f32 %v2506_v35, 0.0  ;;  %v1863_v38 = vpop.f32.mrf.mxu0  ;;  %v2078_v39 = vpop.f32.mrf.mxu1 }
 0x1d3   :  { %v2661_v40 = vmax.f32 %v1863_v38, 0.0  ;;  %v2747_v41 = vmax.f32 %v2078_v39, 0.0 }
 0x1d4   :  { %v3175_v42 = vpack.c.bf16 %v2832_v36, %v2832_v36  ;;  %v3261_v43 = vpack.c.bf16 %v2918_v37, %v2918_v37 }
 0x1d5   :  { %v3004_v44 = vpack.c.bf16 %v2661_v40, %v2661_v40  ;;  %v3090_v45 = vpack.c.bf16 %v2747_v41, %v2747_v41  ;;  %v4550_v40 = vld [vmem:[%s6784_s0 + $0xf8] sm:$0xff]  ;;  %v4593_v41 = vld [vmem:[%s6784_s0 + $0x250] sm:$0xff] }
 0x1d6   :  { %3519 = vst.msk [vmem:[%s6785_s2 + $0x350] sm:$0xf] %vm3306_vm3, %v3175_v42 }
 0x1d7   :  { %3605 = vst.msk [vmem:[%s6785_s2 + $0x4a8] sm:$0xf] %vm3306_vm3, %v3261_v43 }
 0x1d8   :  { %3348 = vst.msk [vmem:[%s6785_s2 + $0xa4] sm:$0xf] %vm3306_vm3, %v3004_v44 }
 0x1d9   :  { %3434 = vst.msk [vmem:[%s6785_s2 + $0x1fc] sm:$0xf] %vm3306_vm3, %v3090_v45  ;;  %v2293_v46 = vpop.f32.mrf.mxu2  ;;  %v2508_v47 = vpop.f32.mrf.mxu3 }
 0x1da   :  { %v2833_v50 = vmax.f32 %v2293_v46, 0.0  ;;  %v2919_v51 = vmax.f32 %v2508_v47, 0.0  ;;  %v1866_v52 = vpop.f32.mrf.mxu0  ;;  %v2081_v53 = vpop.f32.mrf.mxu1  ;;  %v4636_v46 = vld [vmem:[%s6784_s0 + $0x3a8] sm:$0xff]  ;;  %v4679_v47 = vld [vmem:[%s6784_s0 + $0x500] sm:$0xff] }
 0x1db   :  { %v2662_v56 = vmax.f32 %v1866_v52, 0.0  ;;  %v2748_v57 = vmax.f32 %v2081_v53, 0.0 }
 0x1dc   :  { %v3176_v58 = vpack.c.bf16 %v2833_v50, %v2833_v50  ;;  %v3262_v59 = vpack.c.bf16 %v2919_v51, %v2919_v51 }
 0x1dd   :  { %v3005_v60 = vpack.c.bf16 %v2662_v56, %v2662_v56  ;;  %v3091_v61 = vpack.c.bf16 %v2748_v57, %v2748_v57  ;;  %4376 = vmatmul.msk.bf16.gmra.mxu0 %vm1228_vm2, %v4548_v48  ;;  %4419 = vmatmul.msk.bf16.gmra.mxu1 %vm1228_vm2, %v4591_v49 }
 0x1de   :  { %3520 = vst.msk [vmem:[%s6785_s2 + $0x354] sm:$0xf] %vm3306_vm3, %v3176_v58  ;;  %4462 = vmatmul.msk.bf16.gmra.mxu2 %vm1228_vm2, %v4634_v54  ;;  %4505 = vmatmul.msk.bf16.gmra.mxu3 %vm1228_vm2, %v4677_v55 }
 0x1df   :  { %3606 = vst.msk [vmem:[%s6785_s2 + $0x4ac] sm:$0xf] %vm3306_vm3, %v3262_v59 }
 0x1e0   :  { %3349 = vst.msk [vmem:[%s6785_s2 + $0xa8] sm:$0xf] %vm3306_vm3, %v3005_v60 }
 0x1e1   :  { %3435 = vst.msk [vmem:[%s6785_s2 + $0x200] sm:$0xf] %vm3306_vm3, %v3091_v61  ;;  %v2296_v62 = vpop.f32.mrf.mxu2  ;;  %v2511_v63 = vpop.f32.mrf.mxu3 }
 0x1e2   :  { %v2834_v0 = vmax.f32 %v2296_v62, 0.0  ;;  %v2920_v1 = vmax.f32 %v2511_v63, 0.0  ;;  %v1868_v2 = vpop.f32.mrf.mxu0  ;;  %v2083_v3 = vpop.f32.mrf.mxu1 }
 0x1e3   :  { %v2663_v4 = vmax.f32 %v1868_v2, 0.0  ;;  %v2749_v5 = vmax.f32 %v2083_v3, 0.0 }
 0x1e4   :  { %v3177_v6 = vpack.c.bf16 %v2834_v0, %v2834_v0  ;;  %v3263_v7 = vpack.c.bf16 %v2920_v1, %v2920_v1 }
 0x1e5   :  { %v3006_v8 = vpack.c.bf16 %v2663_v4, %v2663_v4  ;;  %v3092_v9 = vpack.c.bf16 %v2749_v5, %v2749_v5  ;;  %v4551_v4 = vld [vmem:[%s6784_s0 + $0x100] sm:$0xff]  ;;  %v4594_v5 = vld [vmem:[%s6784_s0 + $0x258] sm:$0xff] }
 0x1e6   :  { %3521 = vst.msk [vmem:[%s6785_s2 + $0x358] sm:$0xf] %vm3306_vm3, %v3177_v6 }
 0x1e7   :  { %3607 = vst.msk [vmem:[%s6785_s2 + $0x4b0] sm:$0xf] %vm3306_vm3, %v3263_v7 }
 0x1e8   :  { %3350 = vst.msk [vmem:[%s6785_s2 + $0xac] sm:$0xf] %vm3306_vm3, %v3006_v8 }
 0x1e9   :  { %3436 = vst.msk [vmem:[%s6785_s2 + $0x204] sm:$0xf] %vm3306_vm3, %v3092_v9  ;;  %v2298_v10 = vpop.f32.mrf.mxu2  ;;  %v2513_v11 = vpop.f32.mrf.mxu3 }
 0x1ea   :  { %v2835_v14 = vmax.f32 %v2298_v10, 0.0  ;;  %v2921_v15 = vmax.f32 %v2513_v11, 0.0  ;;  %v1871_v16 = vpop.f32.mrf.mxu0  ;;  %v2086_v17 = vpop.f32.mrf.mxu1  ;;  %v4637_v10 = vld [vmem:[%s6784_s0 + $0x3b0] sm:$0xff]  ;;  %v4680_v11 = vld [vmem:[%s6784_s0 + $0x508] sm:$0xff] }
 0x1eb   :  { %v2664_v20 = vmax.f32 %v1871_v16, 0.0  ;;  %v2750_v21 = vmax.f32 %v2086_v17, 0.0 }
 0x1ec   :  { %v3178_v22 = vpack.c.bf16 %v2835_v14, %v2835_v14  ;;  %v3264_v23 = vpack.c.bf16 %v2921_v15, %v2921_v15 }
 0x1ed   :  { %v3007_v24 = vpack.c.bf16 %v2664_v20, %v2664_v20  ;;  %v3093_v25 = vpack.c.bf16 %v2750_v21, %v2750_v21  ;;  %4377 = vmatmul.msk.bf16.gmra.mxu0 %vm1228_vm2, %v4549_v12  ;;  %4420 = vmatmul.msk.bf16.gmra.mxu1 %vm1228_vm2, %v4592_v13 }
 0x1ee   :  { %3522 = vst.msk [vmem:[%s6785_s2 + $0x35c] sm:$0xf] %vm3306_vm3, %v3178_v22  ;;  %4463 = vmatmul.msk.bf16.gmra.mxu2 %vm1228_vm2, %v4635_v18  ;;  %4506 = vmatmul.msk.bf16.gmra.mxu3 %vm1228_vm2, %v4678_v19 }
 0x1ef   :  { %3608 = vst.msk [vmem:[%s6785_s2 + $0x4b4] sm:$0xf] %vm3306_vm3, %v3264_v23 }
 0x1f0   :  { %3351 = vst.msk [vmem:[%s6785_s2 + $0xb0] sm:$0xf] %vm3306_vm3, %v3007_v24 }
 0x1f1   :  { %3437 = vst.msk [vmem:[%s6785_s2 + $0x208] sm:$0xf] %vm3306_vm3, %v3093_v25  ;;  %v2301_v26 = vpop.f32.mrf.mxu2  ;;  %v2516_v27 = vpop.f32.mrf.mxu3 }
 0x1f2   :  { %v2836_v28 = vmax.f32 %v2301_v26, 0.0  ;;  %v2922_v29 = vmax.f32 %v2516_v27, 0.0  ;;  %v1873_v30 = vpop.f32.mrf.mxu0  ;;  %v2088_v31 = vpop.f32.mrf.mxu1 }
 0x1f3   :  { %v2665_v32 = vmax.f32 %v1873_v30, 0.0  ;;  %v2751_v33 = vmax.f32 %v2088_v31, 0.0 }
 0x1f4   :  { %v3179_v34 = vpack.c.bf16 %v2836_v28, %v2836_v28  ;;  %v3265_v35 = vpack.c.bf16 %v2922_v29, %v2922_v29 }
 0x1f5   :  { %v3008_v36 = vpack.c.bf16 %v2665_v32, %v2665_v32  ;;  %v3094_v37 = vpack.c.bf16 %v2751_v33, %v2751_v33  ;;  %v4552_v32 = vld [vmem:[%s6784_s0 + $0x108] sm:$0xff]  ;;  %v4595_v33 = vld [vmem:[%s6784_s0 + $0x260] sm:$0xff] }
 0x1f6   :  { %3523 = vst.msk [vmem:[%s6785_s2 + $0x360] sm:$0xf] %vm3306_vm3, %v3179_v34 }
 0x1f7   :  { %3609 = vst.msk [vmem:[%s6785_s2 + $0x4b8] sm:$0xf] %vm3306_vm3, %v3265_v35 }
 0x1f8   :  { %3352 = vst.msk [vmem:[%s6785_s2 + $0xb4] sm:$0xf] %vm3306_vm3, %v3008_v36 }
 0x1f9   :  { %3438 = vst.msk [vmem:[%s6785_s2 + $0x20c] sm:$0xf] %vm3306_vm3, %v3094_v37  ;;  %v2303_v38 = vpop.f32.mrf.mxu2  ;;  %v2518_v39 = vpop.f32.mrf.mxu3 }
 0x1fa   :  { %v2837_v42 = vmax.f32 %v2303_v38, 0.0  ;;  %v2923_v43 = vmax.f32 %v2518_v39, 0.0  ;;  %v1876_v44 = vpop.f32.mrf.mxu0  ;;  %v2091_v45 = vpop.f32.mrf.mxu1  ;;  %v4638_v38 = vld [vmem:[%s6784_s0 + $0x3b8] sm:$0xff]  ;;  %v4681_v39 = vld [vmem:[%s6784_s0 + $0x510] sm:$0xff] }
 0x1fb   :  { %v2666_v48 = vmax.f32 %v1876_v44, 0.0  ;;  %v2752_v49 = vmax.f32 %v2091_v45, 0.0 }
 0x1fc   :  { %v3180_v50 = vpack.c.bf16 %v2837_v42, %v2837_v42  ;;  %v3266_v51 = vpack.c.bf16 %v2923_v43, %v2923_v43 }
 0x1fd   :  { %v3009_v52 = vpack.c.bf16 %v2666_v48, %v2666_v48  ;;  %v3095_v53 = vpack.c.bf16 %v2752_v49, %v2752_v49  ;;  %4378 = vmatmul.msk.bf16.gmra.mxu0 %vm1228_vm2, %v4550_v40  ;;  %4421 = vmatmul.msk.bf16.gmra.mxu1 %vm1228_vm2, %v4593_v41 }
 0x1fe   :  { %3524 = vst.msk [vmem:[%s6785_s2 + $0x364] sm:$0xf] %vm3306_vm3, %v3180_v50  ;;  %4464 = vmatmul.msk.bf16.gmra.mxu2 %vm1228_vm2, %v4636_v46  ;;  %4507 = vmatmul.msk.bf16.gmra.mxu3 %vm1228_vm2, %v4679_v47 }
 0x1ff   :  { %3610 = vst.msk [vmem:[%s6785_s2 + $0x4bc] sm:$0xf] %vm3306_vm3, %v3266_v51 }
 0x200   :  { %3353 = vst.msk [vmem:[%s6785_s2 + $0xb8] sm:$0xf] %vm3306_vm3, %v3009_v52 }
 0x201   :  { %3439 = vst.msk [vmem:[%s6785_s2 + $0x210] sm:$0xf] %vm3306_vm3, %v3095_v53  ;;  %v2306_v54 = vpop.f32.mrf.mxu2  ;;  %v2521_v55 = vpop.f32.mrf.mxu3 }
 0x202   :  { %v2838_v56 = vmax.f32 %v2306_v54, 0.0  ;;  %v2924_v57 = vmax.f32 %v2521_v55, 0.0  ;;  %v1878_v58 = vpop.f32.mrf.mxu0  ;;  %v2093_v59 = vpop.f32.mrf.mxu1 }
 0x203   :  { %v2667_v60 = vmax.f32 %v1878_v58, 0.0  ;;  %v2753_v61 = vmax.f32 %v2093_v59, 0.0 }
 0x204   :  { %v3181_v62 = vpack.c.bf16 %v2838_v56, %v2838_v56  ;;  %v3267_v63 = vpack.c.bf16 %v2924_v57, %v2924_v57 }
 0x205   :  { %v3010_v0 = vpack.c.bf16 %v2667_v60, %v2667_v60  ;;  %v3096_v1 = vpack.c.bf16 %v2753_v61, %v2753_v61  ;;  %v4553_v60 = vld [vmem:[%s6784_s0 + $0x110] sm:$0xff]  ;;  %v4596_v61 = vld [vmem:[%s6784_s0 + $0x268] sm:$0xff] }
 0x206   :  { %3525 = vst.msk [vmem:[%s6785_s2 + $0x368] sm:$0xf] %vm3306_vm3, %v3181_v62 }
 0x207   :  { %3611 = vst.msk [vmem:[%s6785_s2 + $0x4c0] sm:$0xf] %vm3306_vm3, %v3267_v63 }
 0x208   :  { %3354 = vst.msk [vmem:[%s6785_s2 + $0xbc] sm:$0xf] %vm3306_vm3, %v3010_v0 }
 0x209   :  { %3440 = vst.msk [vmem:[%s6785_s2 + $0x214] sm:$0xf] %vm3306_vm3, %v3096_v1  ;;  %v2308_v2 = vpop.f32.mrf.mxu2  ;;  %v2523_v3 = vpop.f32.mrf.mxu3 }
 0x20a   :  { %v2839_v6 = vmax.f32 %v2308_v2, 0.0  ;;  %v2925_v7 = vmax.f32 %v2523_v3, 0.0  ;;  %v1881_v8 = vpop.f32.mrf.mxu0  ;;  %v2096_v9 = vpop.f32.mrf.mxu1  ;;  %v4639_v2 = vld [vmem:[%s6784_s0 + $0x3c0] sm:$0xff]  ;;  %v4682_v3 = vld [vmem:[%s6784_s0 + $0x518] sm:$0xff] }
 0x20b   :  { %v2668_v12 = vmax.f32 %v1881_v8, 0.0  ;;  %v2754_v13 = vmax.f32 %v2096_v9, 0.0 }
 0x20c   :  { %v3182_v14 = vpack.c.bf16 %v2839_v6, %v2839_v6  ;;  %v3268_v15 = vpack.c.bf16 %v2925_v7, %v2925_v7 }
 0x20d   :  { %v3011_v16 = vpack.c.bf16 %v2668_v12, %v2668_v12  ;;  %v3097_v17 = vpack.c.bf16 %v2754_v13, %v2754_v13  ;;  %4379 = vmatmul.msk.bf16.gmra.mxu0 %vm1228_vm2, %v4551_v4  ;;  %4422 = vmatmul.msk.bf16.gmra.mxu1 %vm1228_vm2, %v4594_v5 }
 0x20e   :  { %3526 = vst.msk [vmem:[%s6785_s2 + $0x36c] sm:$0xf] %vm3306_vm3, %v3182_v14  ;;  %4465 = vmatmul.msk.bf16.gmra.mxu2 %vm1228_vm2, %v4637_v10  ;;  %4508 = vmatmul.msk.bf16.gmra.mxu3 %vm1228_vm2, %v4680_v11 }
 0x20f   :  { %3612 = vst.msk [vmem:[%s6785_s2 + $0x4c4] sm:$0xf] %vm3306_vm3, %v3268_v15 }
 0x210   :  { %3355 = vst.msk [vmem:[%s6785_s2 + $0xc0] sm:$0xf] %vm3306_vm3, %v3011_v16 }
 0x211   :  { %3441 = vst.msk [vmem:[%s6785_s2 + $0x218] sm:$0xf] %vm3306_vm3, %v3097_v17  ;;  %v2311_v18 = vpop.f32.mrf.mxu2  ;;  %v2526_v19 = vpop.f32.mrf.mxu3 }
 0x212   :  { %v2840_v20 = vmax.f32 %v2311_v18, 0.0  ;;  %v2926_v21 = vmax.f32 %v2526_v19, 0.0  ;;  %v1883_v22 = vpop.f32.mrf.mxu0  ;;  %v2098_v23 = vpop.f32.mrf.mxu1 }
 0x213   :  { %v2669_v24 = vmax.f32 %v1883_v22, 0.0  ;;  %v2755_v25 = vmax.f32 %v2098_v23, 0.0 }
 0x214   :  { %v3183_v26 = vpack.c.bf16 %v2840_v20, %v2840_v20  ;;  %v3269_v27 = vpack.c.bf16 %v2926_v21, %v2926_v21 }
 0x215   :  { %v3012_v28 = vpack.c.bf16 %v2669_v24, %v2669_v24  ;;  %v3098_v29 = vpack.c.bf16 %v2755_v25, %v2755_v25  ;;  %v4554_v24 = vld [vmem:[%s6784_s0 + $0x118] sm:$0xff]  ;;  %v4597_v25 = vld [vmem:[%s6784_s0 + $0x270] sm:$0xff] }
 0x216   :  { %3527 = vst.msk [vmem:[%s6785_s2 + $0x370] sm:$0xf] %vm3306_vm3, %v3183_v26 }
 0x217   :  { %3613 = vst.msk [vmem:[%s6785_s2 + $0x4c8] sm:$0xf] %vm3306_vm3, %v3269_v27 }
 0x218   :  { %3356 = vst.msk [vmem:[%s6785_s2 + $0xc4] sm:$0xf] %vm3306_vm3, %v3012_v28 }
 0x219   :  { %3442 = vst.msk [vmem:[%s6785_s2 + $0x21c] sm:$0xf] %vm3306_vm3, %v3098_v29  ;;  %v2313_v30 = vpop.f32.mrf.mxu2  ;;  %v2528_v31 = vpop.f32.mrf.mxu3 }
 0x21a   :  { %v2841_v34 = vmax.f32 %v2313_v30, 0.0  ;;  %v2927_v35 = vmax.f32 %v2528_v31, 0.0  ;;  %v1886_v36 = vpop.f32.mrf.mxu0  ;;  %v2101_v37 = vpop.f32.mrf.mxu1  ;;  %v4640_v30 = vld [vmem:[%s6784_s0 + $0x3c8] sm:$0xff]  ;;  %v4683_v31 = vld [vmem:[%s6784_s0 + $0x520] sm:$0xff] }
 0x21b   :  { %v2670_v40 = vmax.f32 %v1886_v36, 0.0  ;;  %v2756_v41 = vmax.f32 %v2101_v37, 0.0 }
 0x21c   :  { %v3184_v42 = vpack.c.bf16 %v2841_v34, %v2841_v34  ;;  %v3270_v43 = vpack.c.bf16 %v2927_v35, %v2927_v35 }
 0x21d   :  { %v3013_v44 = vpack.c.bf16 %v2670_v40, %v2670_v40  ;;  %v3099_v45 = vpack.c.bf16 %v2756_v41, %v2756_v41  ;;  %4380 = vmatmul.msk.bf16.gmra.mxu0 %vm1228_vm2, %v4552_v32  ;;  %4423 = vmatmul.msk.bf16.gmra.mxu1 %vm1228_vm2, %v4595_v33 }
 0x21e   :  { %3528 = vst.msk [vmem:[%s6785_s2 + $0x374] sm:$0xf] %vm3306_vm3, %v3184_v42  ;;  %4466 = vmatmul.msk.bf16.gmra.mxu2 %vm1228_vm2, %v4638_v38  ;;  %4509 = vmatmul.msk.bf16.gmra.mxu3 %vm1228_vm2, %v4681_v39 }
 0x21f   :  { %3614 = vst.msk [vmem:[%s6785_s2 + $0x4cc] sm:$0xf] %vm3306_vm3, %v3270_v43 }
 0x220   :  { %3357 = vst.msk [vmem:[%s6785_s2 + $0xc8] sm:$0xf] %vm3306_vm3, %v3013_v44 }
 0x221   :  { %3443 = vst.msk [vmem:[%s6785_s2 + $0x220] sm:$0xf] %vm3306_vm3, %v3099_v45  ;;  %v2316_v46 = vpop.f32.mrf.mxu2  ;;  %v2531_v47 = vpop.f32.mrf.mxu3 }
 0x222   :  { %v2842_v48 = vmax.f32 %v2316_v46, 0.0  ;;  %v2928_v49 = vmax.f32 %v2531_v47, 0.0  ;;  %v1888_v50 = vpop.f32.mrf.mxu0  ;;  %v2103_v51 = vpop.f32.mrf.mxu1 }
 0x223   :  { %v2671_v52 = vmax.f32 %v1888_v50, 0.0  ;;  %v2757_v53 = vmax.f32 %v2103_v51, 0.0 }
 0x224   :  { %v3185_v54 = vpack.c.bf16 %v2842_v48, %v2842_v48  ;;  %v3271_v55 = vpack.c.bf16 %v2928_v49, %v2928_v49 }
 0x225   :  { %v3014_v56 = vpack.c.bf16 %v2671_v52, %v2671_v52  ;;  %v3100_v57 = vpack.c.bf16 %v2757_v53, %v2757_v53  ;;  %v4555_v52 = vld [vmem:[%s6784_s0 + $0x120] sm:$0xff]  ;;  %v4598_v53 = vld [vmem:[%s6784_s0 + $0x278] sm:$0xff] }
 0x226   :  { %3529 = vst.msk [vmem:[%s6785_s2 + $0x378] sm:$0xf] %vm3306_vm3, %v3185_v54 }
 0x227   :  { %3615 = vst.msk [vmem:[%s6785_s2 + $0x4d0] sm:$0xf] %vm3306_vm3, %v3271_v55 }
 0x228   :  { %3358 = vst.msk [vmem:[%s6785_s2 + $0xcc] sm:$0xf] %vm3306_vm3, %v3014_v56 }
 0x229   :  { %3444 = vst.msk [vmem:[%s6785_s2 + $0x224] sm:$0xf] %vm3306_vm3, %v3100_v57  ;;  %v2318_v58 = vpop.f32.mrf.mxu2  ;;  %v2533_v59 = vpop.f32.mrf.mxu3 }
 0x22a   :  { %v2843_v62 = vmax.f32 %v2318_v58, 0.0  ;;  %v2929_v63 = vmax.f32 %v2533_v59, 0.0  ;;  %v1891_v0 = vpop.f32.mrf.mxu0  ;;  %v2106_v1 = vpop.f32.mrf.mxu1  ;;  %v4641_v58 = vld [vmem:[%s6784_s0 + $0x3d0] sm:$0xff]  ;;  %v4684_v59 = vld [vmem:[%s6784_s0 + $0x528] sm:$0xff] }
 0x22b   :  { %v2672_v4 = vmax.f32 %v1891_v0, 0.0  ;;  %v2758_v5 = vmax.f32 %v2106_v1, 0.0 }
 0x22c   :  { %v3186_v6 = vpack.c.bf16 %v2843_v62, %v2843_v62  ;;  %v3272_v7 = vpack.c.bf16 %v2929_v63, %v2929_v63 }
 0x22d   :  { %v3015_v8 = vpack.c.bf16 %v2672_v4, %v2672_v4  ;;  %v3101_v9 = vpack.c.bf16 %v2758_v5, %v2758_v5  ;;  %4381 = vmatmul.msk.bf16.gmra.mxu0 %vm1228_vm2, %v4553_v60  ;;  %4424 = vmatmul.msk.bf16.gmra.mxu1 %vm1228_vm2, %v4596_v61 }
 0x22e   :  { %3530 = vst.msk [vmem:[%s6785_s2 + $0x37c] sm:$0xf] %vm3306_vm3, %v3186_v6  ;;  %4467 = vmatmul.msk.bf16.gmra.mxu2 %vm1228_vm2, %v4639_v2  ;;  %4510 = vmatmul.msk.bf16.gmra.mxu3 %vm1228_vm2, %v4682_v3 }
 0x22f   :  { %3616 = vst.msk [vmem:[%s6785_s2 + $0x4d4] sm:$0xf] %vm3306_vm3, %v3272_v7 }
 0x230   :  { %3359 = vst.msk [vmem:[%s6785_s2 + $0xd0] sm:$0xf] %vm3306_vm3, %v3015_v8 }
 0x231   :  { %3445 = vst.msk [vmem:[%s6785_s2 + $0x228] sm:$0xf] %vm3306_vm3, %v3101_v9  ;;  %v2321_v10 = vpop.f32.mrf.mxu2  ;;  %v2536_v11 = vpop.f32.mrf.mxu3 }
 0x232   :  { %v2844_v12 = vmax.f32 %v2321_v10, 0.0  ;;  %v2930_v13 = vmax.f32 %v2536_v11, 0.0  ;;  %v1893_v14 = vpop.f32.mrf.mxu0  ;;  %v2108_v15 = vpop.f32.mrf.mxu1 }
 0x233   :  { %v2673_v16 = vmax.f32 %v1893_v14, 0.0  ;;  %v2759_v17 = vmax.f32 %v2108_v15, 0.0 }
 0x234   :  { %v3187_v18 = vpack.c.bf16 %v2844_v12, %v2844_v12  ;;  %v3273_v19 = vpack.c.bf16 %v2930_v13, %v2930_v13 }
 0x235   :  { %v3016_v20 = vpack.c.bf16 %v2673_v16, %v2673_v16  ;;  %v3102_v21 = vpack.c.bf16 %v2759_v17, %v2759_v17  ;;  %v4556_v16 = vld [vmem:[%s6784_s0 + $0x128] sm:$0xff]  ;;  %v4599_v17 = vld [vmem:[%s6784_s0 + $0x280] sm:$0xff] }
 0x236   :  { %3531 = vst.msk [vmem:[%s6785_s2 + $0x380] sm:$0xf] %vm3306_vm3, %v3187_v18 }
 0x237   :  { %3617 = vst.msk [vmem:[%s6785_s2 + $0x4d8] sm:$0xf] %vm3306_vm3, %v3273_v19 }
 0x238   :  { %3360 = vst.msk [vmem:[%s6785_s2 + $0xd4] sm:$0xf] %vm3306_vm3, %v3016_v20 }
 0x239   :  { %3446 = vst.msk [vmem:[%s6785_s2 + $0x22c] sm:$0xf] %vm3306_vm3, %v3102_v21  ;;  %v2323_v22 = vpop.f32.mrf.mxu2  ;;  %v2538_v23 = vpop.f32.mrf.mxu3 }
 0x23a   :  { %v2845_v26 = vmax.f32 %v2323_v22, 0.0  ;;  %v2931_v27 = vmax.f32 %v2538_v23, 0.0  ;;  %v1896_v28 = vpop.f32.mrf.mxu0  ;;  %v2111_v29 = vpop.f32.mrf.mxu1  ;;  %v4642_v22 = vld [vmem:[%s6784_s0 + $0x3d8] sm:$0xff]  ;;  %v4685_v23 = vld [vmem:[%s6784_s0 + $0x530] sm:$0xff] }
 0x23b   :  { %v2674_v32 = vmax.f32 %v1896_v28, 0.0  ;;  %v2760_v33 = vmax.f32 %v2111_v29, 0.0 }
 0x23c   :  { %v3188_v34 = vpack.c.bf16 %v2845_v26, %v2845_v26  ;;  %v3274_v35 = vpack.c.bf16 %v2931_v27, %v2931_v27 }
 0x23d   :  { %v3017_v36 = vpack.c.bf16 %v2674_v32, %v2674_v32  ;;  %v3103_v37 = vpack.c.bf16 %v2760_v33, %v2760_v33  ;;  %4382 = vmatmul.msk.bf16.gmra.mxu0 %vm1228_vm2, %v4554_v24  ;;  %4425 = vmatmul.msk.bf16.gmra.mxu1 %vm1228_vm2, %v4597_v25 }
 0x23e   :  { %3532 = vst.msk [vmem:[%s6785_s2 + $0x384] sm:$0xf] %vm3306_vm3, %v3188_v34  ;;  %4468 = vmatmul.msk.bf16.gmra.mxu2 %vm1228_vm2, %v4640_v30  ;;  %4511 = vmatmul.msk.bf16.gmra.mxu3 %vm1228_vm2, %v4683_v31 }
 0x23f   :  { %3618 = vst.msk [vmem:[%s6785_s2 + $0x4dc] sm:$0xf] %vm3306_vm3, %v3274_v35 }
 0x240   :  { %3361 = vst.msk [vmem:[%s6785_s2 + $0xd8] sm:$0xf] %vm3306_vm3, %v3017_v36 }
 0x241   :  { %3447 = vst.msk [vmem:[%s6785_s2 + $0x230] sm:$0xf] %vm3306_vm3, %v3103_v37  ;;  %v2326_v38 = vpop.f32.mrf.mxu2  ;;  %v2541_v39 = vpop.f32.mrf.mxu3 }
 0x242   :  { %v2846_v40 = vmax.f32 %v2326_v38, 0.0  ;;  %v2932_v41 = vmax.f32 %v2541_v39, 0.0  ;;  %v1898_v42 = vpop.f32.mrf.mxu0  ;;  %v2113_v43 = vpop.f32.mrf.mxu1 }
 0x243   :  { %v2675_v44 = vmax.f32 %v1898_v42, 0.0  ;;  %v2761_v45 = vmax.f32 %v2113_v43, 0.0 }
 0x244   :  { %v3189_v46 = vpack.c.bf16 %v2846_v40, %v2846_v40  ;;  %v3275_v47 = vpack.c.bf16 %v2932_v41, %v2932_v41 }
 0x245   :  { %v3018_v48 = vpack.c.bf16 %v2675_v44, %v2675_v44  ;;  %v3104_v49 = vpack.c.bf16 %v2761_v45, %v2761_v45  ;;  %v4557_v44 = vld [vmem:[%s6784_s0 + $0x130] sm:$0xff]  ;;  %v4600_v45 = vld [vmem:[%s6784_s0 + $0x288] sm:$0xff] }
 0x246   :  { %3533 = vst.msk [vmem:[%s6785_s2 + $0x388] sm:$0xf] %vm3306_vm3, %v3189_v46 }
 0x247   :  { %3619 = vst.msk [vmem:[%s6785_s2 + $0x4e0] sm:$0xf] %vm3306_vm3, %v3275_v47 }
 0x248   :  { %3362 = vst.msk [vmem:[%s6785_s2 + $0xdc] sm:$0xf] %vm3306_vm3, %v3018_v48 }
 0x249   :  { %3448 = vst.msk [vmem:[%s6785_s2 + $0x234] sm:$0xf] %vm3306_vm3, %v3104_v49  ;;  %v2328_v50 = vpop.f32.mrf.mxu2  ;;  %v2543_v51 = vpop.f32.mrf.mxu3 }
 0x24a   :  { %v2847_v54 = vmax.f32 %v2328_v50, 0.0  ;;  %v2933_v55 = vmax.f32 %v2543_v51, 0.0  ;;  %v1901_v56 = vpop.f32.mrf.mxu0  ;;  %v2116_v57 = vpop.f32.mrf.mxu1  ;;  %v4643_v50 = vld [vmem:[%s6784_s0 + $0x3e0] sm:$0xff]  ;;  %v4686_v51 = vld [vmem:[%s6784_s0 + $0x538] sm:$0xff] }
 0x24b   :  { %v2676_v60 = vmax.f32 %v1901_v56, 0.0  ;;  %v2762_v61 = vmax.f32 %v2116_v57, 0.0 }
 0x24c   :  { %v3190_v62 = vpack.c.bf16 %v2847_v54, %v2847_v54  ;;  %v3276_v63 = vpack.c.bf16 %v2933_v55, %v2933_v55 }
 0x24d   :  { %v3019_v0 = vpack.c.bf16 %v2676_v60, %v2676_v60  ;;  %v3105_v1 = vpack.c.bf16 %v2762_v61, %v2762_v61  ;;  %4383 = vmatmul.msk.bf16.gmra.mxu0 %vm1228_vm2, %v4555_v52  ;;  %4426 = vmatmul.msk.bf16.gmra.mxu1 %vm1228_vm2, %v4598_v53 }
 0x24e   :  { %3534 = vst.msk [vmem:[%s6785_s2 + $0x38c] sm:$0xf] %vm3306_vm3, %v3190_v62  ;;  %4469 = vmatmul.msk.bf16.gmra.mxu2 %vm1228_vm2, %v4641_v58  ;;  %4512 = vmatmul.msk.bf16.gmra.mxu3 %vm1228_vm2, %v4684_v59 }
 0x24f   :  { %3620 = vst.msk [vmem:[%s6785_s2 + $0x4e4] sm:$0xf] %vm3306_vm3, %v3276_v63 }
 0x250   :  { %3363 = vst.msk [vmem:[%s6785_s2 + $0xe0] sm:$0xf] %vm3306_vm3, %v3019_v0 }
 0x251   :  { %3449 = vst.msk [vmem:[%s6785_s2 + $0x238] sm:$0xf] %vm3306_vm3, %v3105_v1  ;;  %v2331_v2 = vpop.f32.mrf.mxu2  ;;  %v2546_v3 = vpop.f32.mrf.mxu3 }
 0x252   :  { %v2848_v4 = vmax.f32 %v2331_v2, 0.0  ;;  %v2934_v5 = vmax.f32 %v2546_v3, 0.0  ;;  %v1903_v6 = vpop.f32.mrf.mxu0  ;;  %v2118_v7 = vpop.f32.mrf.mxu1 }
 0x253   :  { %v2677_v8 = vmax.f32 %v1903_v6, 0.0  ;;  %v2763_v9 = vmax.f32 %v2118_v7, 0.0 }
 0x254   :  { %v3191_v10 = vpack.c.bf16 %v2848_v4, %v2848_v4  ;;  %v3277_v11 = vpack.c.bf16 %v2934_v5, %v2934_v5 }
 0x255   :  { %v3020_v12 = vpack.c.bf16 %v2677_v8, %v2677_v8  ;;  %v3106_v13 = vpack.c.bf16 %v2763_v9, %v2763_v9  ;;  %v4558_v8 = vld [vmem:[%s6784_s0 + $0x138] sm:$0xff]  ;;  %v4601_v9 = vld [vmem:[%s6784_s0 + $0x290] sm:$0xff] }
 0x256   :  { %3535 = vst.msk [vmem:[%s6785_s2 + $0x390] sm:$0xf] %vm3306_vm3, %v3191_v10 }
 0x257   :  { %3621 = vst.msk [vmem:[%s6785_s2 + $0x4e8] sm:$0xf] %vm3306_vm3, %v3277_v11 }
 0x258   :  { %3364 = vst.msk [vmem:[%s6785_s2 + $0xe4] sm:$0xf] %vm3306_vm3, %v3020_v12 }
 0x259   :  { %3450 = vst.msk [vmem:[%s6785_s2 + $0x23c] sm:$0xf] %vm3306_vm3, %v3106_v13  ;;  %v2333_v14 = vpop.f32.mrf.mxu2  ;;  %v2548_v15 = vpop.f32.mrf.mxu3 }
 0x25a   :  { %v2849_v18 = vmax.f32 %v2333_v14, 0.0  ;;  %v2935_v19 = vmax.f32 %v2548_v15, 0.0  ;;  %v1906_v20 = vpop.f32.mrf.mxu0  ;;  %v2121_v21 = vpop.f32.mrf.mxu1  ;;  %v4644_v14 = vld [vmem:[%s6784_s0 + $0x3e8] sm:$0xff]  ;;  %v4687_v15 = vld [vmem:[%s6784_s0 + $0x540] sm:$0xff] }
 0x25b   :  { %v2678_v24 = vmax.f32 %v1906_v20, 0.0  ;;  %v2764_v25 = vmax.f32 %v2121_v21, 0.0 }
 0x25c   :  { %v3192_v26 = vpack.c.bf16 %v2849_v18, %v2849_v18  ;;  %v3278_v27 = vpack.c.bf16 %v2935_v19, %v2935_v19 }
 0x25d   :  { %v3021_v28 = vpack.c.bf16 %v2678_v24, %v2678_v24  ;;  %v3107_v29 = vpack.c.bf16 %v2764_v25, %v2764_v25  ;;  %4384 = vmatmul.msk.bf16.gmra.mxu0 %vm1228_vm2, %v4556_v16  ;;  %4427 = vmatmul.msk.bf16.gmra.mxu1 %vm1228_vm2, %v4599_v17 }
 0x25e   :  { %3536 = vst.msk [vmem:[%s6785_s2 + $0x394] sm:$0xf] %vm3306_vm3, %v3192_v26  ;;  %4470 = vmatmul.msk.bf16.gmra.mxu2 %vm1228_vm2, %v4642_v22  ;;  %4513 = vmatmul.msk.bf16.gmra.mxu3 %vm1228_vm2, %v4685_v23 }
 0x25f   :  { %3622 = vst.msk [vmem:[%s6785_s2 + $0x4ec] sm:$0xf] %vm3306_vm3, %v3278_v27 }
 0x260   :  { %3365 = vst.msk [vmem:[%s6785_s2 + $0xe8] sm:$0xf] %vm3306_vm3, %v3021_v28 }
 0x261   :  { %3451 = vst.msk [vmem:[%s6785_s2 + $0x240] sm:$0xf] %vm3306_vm3, %v3107_v29  ;;  %v2336_v30 = vpop.f32.mrf.mxu2  ;;  %v2551_v31 = vpop.f32.mrf.mxu3 }
 0x262   :  { %v2850_v32 = vmax.f32 %v2336_v30, 0.0  ;;  %v2936_v33 = vmax.f32 %v2551_v31, 0.0  ;;  %v1908_v34 = vpop.f32.mrf.mxu0  ;;  %v2123_v35 = vpop.f32.mrf.mxu1 }
 0x263   :  { %v2679_v36 = vmax.f32 %v1908_v34, 0.0  ;;  %v2765_v37 = vmax.f32 %v2123_v35, 0.0 }
 0x264   :  { %v3193_v38 = vpack.c.bf16 %v2850_v32, %v2850_v32  ;;  %v3279_v39 = vpack.c.bf16 %v2936_v33, %v2936_v33 }
 0x265   :  { %v3022_v40 = vpack.c.bf16 %v2679_v36, %v2679_v36  ;;  %v3108_v41 = vpack.c.bf16 %v2765_v37, %v2765_v37  ;;  %v4559_v36 = vld [vmem:[%s6784_s0 + $0x140] sm:$0xff]  ;;  %v4602_v37 = vld [vmem:[%s6784_s0 + $0x298] sm:$0xff] }
 0x266   :  { %3537 = vst.msk [vmem:[%s6785_s2 + $0x398] sm:$0xf] %vm3306_vm3, %v3193_v38 }
 0x267   :  { %3623 = vst.msk [vmem:[%s6785_s2 + $0x4f0] sm:$0xf] %vm3306_vm3, %v3279_v39 }
 0x268   :  { %3366 = vst.msk [vmem:[%s6785_s2 + $0xec] sm:$0xf] %vm3306_vm3, %v3022_v40 }
 0x269   :  { %3452 = vst.msk [vmem:[%s6785_s2 + $0x244] sm:$0xf] %vm3306_vm3, %v3108_v41  ;;  %v2338_v42 = vpop.f32.mrf.mxu2  ;;  %v2553_v43 = vpop.f32.mrf.mxu3 }
 0x26a   :  { %v2851_v46 = vmax.f32 %v2338_v42, 0.0  ;;  %v2937_v47 = vmax.f32 %v2553_v43, 0.0  ;;  %v1911_v48 = vpop.f32.mrf.mxu0  ;;  %v2126_v49 = vpop.f32.mrf.mxu1  ;;  %v4645_v42 = vld [vmem:[%s6784_s0 + $0x3f0] sm:$0xff]  ;;  %v4688_v43 = vld [vmem:[%s6784_s0 + $0x548] sm:$0xff] }
 0x26b   :  { %v2680_v52 = vmax.f32 %v1911_v48, 0.0  ;;  %v2766_v53 = vmax.f32 %v2126_v49, 0.0 }
 0x26c   :  { %v3194_v54 = vpack.c.bf16 %v2851_v46, %v2851_v46  ;;  %v3280_v55 = vpack.c.bf16 %v2937_v47, %v2937_v47 }
 0x26d   :  { %v3023_v56 = vpack.c.bf16 %v2680_v52, %v2680_v52  ;;  %v3109_v57 = vpack.c.bf16 %v2766_v53, %v2766_v53  ;;  %4385 = vmatmul.msk.bf16.gmra.mxu0 %vm1228_vm2, %v4557_v44  ;;  %4428 = vmatmul.msk.bf16.gmra.mxu1 %vm1228_vm2, %v4600_v45 }
 0x26e   :  { %3538 = vst.msk [vmem:[%s6785_s2 + $0x39c] sm:$0xf] %vm3306_vm3, %v3194_v54  ;;  %4471 = vmatmul.msk.bf16.gmra.mxu2 %vm1228_vm2, %v4643_v50  ;;  %4514 = vmatmul.msk.bf16.gmra.mxu3 %vm1228_vm2, %v4686_v51 }
 0x26f   :  { %3624 = vst.msk [vmem:[%s6785_s2 + $0x4f4] sm:$0xf] %vm3306_vm3, %v3280_v55 }
 0x270   :  { %3367 = vst.msk [vmem:[%s6785_s2 + $0xf0] sm:$0xf] %vm3306_vm3, %v3023_v56 }
 0x271   :  { %3453 = vst.msk [vmem:[%s6785_s2 + $0x248] sm:$0xf] %vm3306_vm3, %v3109_v57  ;;  %v2341_v58 = vpop.f32.mrf.mxu2  ;;  %v2556_v59 = vpop.f32.mrf.mxu3 }
 0x272   :  { %v2852_v60 = vmax.f32 %v2341_v58, 0.0  ;;  %v2938_v61 = vmax.f32 %v2556_v59, 0.0  ;;  %v1913_v62 = vpop.f32.mrf.mxu0  ;;  %v2128_v63 = vpop.f32.mrf.mxu1 }
 0x273   :  { %v2681_v0 = vmax.f32 %v1913_v62, 0.0  ;;  %v2767_v1 = vmax.f32 %v2128_v63, 0.0 }
 0x274   :  { %v3195_v2 = vpack.c.bf16 %v2852_v60, %v2852_v60  ;;  %v3281_v3 = vpack.c.bf16 %v2938_v61, %v2938_v61 }
 0x275   :  { %v3024_v4 = vpack.c.bf16 %v2681_v0, %v2681_v0  ;;  %v3110_v5 = vpack.c.bf16 %v2767_v1, %v2767_v1  ;;  %v4560_v0 = vld [vmem:[%s6784_s0 + $0x148] sm:$0xff]  ;;  %v4603_v1 = vld [vmem:[%s6784_s0 + $0x2a0] sm:$0xff] }
 0x276   :  { %3539 = vst.msk [vmem:[%s6785_s2 + $0x3a0] sm:$0xf] %vm3306_vm3, %v3195_v2 }
 0x277   :  { %3625 = vst.msk [vmem:[%s6785_s2 + $0x4f8] sm:$0xf] %vm3306_vm3, %v3281_v3 }
 0x278   :  { %3368 = vst.msk [vmem:[%s6785_s2 + $0xf4] sm:$0xf] %vm3306_vm3, %v3024_v4 }
 0x279   :  { %3454 = vst.msk [vmem:[%s6785_s2 + $0x24c] sm:$0xf] %vm3306_vm3, %v3110_v5  ;;  %v2343_v6 = vpop.f32.mrf.mxu2  ;;  %v2558_v7 = vpop.f32.mrf.mxu3 }
 0x27a   :  { %v2853_v10 = vmax.f32 %v2343_v6, 0.0  ;;  %v2939_v11 = vmax.f32 %v2558_v7, 0.0  ;;  %v1916_v12 = vpop.f32.mrf.mxu0  ;;  %v2131_v13 = vpop.f32.mrf.mxu1  ;;  %v4646_v6 = vld [vmem:[%s6784_s0 + $0x3f8] sm:$0xff]  ;;  %v4689_v7 = vld [vmem:[%s6784_s0 + $0x550] sm:$0xff] }
 0x27b   :  { %v2682_v16 = vmax.f32 %v1916_v12, 0.0  ;;  %v2768_v17 = vmax.f32 %v2131_v13, 0.0 }
 0x27c   :  { %v3196_v18 = vpack.c.bf16 %v2853_v10, %v2853_v10  ;;  %v3282_v19 = vpack.c.bf16 %v2939_v11, %v2939_v11 }
 0x27d   :  { %v3025_v20 = vpack.c.bf16 %v2682_v16, %v2682_v16  ;;  %v3111_v21 = vpack.c.bf16 %v2768_v17, %v2768_v17  ;;  %4386 = vmatmul.msk.bf16.gmra.mxu0 %vm1228_vm2, %v4558_v8  ;;  %4429 = vmatmul.msk.bf16.gmra.mxu1 %vm1228_vm2, %v4601_v9 }
 0x27e   :  { %3540 = vst.msk [vmem:[%s6785_s2 + $0x3a4] sm:$0xf] %vm3306_vm3, %v3196_v18  ;;  %4472 = vmatmul.msk.bf16.gmra.mxu2 %vm1228_vm2, %v4644_v14  ;;  %4515 = vmatmul.msk.bf16.gmra.mxu3 %vm1228_vm2, %v4687_v15 }
 0x27f   :  { %3626 = vst.msk [vmem:[%s6785_s2 + $0x4fc] sm:$0xf] %vm3306_vm3, %v3282_v19 }
 0x280   :  { %3369 = vst.msk [vmem:[%s6785_s2 + $0xf8] sm:$0xf] %vm3306_vm3, %v3025_v20 }
 0x281   :  { %3455 = vst.msk [vmem:[%s6785_s2 + $0x250] sm:$0xf] %vm3306_vm3, %v3111_v21  ;;  %v2346_v22 = vpop.f32.mrf.mxu2  ;;  %v2561_v23 = vpop.f32.mrf.mxu3 }
 0x282   :  { %v2854_v24 = vmax.f32 %v2346_v22, 0.0  ;;  %v2940_v25 = vmax.f32 %v2561_v23, 0.0  ;;  %v1918_v26 = vpop.f32.mrf.mxu0  ;;  %v2133_v27 = vpop.f32.mrf.mxu1  ;;  %v354_v22 = vld [vmem:[%s6784_s0 + $0x558] sm:$0x1] }
 0x283   :  { %v2683_v28 = vmax.f32 %v1918_v26, 0.0  ;;  %v2769_v29 = vmax.f32 %v2133_v27, 0.0  ;;  %v1044_v27 = vunpack.c.l.b16 %v354_v22 }
 0x284   :  { %v3197_v30 = vpack.c.bf16 %v2854_v24, %v2854_v24  ;;  %v3283_v31 = vpack.c.bf16 %v2940_v25, %v2940_v25 }
 0x285   :  { %v3026_v32 = vpack.c.bf16 %v2683_v28, %v2683_v28  ;;  %v3112_v33 = vpack.c.bf16 %v2769_v29, %v2769_v29 }
 0x286   :  { %3541 = vst.msk [vmem:[%s6785_s2 + $0x3a8] sm:$0xf] %vm3306_vm3, %v3197_v30  ;;  %v4561_v30 = vld [vmem:[%s6784_s0 + $0x150] sm:$0xff] }
 0x287   :  { %3627 = vst.msk [vmem:[%s6785_s2 + $0x500] sm:$0xf] %vm3306_vm3, %v3283_v31  ;;  %v4604_v31 = vld [vmem:[%s6784_s0 + $0x2a8] sm:$0xff] }
 0x288   :  { %3370 = vst.msk [vmem:[%s6785_s2 + $0xfc] sm:$0xf] %vm3306_vm3, %v3026_v32 }
 0x289   :  { %3456 = vst.msk [vmem:[%s6785_s2 + $0x254] sm:$0xf] %vm3306_vm3, %v3112_v33  ;;  %v2348_v34 = vpop.f32.mrf.mxu2  ;;  %v2563_v35 = vpop.f32.mrf.mxu3 }
 0x28a   :  { %v2855_v38 = vmax.f32 %v2348_v34, 0.0  ;;  %v2941_v39 = vmax.f32 %v2563_v35, 0.0  ;;  %v1921_v40 = vpop.f32.mrf.mxu0  ;;  %v2136_v41 = vpop.f32.mrf.mxu1 }
 0x28b   :  { %v2684_v44 = vmax.f32 %v1921_v40, 0.0  ;;  %v2770_v45 = vmax.f32 %v2136_v41, 0.0 }
 0x28c   :  { %v3198_v46 = vpack.c.bf16 %v2855_v38, %v2855_v38  ;;  %v3284_v47 = vpack.c.bf16 %v2941_v39, %v2941_v39 }
 0x28d   :  { %v3027_v48 = vpack.c.bf16 %v2684_v44, %v2684_v44  ;;  %v3113_v49 = vpack.c.bf16 %v2770_v45, %v2770_v45  ;;  %4387 = vmatmul.msk.bf16.gmra.mxu0 %vm1228_vm2, %v4559_v36  ;;  %4430 = vmatmul.msk.bf16.gmra.mxu1 %vm1228_vm2, %v4602_v37  ;;  %v4647_v36 = vld [vmem:[%s6784_s0 + $0x400] sm:$0xff]  ;;  %v1216_v37 = vpack.c.b16 %v1044_v27, %v1044_v27 }
 0x28e   :  { %3542 = vst.msk [vmem:[%s6785_s2 + $0x3ac] sm:$0xf] %vm3306_vm3, %v3198_v46  ;;  %4473 = vmatmul.msk.bf16.gmra.mxu2 %vm1228_vm2, %v4645_v42  ;;  %4516 = vmatmul.msk.bf16.gmra.mxu3 %vm1228_vm2, %v4688_v43 }
 0x28f   :  { %3628 = vst.msk [vmem:[%s6785_s2 + $0x504] sm:$0xf] %vm3306_vm3, %v3284_v47 }
 0x290   :  { %3371 = vst.msk [vmem:[%s6785_s2 + $0x100] sm:$0xf] %vm3306_vm3, %v3027_v48 }
 0x291   :  { %3457 = vst.msk [vmem:[%s6785_s2 + $0x258] sm:$0xf] %vm3306_vm3, %v3113_v49  ;;  %v2351_v50 = vpop.f32.mrf.mxu2  ;;  %v2566_v51 = vpop.f32.mrf.mxu3 }
 0x292   :  { %v2856_v52 = vmax.f32 %v2351_v50, 0.0  ;;  %v2942_v53 = vmax.f32 %v2566_v51, 0.0  ;;  %v1923_v54 = vpop.f32.mrf.mxu0  ;;  %v2138_v55 = vpop.f32.mrf.mxu1 }
 0x293   :  { %v2685_v56 = vmax.f32 %v1923_v54, 0.0  ;;  %v2771_v57 = vmax.f32 %v2138_v55, 0.0 }
 0x294   :  { %v3199_v58 = vpack.c.bf16 %v2856_v52, %v2856_v52  ;;  %v3285_v59 = vpack.c.bf16 %v2942_v53, %v2942_v53 }
 0x295   :  { %v3028_v60 = vpack.c.bf16 %v2685_v56, %v2685_v56  ;;  %v3114_v61 = vpack.c.bf16 %v2771_v57, %v2771_v57 }
 0x296   :  { %3543 = vst.msk [vmem:[%s6785_s2 + $0x3b0] sm:$0xf] %vm3306_vm3, %v3199_v58 }
 0x297   :  { %3629 = vst.msk [vmem:[%s6785_s2 + $0x508] sm:$0xf] %vm3306_vm3, %v3285_v59 }
 0x298   :  { %3372 = vst.msk [vmem:[%s6785_s2 + $0x104] sm:$0xf] %vm3306_vm3, %v3028_v60 }
 0x299   :  { %3458 = vst.msk [vmem:[%s6785_s2 + $0x25c] sm:$0xf] %vm3306_vm3, %v3114_v61  ;;  %v2353_v62 = vpop.f32.mrf.mxu2  ;;  %v2568_v63 = vpop.f32.mrf.mxu3 }
 0x29a   :  { %v2857_v2 = vmax.f32 %v2353_v62, 0.0  ;;  %v2943_v3 = vmax.f32 %v2568_v63, 0.0  ;;  %v1926_v4 = vpop.f32.mrf.mxu0  ;;  %v2141_v5 = vpop.f32.mrf.mxu1 }
 0x29b   :  { %v2686_v8 = vmax.f32 %v1926_v4, 0.0  ;;  %v2772_v9 = vmax.f32 %v2141_v5, 0.0 }
 0x29c   :  { %v3200_v10 = vpack.c.bf16 %v2857_v2, %v2857_v2  ;;  %v3286_v11 = vpack.c.bf16 %v2943_v3, %v2943_v3 }
 0x29d   :  { %v3029_v12 = vpack.c.bf16 %v2686_v8, %v2686_v8  ;;  %v3115_v13 = vpack.c.bf16 %v2772_v9, %v2772_v9  ;;  %4388 = vmatmul.msk.bf16.gmra.mxu0 %vm1228_vm2, %v4560_v0  ;;  %4431 = vmatmul.msk.bf16.gmra.mxu1 %vm1228_vm2, %v4603_v1 }
 0x29e   :  { %3544 = vst.msk [vmem:[%s6785_s2 + $0x3b4] sm:$0xf] %vm3306_vm3, %v3200_v10  ;;  %4474 = vmatmul.msk.bf16.gmra.mxu2 %vm1228_vm2, %v4646_v6  ;;  %4517 = vmatmul.msk.bf16.gmra.mxu3 %vm1228_vm2, %v4689_v7 }
 0x29f   :  { %3630 = vst.msk [vmem:[%s6785_s2 + $0x50c] sm:$0xf] %vm3306_vm3, %v3286_v11 }
 0x2a0   :  { %3373 = vst.msk [vmem:[%s6785_s2 + $0x108] sm:$0xf] %vm3306_vm3, %v3029_v12 }
 0x2a1   :  { %3459 = vst.msk [vmem:[%s6785_s2 + $0x260] sm:$0xf] %vm3306_vm3, %v3115_v13  ;;  %v2356_v14 = vpop.f32.mrf.mxu2  ;;  %v2571_v15 = vpop.f32.mrf.mxu3 }
 0x2a2   :  { %v2858_v16 = vmax.f32 %v2356_v14, 0.0  ;;  %v2944_v17 = vmax.f32 %v2571_v15, 0.0  ;;  %v1928_v18 = vpop.f32.mrf.mxu0  ;;  %v2143_v19 = vpop.f32.mrf.mxu1 }
 0x2a3   :  { %v2687_v20 = vmax.f32 %v1928_v18, 0.0  ;;  %v2773_v21 = vmax.f32 %v2143_v19, 0.0 }
 0x2a4   :  { %v3201_v23 = vpack.c.bf16 %v2858_v16, %v2858_v16  ;;  %v3287_v24 = vpack.c.bf16 %v2944_v17, %v2944_v17 }
 0x2a5   :  { %v3030_v25 = vpack.c.bf16 %v2687_v20, %v2687_v20  ;;  %v3116_v26 = vpack.c.bf16 %v2773_v21, %v2773_v21 }
 0x2a6   :  { %3545 = vst.msk [vmem:[%s6785_s2 + $0x3b8] sm:$0xf] %vm3306_vm3, %v3201_v23 }
 0x2a7   :  { %3631 = vst.msk [vmem:[%s6785_s2 + $0x510] sm:$0xf] %vm3306_vm3, %v3287_v24 }
 0x2a8   :  { %3374 = vst.msk [vmem:[%s6785_s2 + $0x10c] sm:$0xf] %vm3306_vm3, %v3030_v25 }
 0x2a9   :  { %3460 = vst.msk [vmem:[%s6785_s2 + $0x264] sm:$0xf] %vm3306_vm3, %v3116_v26  ;;  %v2358_v28 = vpop.f32.mrf.mxu2  ;;  %v2573_v29 = vpop.f32.mrf.mxu3 }
 0x2aa   :  { %v2859_v32 = vmax.f32 %v2358_v28, 0.0  ;;  %v2945_v33 = vmax.f32 %v2573_v29, 0.0  ;;  %v1931_v34 = vpop.f32.mrf.mxu0  ;;  %v2146_v35 = vpop.f32.mrf.mxu1 }
 0x2ab   :  { %v2688_v38 = vmax.f32 %v1931_v34, 0.0  ;;  %v2774_v39 = vmax.f32 %v2146_v35, 0.0 }
 0x2ac   :  { %v3202_v40 = vpack.c.bf16 %v2859_v32, %v2859_v32  ;;  %v3288_v41 = vpack.c.bf16 %v2945_v33, %v2945_v33 }
 0x2ad   :  { %v3031_v42 = vpack.c.bf16 %v2688_v38, %v2688_v38  ;;  %v3117_v43 = vpack.c.bf16 %v2774_v39, %v2774_v39  ;;  %4389 = vmatmul.msk.bf16.gmra.mxu0 %vm1228_vm2, %v4561_v30  ;;  %4432 = vmatmul.msk.bf16.gmra.mxu1 %vm1228_vm2, %v4604_v31 }
 0x2ae   :  { %3546 = vst.msk [vmem:[%s6785_s2 + $0x3bc] sm:$0xf] %vm3306_vm3, %v3202_v40  ;;  %4475 = vmatmul.msk.bf16.gmra.mxu2 %vm1228_vm2, %v4647_v36  ;;  %4518 = vmatmul.msk.bf16.gmra.mxu3 %vm1228_vm2, %v1216_v37 }
 0x2af   :  { %3632 = vst.msk [vmem:[%s6785_s2 + $0x514] sm:$0xf] %vm3306_vm3, %v3288_v41 }
 0x2b0   :  { %3375 = vst.msk [vmem:[%s6785_s2 + $0x110] sm:$0xf] %vm3306_vm3, %v3031_v42 }
 0x2b1   :  { %3461 = vst.msk [vmem:[%s6785_s2 + $0x268] sm:$0xf] %vm3306_vm3, %v3117_v43  ;;  %v2361_v44 = vpop.f32.mrf.mxu2  ;;  %v2576_v45 = vpop.f32.mrf.mxu3 }
 0x2b2   :  { %v2860_v46 = vmax.f32 %v2361_v44, 0.0  ;;  %v2946_v47 = vmax.f32 %v2576_v45, 0.0  ;;  %v1933_v48 = vpop.f32.mrf.mxu0  ;;  %v2148_v49 = vpop.f32.mrf.mxu1 }
 0x2b3   :  { %v2689_v50 = vmax.f32 %v1933_v48, 0.0  ;;  %v2775_v51 = vmax.f32 %v2148_v49, 0.0 }
 0x2b4   :  { %v3203_v52 = vpack.c.bf16 %v2860_v46, %v2860_v46  ;;  %v3289_v53 = vpack.c.bf16 %v2946_v47, %v2946_v47 }
 0x2b5   :  { %v3032_v54 = vpack.c.bf16 %v2689_v50, %v2689_v50  ;;  %v3118_v55 = vpack.c.bf16 %v2775_v51, %v2775_v51 }
 0x2b6   :  { %3547 = vst.msk [vmem:[%s6785_s2 + $0x3c0] sm:$0xf] %vm3306_vm3, %v3203_v52 }
 0x2b7   :  { %3633 = vst.msk [vmem:[%s6785_s2 + $0x518] sm:$0xf] %vm3306_vm3, %v3289_v53 }
 0x2b8   :  { %3376 = vst.msk [vmem:[%s6785_s2 + $0x114] sm:$0xf] %vm3306_vm3, %v3032_v54 }
 0x2b9   :  { %3462 = vst.msk [vmem:[%s6785_s2 + $0x26c] sm:$0xf] %vm3306_vm3, %v3118_v55  ;;  %v2363_v56 = vpop.f32.mrf.mxu2  ;;  %v2578_v57 = vpop.f32.mrf.mxu3 }
 0x2ba   :  { %v2861_v58 = vmax.f32 %v2363_v56, 0.0  ;;  %v2947_v59 = vmax.f32 %v2578_v57, 0.0  ;;  %v1936_v60 = vpop.f32.mrf.mxu0  ;;  %v2151_v61 = vpop.f32.mrf.mxu1 }
 0x2bb   :  { %v2690_v62 = vmax.f32 %v1936_v60, 0.0  ;;  %v2776_v63 = vmax.f32 %v2151_v61, 0.0 }
 0x2bc   :  { %v3204_v0 = vpack.c.bf16 %v2861_v58, %v2861_v58  ;;  %v3290_v1 = vpack.c.bf16 %v2947_v59, %v2947_v59 }
 0x2bd   :  { %v3033_v2 = vpack.c.bf16 %v2690_v62, %v2690_v62  ;;  %v3119_v3 = vpack.c.bf16 %v2776_v63, %v2776_v63 }
 0x2be   :  { %3548 = vst.msk [vmem:[%s6785_s2 + $0x3c4] sm:$0xf] %vm3306_vm3, %v3204_v0 }
 0x2bf   :  { %3634 = vst.msk [vmem:[%s6785_s2 + $0x51c] sm:$0xf] %vm3306_vm3, %v3290_v1 }
 0x2c0   :  { %3377 = vst.msk [vmem:[%s6785_s2 + $0x118] sm:$0xf] %vm3306_vm3, %v3033_v2 }
 0x2c1   :  { %3463 = vst.msk [vmem:[%s6785_s2 + $0x270] sm:$0xf] %vm3306_vm3, %v3119_v3  ;;  %v2366_v4 = vpop.f32.mrf.mxu2  ;;  %v2581_v5 = vpop.f32.mrf.mxu3 }
 0x2c2   :  { %v2862_v6 = vmax.f32 %v2366_v4, 0.0  ;;  %v2948_v7 = vmax.f32 %v2581_v5, 0.0  ;;  %v1938_v8 = vpop.f32.mrf.mxu0  ;;  %v2153_v9 = vpop.f32.mrf.mxu1 }
 0x2c3   :  { %v2691_v10 = vmax.f32 %v1938_v8, 0.0  ;;  %v2777_v11 = vmax.f32 %v2153_v9, 0.0 }
 0x2c4   :  { %v3205_v12 = vpack.c.bf16 %v2862_v6, %v2862_v6  ;;  %v3291_v13 = vpack.c.bf16 %v2948_v7, %v2948_v7 }
 0x2c5   :  { %v3034_v14 = vpack.c.bf16 %v2691_v10, %v2691_v10  ;;  %v3120_v15 = vpack.c.bf16 %v2777_v11, %v2777_v11 }
 0x2c6   :  { %3549 = vst.msk [vmem:[%s6785_s2 + $0x3c8] sm:$0xf] %vm3306_vm3, %v3205_v12 }
 0x2c7   :  { %3635 = vst.msk [vmem:[%s6785_s2 + $0x520] sm:$0xf] %vm3306_vm3, %v3291_v13 }
 0x2c8   :  { %3378 = vst.msk [vmem:[%s6785_s2 + $0x11c] sm:$0xf] %vm3306_vm3, %v3034_v14 }
 0x2c9   :  { %3464 = vst.msk [vmem:[%s6785_s2 + $0x274] sm:$0xf] %vm3306_vm3, %v3120_v15  ;;  %v2368_v16 = vpop.f32.mrf.mxu2  ;;  %v2583_v17 = vpop.f32.mrf.mxu3 }
 0x2ca   :  { %v2863_v18 = vmax.f32 %v2368_v16, 0.0  ;;  %v2949_v19 = vmax.f32 %v2583_v17, 0.0  ;;  %v1941_v20 = vpop.f32.mrf.mxu0  ;;  %v2156_v21 = vpop.f32.mrf.mxu1 }
 0x2cb   :  { %v2692_v22 = vmax.f32 %v1941_v20, 0.0  ;;  %v2778_v23 = vmax.f32 %v2156_v21, 0.0 }
 0x2cc   :  { %v3206_v24 = vpack.c.bf16 %v2863_v18, %v2863_v18  ;;  %v3292_v25 = vpack.c.bf16 %v2949_v19, %v2949_v19 }
 0x2cd   :  { %v3035_v26 = vpack.c.bf16 %v2692_v22, %v2692_v22  ;;  %v3121_v27 = vpack.c.bf16 %v2778_v23, %v2778_v23 }
 0x2ce   :  { %3550 = vst.msk [vmem:[%s6785_s2 + $0x3cc] sm:$0xf] %vm3306_vm3, %v3206_v24 }
 0x2cf   :  { %3636 = vst.msk [vmem:[%s6785_s2 + $0x524] sm:$0xf] %vm3306_vm3, %v3292_v25 }
 0x2d0   :  { %3379 = vst.msk [vmem:[%s6785_s2 + $0x120] sm:$0xf] %vm3306_vm3, %v3035_v26 }
 0x2d1   :  { %3465 = vst.msk [vmem:[%s6785_s2 + $0x278] sm:$0xf] %vm3306_vm3, %v3121_v27  ;;  %v2371_v28 = vpop.f32.mrf.mxu2  ;;  %v2586_v29 = vpop.f32.mrf.mxu3 }
 0x2d2   :  { %v2864_v30 = vmax.f32 %v2371_v28, 0.0  ;;  %v2950_v31 = vmax.f32 %v2586_v29, 0.0  ;;  %v1943_v32 = vpop.f32.mrf.mxu0  ;;  %v2158_v33 = vpop.f32.mrf.mxu1 }
 0x2d3   :  { %v2693_v34 = vmax.f32 %v1943_v32, 0.0  ;;  %v2779_v35 = vmax.f32 %v2158_v33, 0.0 }
 0x2d4   :  { %v3207_v36 = vpack.c.bf16 %v2864_v30, %v2864_v30  ;;  %v3293_v37 = vpack.c.bf16 %v2950_v31, %v2950_v31 }
 0x2d5   :  { %v3036_v38 = vpack.c.bf16 %v2693_v34, %v2693_v34  ;;  %v3122_v39 = vpack.c.bf16 %v2779_v35, %v2779_v35 }
 0x2d6   :  { %3551 = vst.msk [vmem:[%s6785_s2 + $0x3d0] sm:$0xf] %vm3306_vm3, %v3207_v36 }
 0x2d7   :  { %3637 = vst.msk [vmem:[%s6785_s2 + $0x528] sm:$0xf] %vm3306_vm3, %v3293_v37 }
 0x2d8   :  { %3380 = vst.msk [vmem:[%s6785_s2 + $0x124] sm:$0xf] %vm3306_vm3, %v3036_v38 }
 0x2d9   :  { %3466 = vst.msk [vmem:[%s6785_s2 + $0x27c] sm:$0xf] %vm3306_vm3, %v3122_v39  ;;  %v2373_v40 = vpop.f32.mrf.mxu2  ;;  %v2588_v41 = vpop.f32.mrf.mxu3 }
 0x2da   :  { %v2865_v42 = vmax.f32 %v2373_v40, 0.0  ;;  %v2951_v43 = vmax.f32 %v2588_v41, 0.0  ;;  %v1946_v44 = vpop.f32.mrf.mxu0  ;;  %v2161_v45 = vpop.f32.mrf.mxu1 }
 0x2db   :  { %v2694_v46 = vmax.f32 %v1946_v44, 0.0  ;;  %v2780_v47 = vmax.f32 %v2161_v45, 0.0 }
 0x2dc   :  { %v3208_v48 = vpack.c.bf16 %v2865_v42, %v2865_v42  ;;  %v3294_v49 = vpack.c.bf16 %v2951_v43, %v2951_v43 }
 0x2dd   :  { %v3037_v50 = vpack.c.bf16 %v2694_v46, %v2694_v46  ;;  %v3123_v51 = vpack.c.bf16 %v2780_v47, %v2780_v47 }
 0x2de   :  { %3552 = vst.msk [vmem:[%s6785_s2 + $0x3d4] sm:$0xf] %vm3306_vm3, %v3208_v48 }
 0x2df   :  { %3638 = vst.msk [vmem:[%s6785_s2 + $0x52c] sm:$0xf] %vm3306_vm3, %v3294_v49 }
 0x2e0   :  { %3381 = vst.msk [vmem:[%s6785_s2 + $0x128] sm:$0xf] %vm3306_vm3, %v3037_v50 }
 0x2e1   :  { %3467 = vst.msk [vmem:[%s6785_s2 + $0x280] sm:$0xf] %vm3306_vm3, %v3123_v51  ;;  %v2376_v52 = vpop.f32.mrf.mxu2  ;;  %v2591_v53 = vpop.f32.mrf.mxu3 }
 0x2e2   :  { %v2866_v54 = vmax.f32 %v2376_v52, 0.0  ;;  %v2952_v55 = vmax.f32 %v2591_v53, 0.0  ;;  %v1948_v56 = vpop.f32.mrf.mxu0  ;;  %v2163_v57 = vpop.f32.mrf.mxu1 }
 0x2e3   :  { %v2695_v58 = vmax.f32 %v1948_v56, 0.0  ;;  %v2781_v59 = vmax.f32 %v2163_v57, 0.0 }
 0x2e4   :  { %v3209_v60 = vpack.c.bf16 %v2866_v54, %v2866_v54  ;;  %v3295_v61 = vpack.c.bf16 %v2952_v55, %v2952_v55 }
 0x2e5   :  { %v3038_v62 = vpack.c.bf16 %v2695_v58, %v2695_v58  ;;  %v3124_v63 = vpack.c.bf16 %v2781_v59, %v2781_v59 }
 0x2e6   :  { %3553 = vst.msk [vmem:[%s6785_s2 + $0x3d8] sm:$0xf] %vm3306_vm3, %v3209_v60 }
 0x2e7   :  { %3639 = vst.msk [vmem:[%s6785_s2 + $0x530] sm:$0xf] %vm3306_vm3, %v3295_v61 }
 0x2e8   :  { %3382 = vst.msk [vmem:[%s6785_s2 + $0x12c] sm:$0xf] %vm3306_vm3, %v3038_v62 }
 0x2e9   :  { %3468 = vst.msk [vmem:[%s6785_s2 + $0x284] sm:$0xf] %vm3306_vm3, %v3124_v63  ;;  %v2378_v0 = vpop.f32.mrf.mxu2  ;;  %v2593_v1 = vpop.f32.mrf.mxu3 }
 0x2ea   :  { %v2867_v2 = vmax.f32 %v2378_v0, 0.0  ;;  %v2953_v3 = vmax.f32 %v2593_v1, 0.0  ;;  %v1951_v4 = vpop.f32.mrf.mxu0  ;;  %v2166_v5 = vpop.f32.mrf.mxu1 }
 0x2eb   :  { %v2696_v6 = vmax.f32 %v1951_v4, 0.0  ;;  %v2782_v7 = vmax.f32 %v2166_v5, 0.0 }
 0x2ec   :  { %v3210_v8 = vpack.c.bf16 %v2867_v2, %v2867_v2  ;;  %v3296_v9 = vpack.c.bf16 %v2953_v3, %v2953_v3 }
 0x2ed   :  { %v3039_v10 = vpack.c.bf16 %v2696_v6, %v2696_v6  ;;  %v3125_v11 = vpack.c.bf16 %v2782_v7, %v2782_v7 }
 0x2ee   :  { %3554 = vst.msk [vmem:[%s6785_s2 + $0x3dc] sm:$0xf] %vm3306_vm3, %v3210_v8 }
 0x2ef   :  { %3640 = vst.msk [vmem:[%s6785_s2 + $0x534] sm:$0xf] %vm3306_vm3, %v3296_v9 }
 0x2f0   :  { %3383 = vst.msk [vmem:[%s6785_s2 + $0x130] sm:$0xf] %vm3306_vm3, %v3039_v10 }
 0x2f1   :  { %3469 = vst.msk [vmem:[%s6785_s2 + $0x288] sm:$0xf] %vm3306_vm3, %v3125_v11  ;;  %v2381_v12 = vpop.f32.mrf.mxu2  ;;  %v2596_v13 = vpop.f32.mrf.mxu3 }
 0x2f2   :  { %v2868_v14 = vmax.f32 %v2381_v12, 0.0  ;;  %v2954_v15 = vmax.f32 %v2596_v13, 0.0  ;;  %v1953_v16 = vpop.f32.mrf.mxu0  ;;  %v2168_v17 = vpop.f32.mrf.mxu1 }
 0x2f3   :  { %v2697_v18 = vmax.f32 %v1953_v16, 0.0  ;;  %v2783_v19 = vmax.f32 %v2168_v17, 0.0 }
 0x2f4   :  { %v3211_v20 = vpack.c.bf16 %v2868_v14, %v2868_v14  ;;  %v3297_v21 = vpack.c.bf16 %v2954_v15, %v2954_v15 }
 0x2f5   :  { %v3040_v22 = vpack.c.bf16 %v2697_v18, %v2697_v18  ;;  %v3126_v23 = vpack.c.bf16 %v2783_v19, %v2783_v19 }
 0x2f6   :  { %3555 = vst.msk [vmem:[%s6785_s2 + $0x3e0] sm:$0xf] %vm3306_vm3, %v3211_v20 }
 0x2f7   :  { %3641 = vst.msk [vmem:[%s6785_s2 + $0x538] sm:$0xf] %vm3306_vm3, %v3297_v21 }
 0x2f8   :  { %3384 = vst.msk [vmem:[%s6785_s2 + $0x134] sm:$0xf] %vm3306_vm3, %v3040_v22 }
 0x2f9   :  { %3470 = vst.msk [vmem:[%s6785_s2 + $0x28c] sm:$0xf] %vm3306_vm3, %v3126_v23  ;;  %v2383_v24 = vpop.f32.mrf.mxu2  ;;  %v2598_v25 = vpop.f32.mrf.mxu3 }
 0x2fa   :  { %v2869_v26 = vmax.f32 %v2383_v24, 0.0  ;;  %v2955_v27 = vmax.f32 %v2598_v25, 0.0  ;;  %v1956_v28 = vpop.f32.mrf.mxu0  ;;  %v2171_v29 = vpop.f32.mrf.mxu1 }
 0x2fb   :  { %v2698_v30 = vmax.f32 %v1956_v28, 0.0  ;;  %v2784_v31 = vmax.f32 %v2171_v29, 0.0 }
 0x2fc   :  { %v3212_v32 = vpack.c.bf16 %v2869_v26, %v2869_v26  ;;  %v3298_v33 = vpack.c.bf16 %v2955_v27, %v2955_v27 }
 0x2fd   :  { %v3041_v34 = vpack.c.bf16 %v2698_v30, %v2698_v30  ;;  %v3127_v35 = vpack.c.bf16 %v2784_v31, %v2784_v31 }
 0x2fe   :  { %3556 = vst.msk [vmem:[%s6785_s2 + $0x3e4] sm:$0xf] %vm3306_vm3, %v3212_v32 }
 0x2ff   :  { %3642 = vst.msk [vmem:[%s6785_s2 + $0x53c] sm:$0xf] %vm3306_vm3, %v3298_v33 }
 0x300   :  { %3385 = vst.msk [vmem:[%s6785_s2 + $0x138] sm:$0xf] %vm3306_vm3, %v3041_v34 }
 0x301   :  { %3471 = vst.msk [vmem:[%s6785_s2 + $0x290] sm:$0xf] %vm3306_vm3, %v3127_v35  ;;  %v2386_v36 = vpop.f32.mrf.mxu2  ;;  %v2601_v37 = vpop.f32.mrf.mxu3 }
 0x302   :  { %v2870_v38 = vmax.f32 %v2386_v36, 0.0  ;;  %v2956_v39 = vmax.f32 %v2601_v37, 0.0  ;;  %v1958_v40 = vpop.f32.mrf.mxu0  ;;  %v2173_v41 = vpop.f32.mrf.mxu1 }
 0x303   :  { %v2699_v42 = vmax.f32 %v1958_v40, 0.0  ;;  %v2785_v43 = vmax.f32 %v2173_v41, 0.0 }
 0x304   :  { %v3213_v44 = vpack.c.bf16 %v2870_v38, %v2870_v38  ;;  %v3299_v45 = vpack.c.bf16 %v2956_v39, %v2956_v39 }
 0x305   :  { %v3042_v46 = vpack.c.bf16 %v2699_v42, %v2699_v42  ;;  %v3128_v47 = vpack.c.bf16 %v2785_v43, %v2785_v43 }
 0x306   :  { %3557 = vst.msk [vmem:[%s6785_s2 + $0x3e8] sm:$0xf] %vm3306_vm3, %v3213_v44 }
 0x307   :  { %3643 = vst.msk [vmem:[%s6785_s2 + $0x540] sm:$0xf] %vm3306_vm3, %v3299_v45 }
 0x308   :  { %3386 = vst.msk [vmem:[%s6785_s2 + $0x13c] sm:$0xf] %vm3306_vm3, %v3042_v46 }
 0x309   :  { %3472 = vst.msk [vmem:[%s6785_s2 + $0x294] sm:$0xf] %vm3306_vm3, %v3128_v47  ;;  %v2388_v48 = vpop.f32.mrf.mxu2  ;;  %v2603_v49 = vpop.f32.mrf.mxu3 }
 0x30a   :  { %v2871_v50 = vmax.f32 %v2388_v48, 0.0  ;;  %v2957_v51 = vmax.f32 %v2603_v49, 0.0  ;;  %v1961_v52 = vpop.f32.mrf.mxu0  ;;  %v2176_v53 = vpop.f32.mrf.mxu1 }
 0x30b   :  { %v2700_v54 = vmax.f32 %v1961_v52, 0.0  ;;  %v2786_v55 = vmax.f32 %v2176_v53, 0.0 }
 0x30c   :  { %v3214_v56 = vpack.c.bf16 %v2871_v50, %v2871_v50  ;;  %v3300_v57 = vpack.c.bf16 %v2957_v51, %v2957_v51 }
 0x30d   :  { %v3043_v58 = vpack.c.bf16 %v2700_v54, %v2700_v54  ;;  %v3129_v59 = vpack.c.bf16 %v2786_v55, %v2786_v55 }
 0x30e   :  { %3558 = vst.msk [vmem:[%s6785_s2 + $0x3ec] sm:$0xf] %vm3306_vm3, %v3214_v56 }
 0x30f   :  { %3644 = vst.msk [vmem:[%s6785_s2 + $0x544] sm:$0xf] %vm3306_vm3, %v3300_v57 }
 0x310   :  { %3387 = vst.msk [vmem:[%s6785_s2 + $0x140] sm:$0xf] %vm3306_vm3, %v3043_v58 }
 0x311   :  { %3473 = vst.msk [vmem:[%s6785_s2 + $0x298] sm:$0xf] %vm3306_vm3, %v3129_v59  ;;  %v2391_v60 = vpop.f32.mrf.mxu2  ;;  %v2606_v61 = vpop.f32.mrf.mxu3 }
 0x312   :  { %v2872_v62 = vmax.f32 %v2391_v60, 0.0  ;;  %v2958_v63 = vmax.f32 %v2606_v61, 0.0  ;;  %v1963_v0 = vpop.f32.mrf.mxu0  ;;  %v2178_v1 = vpop.f32.mrf.mxu1 }
 0x313   :  { %v2701_v2 = vmax.f32 %v1963_v0, 0.0  ;;  %v2787_v3 = vmax.f32 %v2178_v1, 0.0 }
 0x314   :  { %v3215_v4 = vpack.c.bf16 %v2872_v62, %v2872_v62  ;;  %v3301_v5 = vpack.c.bf16 %v2958_v63, %v2958_v63 }
 0x315   :  { %v3044_v6 = vpack.c.bf16 %v2701_v2, %v2701_v2  ;;  %v3130_v7 = vpack.c.bf16 %v2787_v3, %v2787_v3 }
 0x316   :  { %3559 = vst.msk [vmem:[%s6785_s2 + $0x3f0] sm:$0xf] %vm3306_vm3, %v3215_v4 }
 0x317   :  { %3645 = vst.msk [vmem:[%s6785_s2 + $0x548] sm:$0xf] %vm3306_vm3, %v3301_v5 }
 0x318   :  { %3388 = vst.msk [vmem:[%s6785_s2 + $0x144] sm:$0xf] %vm3306_vm3, %v3044_v6 }
 0x319   :  { %3474 = vst.msk [vmem:[%s6785_s2 + $0x29c] sm:$0xf] %vm3306_vm3, %v3130_v7  ;;  %v2393_v8 = vpop.f32.mrf.mxu2  ;;  %v2608_v9 = vpop.f32.mrf.mxu3 }
 0x31a   :  { %v2873_v10 = vmax.f32 %v2393_v8, 0.0  ;;  %v2959_v11 = vmax.f32 %v2608_v9, 0.0  ;;  %v1966_v12 = vpop.f32.mrf.mxu0  ;;  %v2181_v13 = vpop.f32.mrf.mxu1 }
 0x31b   :  { %v2702_v14 = vmax.f32 %v1966_v12, 0.0  ;;  %v2788_v15 = vmax.f32 %v2181_v13, 0.0 }
 0x31c   :  { %v3216_v16 = vpack.c.bf16 %v2873_v10, %v2873_v10  ;;  %v3302_v17 = vpack.c.bf16 %v2959_v11, %v2959_v11 }
 0x31d   :  { %v3045_v18 = vpack.c.bf16 %v2702_v14, %v2702_v14  ;;  %v3131_v19 = vpack.c.bf16 %v2788_v15, %v2788_v15 }
 0x31e   :  { %3560 = vst.msk [vmem:[%s6785_s2 + $0x3f4] sm:$0xf] %vm3306_vm3, %v3216_v16 }
 0x31f   :  { %3646 = vst.msk [vmem:[%s6785_s2 + $0x54c] sm:$0xf] %vm3306_vm3, %v3302_v17 }
 0x320   :  { %3389 = vst.msk [vmem:[%s6785_s2 + $0x148] sm:$0xf] %vm3306_vm3, %v3045_v18 }
 0x321   :  { %3475 = vst.msk [vmem:[%s6785_s2 + $0x2a0] sm:$0xf] %vm3306_vm3, %v3131_v19  ;;  %v2396_v20 = vpop.f32.mrf.mxu2  ;;  %v2611_v21 = vpop.f32.mrf.mxu3 }
 0x322   :  { %v2874_v22 = vmax.f32 %v2396_v20, 0.0  ;;  %v2960_v23 = vmax.f32 %v2611_v21, 0.0  ;;  %v1968_v24 = vpop.f32.mrf.mxu0  ;;  %v2183_v25 = vpop.f32.mrf.mxu1 }
 0x323   :  { %v2703_v26 = vmax.f32 %v1968_v24, 0.0  ;;  %v2789_v27 = vmax.f32 %v2183_v25, 0.0 }
 0x324   :  { %v3217_v28 = vpack.c.bf16 %v2874_v22, %v2874_v22  ;;  %v3303_v29 = vpack.c.bf16 %v2960_v23, %v2960_v23 }
 0x325   :  { %v3046_v30 = vpack.c.bf16 %v2703_v26, %v2703_v26  ;;  %v3132_v31 = vpack.c.bf16 %v2789_v27, %v2789_v27 }
 0x326   :  { %3561 = vst.msk [vmem:[%s6785_s2 + $0x3f8] sm:$0xf] %vm3306_vm3, %v3217_v28 }
 0x327   :  { %3647 = vst.msk [vmem:[%s6785_s2 + $0x550] sm:$0xf] %vm3306_vm3, %v3303_v29 }
 0x328   :  { %3390 = vst.msk [vmem:[%s6785_s2 + $0x14c] sm:$0xf] %vm3306_vm3, %v3046_v30 }
 0x329   :  { %3476 = vst.msk [vmem:[%s6785_s2 + $0x2a4] sm:$0xf] %vm3306_vm3, %v3132_v31  ;;  %v2398_v32 = vpop.f32.mrf.mxu2  ;;  %v2613_v33 = vpop.f32.mrf.mxu3 }
 0x32a   :  { %v2875_v34 = vmax.f32 %v2398_v32, 0.0  ;;  %v2961_v35 = vmax.f32 %v2613_v33, 0.0  ;;  %v1971_v36 = vpop.f32.mrf.mxu0  ;;  %v2186_v37 = vpop.f32.mrf.mxu1 }
 0x32b   :  { %v2704_v38 = vmax.f32 %v1971_v36, 0.0  ;;  %v2790_v39 = vmax.f32 %v2186_v37, 0.0 }
 0x32c   :  { %v3218_v40 = vpack.c.bf16 %v2875_v34, %v2875_v34  ;;  %v3304_v41 = vpack.c.bf16 %v2961_v35, %v2961_v35 }
 0x32d   :  { %v3047_v42 = vpack.c.bf16 %v2704_v38, %v2704_v38  ;;  %v3133_v43 = vpack.c.bf16 %v2790_v39, %v2790_v39 }
 0x32e   :  { %3562 = vst.msk [vmem:[%s6785_s2 + $0x3fc] sm:$0xf] %vm3306_vm3, %v3218_v40 }
 0x32f   :  { %3648 = vst.msk [vmem:[%s6785_s2 + $0x554] sm:$0xf] %vm3306_vm3, %v3304_v41 }
 0x330   :  { %3391 = vst.msk [vmem:[%s6785_s2 + $0x150] sm:$0xf] %vm3306_vm3, %v3047_v42 }
 0x331   :  { %3477 = vst.msk [vmem:[%s6785_s2 + $0x2a8] sm:$0xf] %vm3306_vm3, %v3133_v43  ;;  %v2401_v44 = vpop.f32.mrf.mxu2  ;;  %v2616_v45 = vpop.f32.mrf.mxu3 }
 0x332   :  { %v2876_v46 = vmax.f32 %v2401_v44, 0.0  ;;  %v2962_v47 = vmax.f32 %v2616_v45, 0.0  ;;  %v1973_v48 = vpop.f32.mrf.mxu0  ;;  %v2188_v49 = vpop.f32.mrf.mxu1 }
 0x333   :  { %v2705_v50 = vmax.f32 %v1973_v48, 0.0  ;;  %v2791_v51 = vmax.f32 %v2188_v49, 0.0 }
 0x334   :  { %v3219_v52 = vpack.c.bf16 %v2876_v46, %v2876_v46  ;;  %v3305_v53 = vpack.c.bf16 %v2962_v47, %v2962_v47 }
 0x335   :  { %v3048_v54 = vpack.c.bf16 %v2705_v50, %v2705_v50  ;;  %v3134_v55 = vpack.c.bf16 %v2791_v51, %v2791_v51 }
 0x336   :  { %3563 = vst.msk [vmem:[%s6785_s2 + $0x400] sm:$0xf] %vm3306_vm3, %v3219_v52 }
 0x337   :  { %3650 = vst.msk [vmem:[%s6785_s2 + $0x558] sm:$0x1] %vm3649_vm4, %v3305_v53 }
 0x338   :  { %3392 = vst.msk [vmem:[%s6785_s2 + $0x154] sm:$0xf] %vm3306_vm3, %v3048_v54 }
 0x339   :  { %3478 = vst.msk [vmem:[%s6785_s2 + $0x2ac] sm:$0xf] %vm3306_vm3, %v3134_v55  ;;  %v2403_v56 = vpop.f32.mrf.mxu2  ;;  %v2618_v57 = vpop.f32.mrf.mxu3 }
 0x33a   :  { %v2877_v58 = vmax.f32 %v2403_v56, 0.0 }
 0x33c   :  { %v3220_v59 = vpack.c.bf16 %v2877_v58, %v2877_v58 }
 0x33e   :  { %3564 = vst.msk [vmem:[%s6785_s2 + $0x404] sm:$0xf] %vm3306_vm3, %v3220_v59 }

</bundles_post_ra>
